<compile_context>
chip_gen: v7x
topology: tpu7x:2x2x1
jax: 0.10.0
libtpu: 0.0.40
codegen_flags: <defaults>
</compile_context>

<pallas_src>
import functools

import numpy as np
import jax
import jax.numpy as jnp
from jax import lax
from jax.experimental import pallas as pl
from jax.experimental.pallas import tpu as pltpu


def _round_up(x, m):
    return (x + m - 1) // m * m


def cgs_node_feat_kernel(rtw_ref, xj_ref, gp_ref, wcat_ref, o_ref, *, KS, ODk):
    # rtw : (T, 3K) f32       -- [rho | theta | graph edge weights], lane-packed
    # xj  : (T*K, C)          -- gathered neighbour feats (bf16 production, f32 for checks)
    # gp  : (4, KS) f32 SMEM  -- rows = [mean_rho, mean_theta,
    #                                    -0.5/(1e-14+prec_rho^2), -0.5/(1e-14+prec_theta^2)]
    # wcat: (C, OUT_PAD)      -- per-kernel Linear weights concatenated along output columns
    # o   : (T, OUT_PAD) f32
    T = rtw_ref.shape[0]
    K = rtw_ref.shape[1] // 3
    OUT = KS * ODk
    OUT_PAD = o_ref.shape[1]

    rtw = rtw_ref[...]
    rho = rtw[:, 0:K]
    theta = rtw[:, K:2 * K]
    gw = rtw[:, 2 * K:3 * K]

    # Gaussian edge weights per kernel, computed on narrow (T, K) tiles with SMEM scalar
    # parameters (no (T, K*KS) lane-replicated concats, no VPU divides).
    ws = []
    wsum = None
    for ks in range(KS):                                     # KS is small & static -> unrolled
        mr, mt = gp_ref[0, ks], gp_ref[1, ks]
        nhr, nht = gp_ref[2, ks], gp_ref[3, ks]
        w_rho = jnp.exp((rho - mr) ** 2 * nhr)
        first_angle = jnp.abs(theta - mt)
        second_angle = jnp.abs(2.0 * np.pi - first_angle)
        w_theta = jnp.exp(jnp.minimum(first_angle, second_angle) ** 2 * nht)
        w = w_rho * w_theta
        w = jnp.where(jnp.isnan(w), 0.0, w)                  # weights[w != w] = 0
        ws.append(w)
        wsum = w if wsum is None else wsum + w

    # Normalise over the KS kernels, fold in the graph edge weights.  Exact divide: the
    # approx reciprocal cost the 2e-3 numerics budget last round and only K lanes pay it.
    # eps guards an all-underflow row (torch would emit NaN there); elsewhere a no-op.
    scale = gw / (wsum + 1e-30)                              # (T, K)

    # Project-first: one dense MXU matmul of all gathered neighbour features against the
    # concatenated per-kernel weights (bf16 xj feeds the MXU directly, no block-diagonal
    # zeros), then a single cheap weighted reduction over the K neighbours per kernel.
    prec = (lax.Precision.HIGHEST if xj_ref.dtype == jnp.float32
            else lax.Precision.DEFAULT)
    y = jnp.dot(xj_ref[...], wcat_ref[...], precision=prec,
                preferred_element_type=jnp.float32)          # (T*K, OUT_PAD) f32 accum
    y3 = y.reshape(T, K, OUT_PAD)                            # free: K matches sublane grouping

    outs = []
    for ks in range(KS):
        wn = ws[ks] * scale                                  # (T, K) normalised edge weights
        yk = y3[:, :, ks * ODk:(ks + 1) * ODk]               # (T, K, ODk) static lane slice
        outs.append(jnp.sum(wn[:, :, None] * yk, axis=1))    # (T, ODk)
    if OUT_PAD > OUT:
        outs.append(jnp.zeros((T, OUT_PAD - OUT), jnp.float32))
    out = jnp.concatenate(outs, axis=-1)                     # (T, OUT_PAD) lane-dense store
    o_ref[...] = jnp.maximum(out, 0.0)                       # ReLU


def cgs_node_feat(node_feats, centers, nbr_idx, graph_w, params, *,
                  tile=512, feat_dtype=jnp.bfloat16):
    """params = (mean_rho, mean_theta, prec_rho, prec_theta, w_stack)
       mean_*/prec_*: (1, KS);  w_stack: (KS, C, ODk) (already-transposed Linear weights)."""
    B, N, C = node_feats.shape
    BN = B * N
    K = nbr_idx.shape[-1]
    mr, mt, pr, pt, w_stack = params
    KS, _, ODk = w_stack.shape
    OUT = KS * ODk
    OUT_PAD = _round_up(OUT, 128)                  # lane-dense output stores

    cent_flat = centers.reshape(BN, 2).astype(jnp.float32)
    idx = nbr_idx.reshape(BN, K)

    # compute_pseudo (glue): per-edge centre difference -> (rho, theta)
    dis = cent_flat[:, None, :] - cent_flat[idx]             # (BN, K, 2) centre_i - centre_j
    dx, dy = dis[..., 0], dis[..., 1]
    rho = jnp.sqrt(dx * dx + dy * dy)                        # (BN, K)
    theta = jnp.arctan2(dx, dy)                              # matches torch.atan2(coord_x, coord_y)
    gw = graph_w.reshape(BN, K).astype(jnp.float32)
    rtw = jnp.concatenate([rho, theta, gw], axis=1)          # (BN, 3K): ONE packed small input

    # Tile selection: big tiles amortise per-step overhead, but keep >= ~8 grid steps so the
    # single 'parallel' axis still occupies both v7x TensorCores on small graphs.
    tile = max(8, min(tile, BN))
    tile = min(tile, max(8, _round_up(pl.cdiv(BN, 8), 8)))
    tile = _round_up(tile, 8)
    bn_pad = _round_up(BN, tile)

    # Pad the SMALL 2-D arrays before the gather (never jnp.pad the dominant xj stream).
    if bn_pad != BN:
        pad = bn_pad - BN
        rtw = jnp.pad(rtw, ((0, pad), (0, 0)))
        idx = jnp.pad(idx, ((0, pad), (0, 0)))               # pad rows gather node 0; discarded

    # Neighbour-feature gather (XLA) from bf16 feats: halves the dominant HBM stream both on
    # the gather writeback and the kernel read; shipped lane-dense as 2-D (bn_pad*K, C).
    # TODO(synk): for graphs whose (BN, C) feature table fits VMEM, gather in-kernel from a
    # resident feats block (index_map lambda i: (0, 0)) to remove this HBM round trip entirely.
    feats_flat = node_feats.reshape(BN, C).astype(feat_dtype)
    xj = feats_flat[idx].reshape(bn_pad * K, C)              # (bn_pad*K, C) feat_dtype

    # Gaussian parameters as SMEM scalars, with -0.5/(1e-14 + precision^2) prefolded.
    gp = jnp.stack([mr.reshape(KS), mt.reshape(KS),
                    (-0.5 / (1e-14 + pr ** 2)).reshape(KS),
                    (-0.5 / (1e-14 + pt ** 2)).reshape(KS)], axis=0).astype(jnp.float32)

    # Per-kernel Linear weights concatenated along output columns (no block-diag zeros),
    # padded to OUT_PAD lanes, same dtype as xj so the MXU runs bf16-native in production.
    wcat = jnp.concatenate([w_stack[k] for k in range(KS)], axis=1)          # (C, OUT)
    wcat = jnp.pad(wcat.astype(jnp.float32), ((0, 0), (0, OUT_PAD - OUT))).astype(feat_dtype)

    kernel = functools.partial(cgs_node_feat_kernel, KS=KS, ODk=ODk)
    out = pl.pallas_call(
        kernel,
        out_shape=jax.ShapeDtypeStruct((bn_pad, OUT_PAD), jnp.float32),
        grid_spec=pltpu.PrefetchScalarGridSpec(
            num_scalar_prefetch=0,
            grid=(bn_pad // tile,),
            in_specs=[
                pl.BlockSpec((tile, 3 * K), lambda i: (i, 0)),         # packed rho|theta|gw
                pl.BlockSpec((tile * K, C), lambda i: (i, 0)),         # gathered neighbour feats
                pl.BlockSpec(memory_space=pltpu.MemorySpace.SMEM),     # gaussian params (scalars)
                pl.BlockSpec((C, OUT_PAD), lambda i: (0, 0)),          # concatenated Linear weights
            ],
            out_specs=pl.BlockSpec((tile, OUT_PAD), lambda i: (i, 0)),
        ),
        compiler_params=pltpu.CompilerParams(
            dimension_semantics=("parallel",)),
    )(rtw, xj, gp, wcat)

    return out[:BN, :OUT].reshape(B, N, OUT)


def reference(node_feats, centers, nbr_idx, graph_w, params):
    """Pure-JAX mirror of the torch forward (for validation)."""
    B, N, C = node_feats.shape
    BN = B * N
    K = nbr_idx.shape[-1]
    mr, mt, pr, pt, w_stack = params
    KS = w_stack.shape[0]
    hi = lax.Precision.HIGHEST

    feats_flat = node_feats.reshape(BN, C)
    cent_flat = centers.reshape(BN, 2)
    idx = nbr_idx.reshape(BN, K)

    dis = (cent_flat[:, None, :] - cent_flat[idx]).reshape(-1, 2)    # (E, 2)
    coord_x, coord_y = dis[:, 0:1], dis[:, 1:2]
    rho = jnp.sqrt(coord_x ** 2 + coord_y ** 2)                      # (E, 1)
    theta = jnp.arctan2(coord_x, coord_y)                            # (E, 1)

    diff = (rho - mr) ** 2
    w_rho = jnp.exp(-0.5 * diff / (1e-14 + pr ** 2))
    fa = jnp.abs(theta - mt)
    sa = jnp.abs(2 * np.pi - fa)
    w_theta = jnp.exp(-0.5 * jnp.minimum(fa, sa) ** 2 / (1e-14 + pt ** 2))
    w = w_rho * w_theta
    w = jnp.where(jnp.isnan(w), 0.0, w)
    w = w / (jnp.sum(w, axis=1, keepdims=True) + 1e-30)              # same eps as kernel
    ew = graph_w * w                                                 # use_graph_weights

    ew = ew.reshape(BN, K, KS).transpose(0, 2, 1)                    # (BN, KS, K)
    xj = feats_flat[idx]                                             # (BN, K, C)
    agg = jnp.einsum('nsk,nkc->nsc', ew, xj, precision=hi).reshape(B, N, KS, C)
    outs = [jnp.dot(agg[:, :, k], w_stack[k], precision=hi) for k in range(KS)]
    return jnp.maximum(jnp.concatenate(outs, axis=-1), 0.0)


if __name__ == "__main__":
    B, N, C = 4, 64, 128         # batch, nodes, node_dim
    K = 8                        # top-k neighbours per node
    KS = 4                       # kernel_size (from method "...^4")
    OUT = 128                    # out_dim
    ODk = OUT // KS
    BN = B * N

    key = jax.random.PRNGKey(0)
    ks_ = jax.random.split(key, 9)

    # parameters (deterministic, mimicking reset_parameters + Linear default init)
    mean_rho = jax.random.uniform(ks_[0], (1, KS), minval=0.0, maxval=1.0)
    mean_theta = jax.random.uniform(ks_[1], (1, KS), minval=-np.pi, maxval=np.pi)
    prec_rho = jax.random.uniform(ks_[2], (1, KS), minval=0.0, maxval=1.0)
    prec_theta = jax.random.uniform(ks_[3], (1, KS), minval=0.0, maxval=1.0)
    bound = 1.0 / np.sqrt(C)
    w_lin = jax.random.uniform(ks_[4], (KS, ODk, C), minval=-bound, maxval=bound)
    w_stack = jnp.transpose(w_lin, (0, 2, 1)).astype(jnp.float32)    # (KS, C, ODk)
    params = (mean_rho.astype(jnp.float32), mean_theta.astype(jnp.float32),
              prec_rho.astype(jnp.float32), prec_theta.astype(jnp.float32), w_stack)

    # synthetic graph inputs
    node_feats = jax.random.normal(ks_[5], (B, N, C), dtype=jnp.float32)
    centers = jax.random.uniform(ks_[6], (B, N, 2), dtype=jnp.float32)
    graph_w = jax.random.uniform(ks_[7], (BN * K, 1), minval=0.1, maxval=1.0,
                                 dtype=jnp.float32)
    # deterministic top-k neighbour indices (flat into B*N, within the same batch)
    n_ar = np.arange(N)[:, None]
    m_ar = np.arange(K)[None, :]
    nbr = (n_ar + m_ar + 1) % N                                      # (N, K)
    nbr_idx = jnp.asarray(
        (np.arange(B)[:, None, None] * N + nbr[None]).reshape(BN, K), dtype=jnp.int32)

    ref = jax.block_until_ready(reference(node_feats, centers, nbr_idx, graph_w, params))

    # 1) f32 feature path: exact-math check against the pure-JAX reference.
    out_f32 = jax.block_until_ready(
        cgs_node_feat(node_feats, centers, nbr_idx, graph_w, params,
                      tile=512, feat_dtype=jnp.float32))
    np.testing.assert_allclose(np.asarray(out_f32), np.asarray(ref), rtol=2e-3, atol=2e-3)

    # 2) bf16 feature/weight storage (production default): apples-to-apples check against
    #    the same reference evaluated on bf16-quantised features/weights, plus a looser
    #    sanity check against the full-precision reference.
    out_bf16 = jax.block_until_ready(
        cgs_node_feat(node_feats, centers, nbr_idx, graph_w, params, tile=512))
    q = lambda x: x.astype(jnp.bfloat16).astype(jnp.float32)
    ref_q = jax.block_until_ready(
        reference(q(node_feats), centers, nbr_idx, graph_w,
                  (params[0], params[1], params[2], params[3], q(w_stack))))
    np.testing.assert_allclose(np.asarray(out_bf16), np.asarray(ref_q), rtol=5e-3, atol=5e-3)
    np.testing.assert_allclose(np.asarray(out_bf16), np.asarray(ref), rtol=5e-2, atol=5e-2)

    print("KERNEL_OK")
</pallas_src>

<mosaic_0001>
module attributes {stable_mosaic.version = 11 : i64} {
  func.func @cgs_node_feat_kernel(%arg0: i32, %arg1: memref<32x24xf32, #tpu.memory_space<vmem>>, %arg2: memref<256x128xf32, #tpu.memory_space<vmem>>, %arg3: memref<4x4xf32, #tpu.memory_space<smem>>, %arg4: memref<128x128xf32, #tpu.memory_space<vmem>>, %arg5: memref<32x128xf32, #tpu.memory_space<vmem>>) attributes {dimension_semantics = [#tpu.dimension_semantics<parallel>], iteration_bounds = array<i64: 8>, scalar_prefetch = 0 : i64, scratch_operands = 0 : i64, tpu.core_type = #tpu.core_type<tc>, window_params = [{transform_indices = @transform_0, window_bounds = array<i64: 32, 24>}, {transform_indices = @transform_1, window_bounds = array<i64: 256, 128>}, {transform_indices = @transform_2, window_bounds = array<i64: 4, 4>}, {pipeline_mode = #tpu.pipeline_mode<synchronous>, transform_indices = @transform_3, window_bounds = array<i64: 128, 128>}, {transform_indices = @transform_4, window_bounds = array<i64: 32, 128>}]} {
    %c0 = arith.constant 0 : index
    %c0_0 = arith.constant 0 : index
    %0 = vector.load %arg1[%c0, %c0_0] : memref<32x24xf32, #tpu.memory_space<vmem>>, vector<32x24xf32>
    %1 = vector.extract_strided_slice %0 {offsets = [0, 0], sizes = [32, 8], strides = [1, 1]} : vector<32x24xf32> to vector<32x8xf32>
    %2 = vector.extract_strided_slice %0 {offsets = [0, 8], sizes = [32, 8], strides = [1, 1]} : vector<32x24xf32> to vector<32x8xf32>
    %3 = vector.extract_strided_slice %0 {offsets = [0, 16], sizes = [32, 8], strides = [1, 1]} : vector<32x24xf32> to vector<32x8xf32>
    %c0_1 = arith.constant 0 : index
    %c0_2 = arith.constant 0 : index
    %4 = memref.load %arg3[%c0_1, %c0_2] : memref<4x4xf32, #tpu.memory_space<smem>>
    %c1 = arith.constant 1 : index
    %c0_3 = arith.constant 0 : index
    %5 = memref.load %arg3[%c1, %c0_3] : memref<4x4xf32, #tpu.memory_space<smem>>
    %c2 = arith.constant 2 : index
    %c0_4 = arith.constant 0 : index
    %6 = memref.load %arg3[%c2, %c0_4] : memref<4x4xf32, #tpu.memory_space<smem>>
    %c3 = arith.constant 3 : index
    %c0_5 = arith.constant 0 : index
    %7 = memref.load %arg3[%c3, %c0_5] : memref<4x4xf32, #tpu.memory_space<smem>>
    %8 = vector.broadcast %4 : f32 to vector<32x8xf32>
    %9 = arith.subf %1, %8 : vector<32x8xf32>
    %10 = arith.mulf %9, %9 : vector<32x8xf32>
    %11 = vector.broadcast %6 : f32 to vector<32x8xf32>
    %12 = arith.mulf %10, %11 : vector<32x8xf32>
    %13 = math.exp %12 : vector<32x8xf32>
    %14 = vector.broadcast %5 : f32 to vector<32x8xf32>
    %15 = arith.subf %2, %14 : vector<32x8xf32>
    %16 = math.absf %15 : vector<32x8xf32>
    %cst = arith.constant 6.28318548 : f32
    %17 = vector.broadcast %cst : f32 to vector<32x8xf32>
    %18 = arith.subf %17, %16 : vector<32x8xf32>
    %19 = math.absf %18 : vector<32x8xf32>
    %20 = arith.minimumf %16, %19 : vector<32x8xf32>
    %21 = arith.mulf %20, %20 : vector<32x8xf32>
    %22 = vector.broadcast %7 : f32 to vector<32x8xf32>
    %23 = arith.mulf %21, %22 : vector<32x8xf32>
    %24 = math.exp %23 : vector<32x8xf32>
    %25 = arith.mulf %13, %24 : vector<32x8xf32>
    %26 = arith.cmpf one, %25, %25 : vector<32x8xf32>
    %cst_6 = arith.constant 0.000000e+00 : f32
    %27 = vector.broadcast %cst_6 : f32 to vector<32x8xf32>
    %28 = arith.select %26, %27, %25 : vector<32x8xi1>, vector<32x8xf32>
    %c0_7 = arith.constant 0 : index
    %c1_8 = arith.constant 1 : index
    %29 = memref.load %arg3[%c0_7, %c1_8] : memref<4x4xf32, #tpu.memory_space<smem>>
    %c1_9 = arith.constant 1 : index
    %c1_10 = arith.constant 1 : index
    %30 = memref.load %arg3[%c1_9, %c1_10] : memref<4x4xf32, #tpu.memory_space<smem>>
    %c2_11 = arith.constant 2 : index
    %c1_12 = arith.constant 1 : index
    %31 = memref.load %arg3[%c2_11, %c1_12] : memref<4x4xf32, #tpu.memory_space<smem>>
    %c3_13 = arith.constant 3 : index
    %c1_14 = arith.constant 1 : index
    %32 = memref.load %arg3[%c3_13, %c1_14] : memref<4x4xf32, #tpu.memory_space<smem>>
    %33 = vector.broadcast %29 : f32 to vector<32x8xf32>
    %34 = arith.subf %1, %33 : vector<32x8xf32>
    %35 = arith.mulf %34, %34 : vector<32x8xf32>
    %36 = vector.broadcast %31 : f32 to vector<32x8xf32>
    %37 = arith.mulf %35, %36 : vector<32x8xf32>
    %38 = math.exp %37 : vector<32x8xf32>
    %39 = vector.broadcast %30 : f32 to vector<32x8xf32>
    %40 = arith.subf %2, %39 : vector<32x8xf32>
    %41 = math.absf %40 : vector<32x8xf32>
    %cst_15 = arith.constant 6.28318548 : f32
    %42 = vector.broadcast %cst_15 : f32 to vector<32x8xf32>
    %43 = arith.subf %42, %41 : vector<32x8xf32>
    %44 = math.absf %43 : vector<32x8xf32>
    %45 = arith.minimumf %41, %44 : vector<32x8xf32>
    %46 = arith.mulf %45, %45 : vector<32x8xf32>
    %47 = vector.broadcast %32 : f32 to vector<32x8xf32>
    %48 = arith.mulf %46, %47 : vector<32x8xf32>
    %49 = math.exp %48 : vector<32x8xf32>
    %50 = arith.mulf %38, %49 : vector<32x8xf32>
    %51 = arith.cmpf one, %50, %50 : vector<32x8xf32>
    %cst_16 = arith.constant 0.000000e+00 : f32
    %52 = vector.broadcast %cst_16 : f32 to vector<32x8xf32>
    %53 = arith.select %51, %52, %50 : vector<32x8xi1>, vector<32x8xf32>
    %54 = arith.addf %28, %53 : vector<32x8xf32>
    %c0_17 = arith.constant 0 : index
    %c2_18 = arith.constant 2 : index
    %55 = memref.load %arg3[%c0_17, %c2_18] : memref<4x4xf32, #tpu.memory_space<smem>>
    %c1_19 = arith.constant 1 : index
    %c2_20 = arith.constant 2 : index
    %56 = memref.load %arg3[%c1_19, %c2_20] : memref<4x4xf32, #tpu.memory_space<smem>>
    %c2_21 = arith.constant 2 : index
    %c2_22 = arith.constant 2 : index
    %57 = memref.load %arg3[%c2_21, %c2_22] : memref<4x4xf32, #tpu.memory_space<smem>>
    %c3_23 = arith.constant 3 : index
    %c2_24 = arith.constant 2 : index
    %58 = memref.load %arg3[%c3_23, %c2_24] : memref<4x4xf32, #tpu.memory_space<smem>>
    %59 = vector.broadcast %55 : f32 to vector<32x8xf32>
    %60 = arith.subf %1, %59 : vector<32x8xf32>
    %61 = arith.mulf %60, %60 : vector<32x8xf32>
    %62 = vector.broadcast %57 : f32 to vector<32x8xf32>
    %63 = arith.mulf %61, %62 : vector<32x8xf32>
    %64 = math.exp %63 : vector<32x8xf32>
    %65 = vector.broadcast %56 : f32 to vector<32x8xf32>
    %66 = arith.subf %2, %65 : vector<32x8xf32>
    %67 = math.absf %66 : vector<32x8xf32>
    %cst_25 = arith.constant 6.28318548 : f32
    %68 = vector.broadcast %cst_25 : f32 to vector<32x8xf32>
    %69 = arith.subf %68, %67 : vector<32x8xf32>
    %70 = math.absf %69 : vector<32x8xf32>
    %71 = arith.minimumf %67, %70 : vector<32x8xf32>
    %72 = arith.mulf %71, %71 : vector<32x8xf32>
    %73 = vector.broadcast %58 : f32 to vector<32x8xf32>
    %74 = arith.mulf %72, %73 : vector<32x8xf32>
    %75 = math.exp %74 : vector<32x8xf32>
    %76 = arith.mulf %64, %75 : vector<32x8xf32>
    %77 = arith.cmpf one, %76, %76 : vector<32x8xf32>
    %cst_26 = arith.constant 0.000000e+00 : f32
    %78 = vector.broadcast %cst_26 : f32 to vector<32x8xf32>
    %79 = arith.select %77, %78, %76 : vector<32x8xi1>, vector<32x8xf32>
    %80 = arith.addf %54, %79 : vector<32x8xf32>
    %c0_27 = arith.constant 0 : index
    %c3_28 = arith.constant 3 : index
    %81 = memref.load %arg3[%c0_27, %c3_28] : memref<4x4xf32, #tpu.memory_space<smem>>
    %c1_29 = arith.constant 1 : index
    %c3_30 = arith.constant 3 : index
    %82 = memref.load %arg3[%c1_29, %c3_30] : memref<4x4xf32, #tpu.memory_space<smem>>
    %c2_31 = arith.constant 2 : index
    %c3_32 = arith.constant 3 : index
    %83 = memref.load %arg3[%c2_31, %c3_32] : memref<4x4xf32, #tpu.memory_space<smem>>
    %c3_33 = arith.constant 3 : index
    %c3_34 = arith.constant 3 : index
    %84 = memref.load %arg3[%c3_33, %c3_34] : memref<4x4xf32, #tpu.memory_space<smem>>
    %85 = vector.broadcast %81 : f32 to vector<32x8xf32>
    %86 = arith.subf %1, %85 : vector<32x8xf32>
    %87 = arith.mulf %86, %86 : vector<32x8xf32>
    %88 = vector.broadcast %83 : f32 to vector<32x8xf32>
    %89 = arith.mulf %87, %88 : vector<32x8xf32>
    %90 = math.exp %89 : vector<32x8xf32>
    %91 = vector.broadcast %82 : f32 to vector<32x8xf32>
    %92 = arith.subf %2, %91 : vector<32x8xf32>
    %93 = math.absf %92 : vector<32x8xf32>
    %cst_35 = arith.constant 6.28318548 : f32
    %94 = vector.broadcast %cst_35 : f32 to vector<32x8xf32>
    %95 = arith.subf %94, %93 : vector<32x8xf32>
    %96 = math.absf %95 : vector<32x8xf32>
    %97 = arith.minimumf %93, %96 : vector<32x8xf32>
    %98 = arith.mulf %97, %97 : vector<32x8xf32>
    %99 = vector.broadcast %84 : f32 to vector<32x8xf32>
    %100 = arith.mulf %98, %99 : vector<32x8xf32>
    %101 = math.exp %100 : vector<32x8xf32>
    %102 = arith.mulf %90, %101 : vector<32x8xf32>
    %103 = arith.cmpf one, %102, %102 : vector<32x8xf32>
    %cst_36 = arith.constant 0.000000e+00 : f32
    %104 = vector.broadcast %cst_36 : f32 to vector<32x8xf32>
    %105 = arith.select %103, %104, %102 : vector<32x8xi1>, vector<32x8xf32>
    %106 = arith.addf %80, %105 : vector<32x8xf32>
    %cst_37 = arith.constant 1.000000e-30 : f32
    %107 = vector.broadcast %cst_37 : f32 to vector<32x8xf32>
    %108 = arith.addf %106, %107 : vector<32x8xf32>
    %109 = arith.divf %3, %108 : vector<32x8xf32>
    %c0_38 = arith.constant 0 : index
    %c0_39 = arith.constant 0 : index
    %110 = vector.load %arg2[%c0_38, %c0_39] : memref<256x128xf32, #tpu.memory_space<vmem>>, vector<256x128xf32>
    %c0_40 = arith.constant 0 : index
    %c0_41 = arith.constant 0 : index
    %111 = vector.load %arg4[%c0_40, %c0_41] : memref<128x128xf32, #tpu.memory_space<vmem>>, vector<128x128xf32>
    %cst_42 = arith.constant dense<0.000000e+00> : vector<256x128xf32>
    %112 = tpu.matmul %110, %111, %cst_42 {dimension_numbers = #tpu.dot_dimension_numbers<[1], [0], [0], [1], [0, 0, 1, 1], [], []>, precision = #tpu.contract_precision<fp32>} : vector<256x128xf32>, vector<128x128xf32>, vector<256x128xf32> -> vector<256x128xf32>
    %113 = vector.shape_cast %112 : vector<256x128xf32> to vector<32x8x128xf32>
    %114 = arith.mulf %28, %109 : vector<32x8xf32>
    %115 = vector.extract_strided_slice %113 {offsets = [0, 0, 0], sizes = [32, 8, 32], strides = [1, 1, 1]} : vector<32x8x128xf32> to vector<32x8x32xf32>
    %116 = vector.shape_cast %114 : vector<32x8xf32> to vector<32x8x1xf32>
    %117 = vector.broadcast %116 : vector<32x8x1xf32> to vector<32x8x32xf32>
    %118 = arith.mulf %117, %115 : vector<32x8x32xf32>
    %cst_43 = arith.constant dense<0.000000e+00> : vector<32x32xf32>
    %119 = vector.multi_reduction <add>, %118, %cst_43 [1] : vector<32x8x32xf32> to vector<32x32xf32>
    %120 = arith.mulf %53, %109 : vector<32x8xf32>
    %121 = vector.extract_strided_slice %113 {offsets = [0, 0, 32], sizes = [32, 8, 32], strides = [1, 1, 1]} : vector<32x8x128xf32> to vector<32x8x32xf32>
    %122 = vector.shape_cast %120 : vector<32x8xf32> to vector<32x8x1xf32>
    %123 = vector.broadcast %122 : vector<32x8x1xf32> to vector<32x8x32xf32>
    %124 = arith.mulf %123, %121 : vector<32x8x32xf32>
    %cst_44 = arith.constant dense<0.000000e+00> : vector<32x32xf32>
    %125 = vector.multi_reduction <add>, %124, %cst_44 [1] : vector<32x8x32xf32> to vector<32x32xf32>
    %126 = arith.mulf %79, %109 : vector<32x8xf32>
    %127 = vector.extract_strided_slice %113 {offsets = [0, 0, 64], sizes = [32, 8, 32], strides = [1, 1, 1]} : vector<32x8x128xf32> to vector<32x8x32xf32>
    %128 = vector.shape_cast %126 : vector<32x8xf32> to vector<32x8x1xf32>
    %129 = vector.broadcast %128 : vector<32x8x1xf32> to vector<32x8x32xf32>
    %130 = arith.mulf %129, %127 : vector<32x8x32xf32>
    %cst_45 = arith.constant dense<0.000000e+00> : vector<32x32xf32>
    %131 = vector.multi_reduction <add>, %130, %cst_45 [1] : vector<32x8x32xf32> to vector<32x32xf32>
    %132 = arith.mulf %105, %109 : vector<32x8xf32>
    %133 = vector.extract_strided_slice %113 {offsets = [0, 0, 96], sizes = [32, 8, 32], strides = [1, 1, 1]} : vector<32x8x128xf32> to vector<32x8x32xf32>
    %134 = vector.shape_cast %132 : vector<32x8xf32> to vector<32x8x1xf32>
    %135 = vector.broadcast %134 : vector<32x8x1xf32> to vector<32x8x32xf32>
    %136 = arith.mulf %135, %133 : vector<32x8x32xf32>
    %cst_46 = arith.constant dense<0.000000e+00> : vector<32x32xf32>
    %137 = vector.multi_reduction <add>, %136, %cst_46 [1] : vector<32x8x32xf32> to vector<32x32xf32>
    %138 = tpu.concatenate %119, %125, %131, %137 in 1 : vector<32x32xf32>, vector<32x32xf32>, vector<32x32xf32>, vector<32x32xf32> -> vector<32x128xf32>
    %cst_47 = arith.constant 0.000000e+00 : f32
    %139 = vector.broadcast %cst_47 : f32 to vector<32x128xf32>
    %140 = arith.maximumf %138, %139 : vector<32x128xf32>
    %c0_48 = arith.constant 0 : index
    %c0_49 = arith.constant 0 : index
    %141 = vector.load %arg5[%c0_48, %c0_49] : memref<32x128xf32, #tpu.memory_space<vmem>>, vector<32x128xf32>
    tpu.vector_store %arg5[%c0_48, %c0_49], %140 {strides = array<i32>} : memref<32x128xf32, #tpu.memory_space<vmem>>, vector<32x128xf32>,
    return
  }
  func.func @transform_0(%arg0: i32) -> (i32, i32) {
    %c0_i32 = arith.constant 0 : i32
    %c0_i32_0 = arith.constant 0 : i32
    return %arg0, %c0_i32 : i32, i32
  }
  func.func @transform_1(%arg0: i32) -> (i32, i32) {
    %c0_i32 = arith.constant 0 : i32
    %c0_i32_0 = arith.constant 0 : i32
    return %arg0, %c0_i32 : i32, i32
  }
  func.func @transform_2(%arg0: i32) -> (i32, i32) {
    %c0_i32 = arith.constant 0 : i32
    %c0_i32_0 = arith.constant 0 : i32
    %c0_i32_1 = arith.constant 0 : i32
    return %c0_i32, %c0_i32_0 : i32, i32
  }
  func.func @transform_3(%arg0: i32) -> (i32, i32) {
    %c0_i32 = arith.constant 0 : i32
    %c0_i32_0 = arith.constant 0 : i32
    %c0_i32_1 = arith.constant 0 : i32
    return %c0_i32, %c0_i32_0 : i32, i32
  }
  func.func @transform_4(%arg0: i32) -> (i32, i32) {
    %c0_i32 = arith.constant 0 : i32
    %c0_i32_0 = arith.constant 0 : i32
    return %arg0, %c0_i32 : i32, i32
  }
}

</mosaic_0001>

<bundles_post_ra>
// kernel: tpu_custom_call.1
= control target key start
LH: loop header
LB: loop body
LE: loop exit
PB: predicated region body
PF: predicated region fallthrough
CT: control target
= control target key end

     0   :  { %9 = vsyncpa [#allocation3], 0  ;;  %s8936_s0 = inlined_call_operand.vmem [shape: f32[256,24], index: 0, kind: input, shape index: {}]   ;;  %s8937_s1 = inlined_call_operand.hbm [shape: f32[2048,128], index: 1, kind: input, shape index: {}]   ;;  %s8938_s2 = inlined_call_operand.vmem [shape: f32[4,4], index: 2, kind: input, shape index: {}]   ;;  %s8939_s3 = inlined_call_operand.vmem [shape: f32[128,128], index: 3, kind: input, shape index: {}]   ;;  %s8940_s4 = inlined_call_operand.hbm [shape: f32[256,128], index: 4, kind: output, shape index: {}]  }
   0x1   :  { %11 = vsyncpa [#allocation3 + $0x1], 0 }
   0x2   :  { %12 = vsyncpa [#allocation5], 0 }
   0x3   :  { %13 = vsyncpa [#allocation4], 0 }
   0x4   :  { %15 = vsyncpa [#allocation4 + $0x1], 0  ;;  %s6487_s15 = smov 0   ;;  %s6489_s16 = smov 0  }
   0x5   :  { %s6491_s17 = smov 0   ;;  %s6493_s18 = smov 0  }
   0x6 LB: > { %s6508_s19 = sadd.s32 4294967295, %s6450_s18   ;;  %s5040_s20 = sadd.s32 4294967294, %s6450_s18   ;;  %s6450_s18 = sphi %s6493_s18, %s9443_s18   ;;  %s6446_s17 = sphi %s6491_s17, %s9442_s17   ;;  %s6442_s16 = sphi %s6489_s16, %s9441_s16   ;;  %s6438_s15 = sphi %s6487_s15, %s9440_s15  }
   0x7   : > { %s6512_s21 = sadd.s32 1, %s6450_s18   ;;  %s54_s22 = sadd.s32 1, %s6446_s17 }
   0x8   : > { %s51_s23 = ssub.s32 %s6450_s18, %s6512_s21  ;;  %p61_p0 = scmp.ne.s32.totalorder %s6446_s17, %s6442_s16 }
   0x9   : > { %p52_p1 = scmp.eq.s32.totalorder %s51_s23, 0  ;;  %p62_p2 = scmp.eq.s32.totalorder %s6450_s18, 0 }
   0xa   : > { %p67_p3 = scmp.ne.s32.totalorder %s6442_s16, %s6438_s15  ;;  %p8942_p4 = scmp.eq.s32.totalorder %s6508_s19, 0 }
   0xb   : > { %s6524_s24 = scalar_select %p52_p1, %s6446_s17, %s54_s22  }
   0xc   : > { %p6526_p5 = por %p62_p2, %p61_p0  ;;  %p6532_p6 = por %p8942_p4, %p67_p3 }
   0xd   : > { %p133_p7 = scmp.eq.s32.totalorder %s6508_s19, 7  ;;  %p139_p8 = scmp.eq.s32.totalorder %s5040_s20, 7 }
   0xe   : > { %s9096_s26 = scalar_select %p6532_p6, 1, 0 }
   0xf   : > { %p5041_p9 = scmp.ge.s32.totalorder %s6450_s18, 1  ;;  %p146_p10 = scmp.lt.s32.totalorder %s6450_s18, 9 }
  0x10   : > { %p6539_p11 = por %p133_p7, %p61_p0  ;;  %p6543_p12 = por %p139_p8, %p67_p3 }
  0x11   : > { %p6547_p13 = pnand %p5041_p9, %p146_p10  ;;  %s159_s6 = sshll.u32 %s8938_s2, 4  ;;  %s160_s6 = int_to_ptr.vmem [resolvable:$true] %s159_s6 }
  0x12   : > { %s9097_s27 = scalar_select %p6539_p11, 1, 0 }
  0x13   : > { %s9098_s28 = scalar_select %p6543_p12, 1, 0 }
  0x14   : > { %p6203_p1 = pneg %p6547_p13  ;;  %p6216_p0 = scmp.lt.s32.totalorder %s6450_s18, 8 }
  0x15   : > { %s182_s8 = sand.u32 1, %s6446_s17   ;;  %s6335_s11 = scalar_lea.vmem %s160_s6, 64 }
  0x16   : > { %p6559_p2 = pnand %p6203_p1, %p8942_p4  ;;  %p6566_p3 = pnand %p6216_p0, %p6526_p5 }
  0x17   : > { %s5044_s10 = sshll.u32 %s182_s8, 8  ;;  %p6336_p7 = scmp.ne.s32.totalorder %s160_s6, %s6335_s11 }
  0x18   : > { %p6337_p8 = pneg %p6559_p2  ;;  %p6343_p12 = scmp.lt.s32.totalorder %s160_s6, %s160_s6 }
  0x19   : > { %p6344_p11 = scmp.lt.s32.totalorder %s6335_s11, %s6335_s11 }
  0x1a   : > { %p6338_p9 = pnand %p6337_p8, %p6336_p7 }
  0x1b   : > { %p6345_p1 = por %p6344_p11, %p6343_p12 }
  0x1c   : > { %p6339_p10 = pneg %p6338_p9 }
  0x1e   : > { %p6346_p4 = pnand %p6345_p1, %p6339_p10 }
  0x20   : > { %6349 = shalt.err (!%p6346_p4)
}
  0x21   : > { %s6452_s12 = smov [#allocation6]   ;;  %s5073_s13 = sshll.u32 %s6450_s18, 12 }
  0x22   : > { %6206 = dma.vmem_to_smem (!%p6559_p2), %s160_s6, 64, %s6452_s12, [#allocation5]  }
  0x23   : > { %s186_s14 = scalar_lea.vmem [#allocation2], %s5044_s10  ;;  %s6578_s25 = scalar_lea.hbm %s8937_s1, %s5073_s13 }
  0x24   : > { %s193_s20 = sshll.u32 %s186_s14, 4  ;;  %s6582_s30 = scalar_lea.sflag [#allocation3], %s182_s8  ;;  %s6580_s20 = int_to_ptr.vmem [resolvable:$true] %s193_s20 }
  0x25   : > { %s6350_s5 = scalar_lea.hbm %s6578_s25, 4096  ;;  %p6352_p5 = pneg %p6566_p3 }
  0x26   : > { %p6351_p4 = scmp.ne.s32.totalorder %s6578_s25, %s6350_s5  ;;  %s6355_s10 = scalar_lea.hbm %s8937_s1, 32768 }
  0x27   : > { %p6356_p0 = scmp.lt.u32.totalorder %s6578_s25, %s8937_s1  ;;  %p6357_p2 = scmp.lt.u32.totalorder %s6355_s10, %s6350_s5 }
  0x28   : > { %p6353_p11 = pnand %p6352_p5, %p6351_p4  ;;  %p6359_p8 = scmp.lt.u32.totalorder %s6350_s5, %s6578_s25 }
  0x29   : > { %p6358_p7 = por %p6357_p2, %p6356_p0 }
  0x2a   : > { %p6354_p12 = pneg %p6353_p11 }
  0x2b   : > { %p6360_p9 = por %p6359_p8, %p6358_p7 }
  0x2d   : > { %p6361_p10 = pnand %p6360_p9, %p6354_p12 }
  0x2f   : > { %6364 = shalt.err (!%p6361_p10)
}
  0x30   : > { %s6365_s8 = scalar_lea.vmem %s6580_s20, 4096  ;;  %s6453_s13 = smov [#allocation2]  }
  0x31   : > { %p6366_p1 = scmp.ne.s32.totalorder %s6580_s20, %s6365_s8  ;;  %s6370_s14 = sshll.u32 %s6453_s13, 4  ;;  %s6371_s14 = int_to_ptr.vmem [resolvable:$false] %s6370_s14 }
  0x32   : > { %s6372_s22 = scalar_lea.vmem %s6371_s14, 8192  ;;  %p6373_p6 = scmp.lt.s32.totalorder %s6580_s20, %s6371_s14 }
  0x33   : > { %p6368_p4 = pnand %p6366_p1, %p6352_p5  ;;  %p6374_p0 = scmp.lt.s32.totalorder %s6372_s22, %s6365_s8 }
  0x35   : > { %p6369_p11 = pneg %p6368_p4  ;;  %p6375_p2 = por %p6374_p0, %p6373_p6 }
  0x37   : > { %p6376_p7 = pnand %p6375_p2, %p6369_p11 }
  0x39   : > { %6379 = shalt.err (!%p6376_p7)
}
  0x3a   : > { %s6454_s23 = smov 128   ;;  %s6455_s5 = smov 8  }
  0x3b   : > { %6210 = dma.hbm_to_vmem [thread:$0]  (!%p6566_p3), %s6578_s25, 4096, %s6580_s20, %s6582_s30, %s6454_s23, %s6454_s23, %s6455_s5  }
  0x3c   : > { %205 = sbr.rel (%p6547_p13) target bundleno = 956 (0x3bc), region = 36 }
  0x43   : > { %s6613_s6 = sand.u32 1, %s6442_s16   ;;  %p9102_p6 = scmp.ne.s32.totalorder %s9096_s26, 0 }
  0x44   : > { %s5048_s7 = sshll.u32 %s6613_s6, 8  ;;  %s208_s10 = scalar_lea.sflag [#allocation3], %s6613_s6 }
  0x45   : > { %s6617_s11 = scalar_lea.vmem [#allocation2], %s5048_s7 }
  0x46   : > { %6425 = dma.done.wait (%p9102_p6), %s208_s10, 4096  }
  0x47   : > { %6427 = vsyncadd (%p9102_p6), %s208_s10, 4294963200  ;;  %p9103_p3 = scmp.eq.s32.totalorder %s6508_s19, 0 }
  0x49   : > { %6429 = dma.done.wait (%p9103_p3), [#allocation5], 64   ;;  %p9104_p13 = pmov %p9103_p3 }
  0x4b   : > { %6431 = vsyncadd (%p9104_p13), [#allocation5], 4294967232 }
  0x4c   : > { %220 = sfence }
  0x4d   : > { %s5051_s29 = sshll.u32 %s6508_s19, 2  ;;  %s5053_s9 = sld [smem:[#allocation6 + $0x80]] }
  0x4e   : > { %p247_p5 = scmp.lt.s32.totalorder %s5051_s29, 31  ;;  %s5055_s20 = sld [smem:[#allocation6 + $0x180]] }
  0x4f   : > { %s5057_s25 = sld [smem:[#allocation6 + $0x81]]  ;;  %s5061_s12 = sld [smem:[#allocation6 + $0x82]] }
  0x50   : > { %s9445_s29 = smov (!%p247_p5, %s5051_s29), 31  ;;  %s5059_s30 = sld [smem:[#allocation6 + $0x181]] }
  0x51   : > { %s5052_s8 = sshll.u32 %s9445_s29, 3  ;;  %s5063_s22 = sld [smem:[#allocation6 + $0x182]] }
  0x52   : > { %s6631_s14 = scalar_lea.vmem %s8936_s0, %s5052_s8  ;;  %s6659_s23 = sld [smem:[#allocation6 + $0x83]] }
  0x53   : > { %v284_v0 = vstv %s5053_s9  ;;  %v6634_v1 = vld [vmem:[%s6631_s14 + $0x10] sm:$0xff]  ;;  %v6637_v2 = vld [vmem:[%s6631_s14 + $0x18] sm:$0xff]  ;;  %v6640_v3 = vld [vmem:[%s6631_s14 + $0x8] sm:$0xff]  ;;  %s6667_s5 = sld [smem:[#allocation6 + $0x183]]  ;;  %s6456_s7 = smov 120  }
  0x54   : > { %v287_v4 = vsub.f32 %v6634_v1, %v284_v0  ;;  %v288_v5 = vsub.f32 %v6637_v2, %v284_v0  ;;  %v286_v6 = vsub.f32 %v6640_v3, %v284_v0  ;;  %v6646_v7 = vld [vmem:[%s6631_s14] sm:$0xff]  ;;  %v309_v9 = vstv %s5055_s20  ;;  %s7310_s8 = sld [smem:[#allocation6 + $0x1]]  ;;  %s7312_s13 = sld [smem:[#allocation6 + $0x2]] }
  0x55   : > { %v376_v8 = vstv %s5057_s25  ;;  %v285_v10 = vsub.f32 %v6646_v7, %v284_v0  ;;  %v472_v24 = vstv %s5061_s12  ;;  %s6879_s12 = sld [smem:[#allocation6 + $0x100]]  ;;  %s7387_s26 = sld [smem:[#allocation6 + $0x101]] }
  0x56   : > { %v378_v11 = vsub.f32 %v6640_v3, %v376_v8  ;;  %v377_v12 = vsub.f32 %v6646_v7, %v376_v8  ;;  %v291_v13 = vand.u32 2147483647, %v287_v4  ;;  %v292_v14 = vand.u32 2147483647, %v288_v5  ;;  %s5074_s29 = sshll.u32 %s6508_s19, 9  ;;  %s4930_s19 = scalar_lea.sflag [#allocation4], %s6613_s6 }
  0x57   : > { %v290_v15 = vand.u32 2147483647, %v286_v6  ;;  %v380_v16 = vsub.f32 %v6637_v2, %v376_v8  ;;  %v289_v17 = vand.u32 2147483647, %v285_v10  ;;  %v6652_v19 = vstv %s5059_s30  ;;  %s8891_s30 = scalar_lea.hbm %s8940_s4, %s5074_s29  ;;  %p9438_p8 = scmp.ne.s32.totalorder %s9097_s27, 0 }
  0x58   : > { %v382_v18 = vand.u32 2147483647, %v378_v11  ;;  %v381_v20 = vand.u32 2147483647, %v377_v12  ;;  %v295_v21 = vsub.f32 6.2831855, %v291_v13  ;;  %v379_v28 = vsub.f32 %v6634_v1, %v376_v8 }
  0x59   : > { %v296_v22 = vsub.f32 6.2831855, %v292_v14  ;;  %v294_v23 = vsub.f32 6.2831855, %v290_v15  ;;  %v293_v25 = vsub.f32 6.2831855, %v289_v17  ;;  %v474_v32 = vsub.f32 %v6640_v3, %v472_v24 }
  0x5a   : > { %v386_v26 = vsub.f32 6.2831855, %v382_v18  ;;  %v385_v27 = vsub.f32 6.2831855, %v381_v20  ;;  %v299_v29 = vand.u32 2147483647, %v295_v21  ;;  %v473_v36 = vsub.f32 %v6646_v7, %v472_v24 }
  0x5b   : > { %v300_v30 = vand.u32 2147483647, %v296_v22  ;;  %v298_v31 = vand.u32 2147483647, %v294_v23  ;;  %v297_v33 = vand.u32 2147483647, %v293_v25 }
  0x5c   : > { %v390_v34 = vand.u32 2147483647, %v386_v26  ;;  %v389_v35 = vand.u32 2147483647, %v385_v27  ;;  %v303_v37 = vmin.f32 %v291_v13, %v299_v29  ;;  %v384_v40 = vand.u32 2147483647, %v380_v16 }
  0x5d   : > { %v304_v38 = vmin.f32 %v292_v14, %v300_v30  ;;  %v302_v39 = vmin.f32 %v290_v15, %v298_v31  ;;  %v301_v41 = vmin.f32 %v289_v17, %v297_v33  ;;  %v383_v44 = vand.u32 2147483647, %v379_v28 }
  0x5e   : > { %v394_v42 = vmin.f32 %v382_v18, %v390_v34  ;;  %v393_v43 = vmin.f32 %v381_v20, %v389_v35  ;;  %v307_v45 = vmul.f32 %v303_v37, %v303_v37  ;;  %v388_v48 = vsub.f32 6.2831855, %v384_v40 }
  0x5f   : > { %v308_v46 = vmul.f32 %v304_v38, %v304_v38  ;;  %v306_v47 = vmul.f32 %v302_v39, %v302_v39  ;;  %v305_v49 = vmul.f32 %v301_v41, %v301_v41  ;;  %v387_v52 = vsub.f32 6.2831855, %v383_v44 }
  0x60   : > { %v398_v50 = vmul.f32 %v394_v42, %v394_v42  ;;  %v397_v51 = vmul.f32 %v393_v43, %v393_v43  ;;  %v312_v53 = vmul.f32 %v309_v9, %v307_v45  ;;  %v392_v56 = vand.u32 2147483647, %v388_v48 }
  0x61   : > { %v313_v54 = vmul.f32 %v309_v9, %v308_v46  ;;  %v311_v55 = vmul.f32 %v309_v9, %v306_v47  ;;  %v310_v57 = vmul.f32 %v309_v9, %v305_v49  ;;  %v391_v60 = vand.u32 2147483647, %v387_v52 }
  0x62   : > { %v403_v58 = vmul.f32 %v6652_v19, %v398_v50  ;;  %v402_v59 = vmul.f32 %v6652_v19, %v397_v51  ;;  %v318_v61 = vmul.f32 1.442695, %v312_v53  ;;  %v396_v63 = vmin.f32 %v384_v40, %v392_v56 }
  0x63   : > { %v320_v62 = vmul.f32 1.442695, %v313_v54  ;;  %v316_v0 = vmul.f32 1.442695, %v311_v55  ;;  %v314_v4 = vmul.f32 1.442695, %v310_v57  ;;  %v395_v6 = vmin.f32 %v383_v44, %v391_v60 }
  0x64   : > { %v408_v5 = vmul.f32 1.442695, %v403_v58  ;;  %6259 = vpow2.f32 %v318_v61  ;;  %v400_v8 = vmul.f32 %v396_v63, %v396_v63  ;;  %v478_v10 = vand.u32 2147483647, %v474_v32 }
  0x65   : > { %v477_v11 = vand.u32 2147483647, %v473_v36  ;;  %v406_v9 = vmul.f32 1.442695, %v402_v59  ;;  %v399_v12 = vmul.f32 %v395_v6, %v395_v6  ;;  %v476_v13 = vsub.f32 %v6637_v2, %v472_v24 }
  0x66   : > { %v475_v14 = vsub.f32 %v6634_v1, %v472_v24  ;;  %6261 = vpow2.f32 %v320_v62  ;;  %v405_v15 = vmul.f32 %v6652_v19, %v400_v8  ;;  %v482_v16 = vsub.f32 6.2831855, %v478_v10 }
  0x67   : > { %v481_v17 = vsub.f32 6.2831855, %v477_v11  ;;  %6263 = vpow2.f32 %v314_v4  ;;  %v404_v18 = vmul.f32 %v6652_v19, %v399_v12  ;;  %v480_v20 = vand.u32 2147483647, %v476_v13 }
  0x68   : > { %v479_v21 = vand.u32 2147483647, %v475_v14  ;;  %6265 = vpow2.f32 %v316_v0  ;;  %v412_v22 = vmul.f32 1.442695, %v405_v15  ;;  %v486_v23 = vand.u32 2147483647, %v482_v16 }
  0x69   : > { %v485_v25 = vand.u32 2147483647, %v481_v17  ;;  %6267 = vpow2.f32 %v408_v5  ;;  %v497_v26 = vstv %s5063_s22  ;;  %v484_v27 = vsub.f32 6.2831855, %v480_v20  ;;  %s7419_s22 = sld [smem:[#allocation6 + $0x3]] }
  0x6a   : > { %v483_v28 = vsub.f32 6.2831855, %v479_v21  ;;  %6269 = vpow2.f32 %v406_v9  ;;  %v490_v24 = vmin.f32 %v478_v10, %v486_v23  ;;  %v568_v30 = vstv %s6659_s23  ;;  %s6458_s23 = smov 112  }
  0x6b   : > { %v489_v29 = vmin.f32 %v477_v11, %v485_v25  ;;  %v410_v31 = vmul.f32 1.442695, %v404_v18  ;;  %v488_v32 = vand.u32 2147483647, %v484_v27  ;;  %v570_v34 = vsub.f32 %v6640_v3, %v568_v30 }
  0x6c   : > { %v487_v33 = vand.u32 2147483647, %v483_v28  ;;  %6271 = vpow2.f32 %v412_v22  ;;  %v494_v19 = vmul.f32 %v490_v24, %v490_v24  ;;  %v569_v36 = vsub.f32 %v6646_v7, %v568_v30 }
  0x6d   : > { %v493_v35 = vmul.f32 %v489_v29, %v489_v29  ;;  %v492_v37 = vmin.f32 %v480_v20, %v488_v32  ;;  %v574_v39 = vand.u32 2147483647, %v570_v34  ;;  %v572_v40 = vsub.f32 %v6637_v2, %v568_v30  ;;  %v6685_v32 = vld [vmem:[%s8939_s3] sm:$0xff] }
  0x6e   : > { %v491_v38 = vmin.f32 %v479_v21, %v487_v33  ;;  %v6260_v41 = vpop.eup %6259  ;;  %v499_v42 = vmul.f32 %v497_v26, %v494_v19  ;;  %v573_v44 = vand.u32 2147483647, %v569_v36  ;;  %v571_v45 = vsub.f32 %v6634_v1, %v568_v30  ;;  %v6690_v33 = vld [vmem:[%s8939_s3 + $0x8] sm:$0xff]  ;;  %v6699_v36 = vld [vmem:[%s8939_s3 + $0x10] sm:$0xff] }
  0x6f   : > { %v498_v43 = vmul.f32 %v497_v26, %v493_v35  ;;  %330 = vrot.lane.b32.xlu1 %v6260_v41, %s6456_s7  ;;  %v496_v46 = vmul.f32 %v492_v37, %v492_v37  ;;  %v578_v48 = vsub.f32 6.2831855, %v574_v39  ;;  %v576_v49 = vand.u32 2147483647, %v572_v40 }
  0x70   : > { %v495_v47 = vmul.f32 %v491_v38, %v491_v38  ;;  %v6262_v50 = vpop.eup %6261  ;;  %6273 = vpow2.f32 %v410_v31  ;;  %v504_v51 = vmul.f32 1.442695, %v499_v42  ;;  %v577_v53 = vsub.f32 6.2831855, %v573_v44  ;;  %v6704_v38 = vld [vmem:[%s8939_s3 + $0x18] sm:$0xff] }
  0x71   : > { %v502_v52 = vmul.f32 1.442695, %v498_v43  ;;  %v6264_v54 = vpop.eup %6263  ;;  %v501_v55 = vmul.f32 %v497_v26, %v496_v46  ;;  %v582_v57 = vand.u32 2147483647, %v578_v48  ;;  %v580_v58 = vsub.f32 6.2831855, %v576_v49 }
  0x72   : > { %v500_v56 = vmul.f32 %v497_v26, %v495_v47  ;;  %v6266_v59 = vpop.eup %6265  ;;  %326 = vrot.lane.b32.xlu0 %v6264_v54, %s6456_s7  ;;  %6275 = vpow2.f32 %v504_v51  ;;  %v581_v60 = vand.u32 2147483647, %v577_v53  ;;  %v575_v61 = vand.u32 2147483647, %v571_v45  ;;  %v6728_v45 = vld [vmem:[%s8939_s3 + $0x28] sm:$0xff]  ;;  %v6741_v48 = vld [vmem:[%s8939_s3 + $0x30] sm:$0xff] }
  0x73   : > { %v6268_v62 = vpop.eup %6267  ;;  %332 = vrot.lane.b32.xlu1 %v6262_v50, %s6456_s7  ;;  %v508_v63 = vmul.f32 1.442695, %v501_v55  ;;  %v586_v0 = vmin.f32 %v574_v39, %v582_v57  ;;  %v593_v5 = vstv %s6667_s5  ;;  %v584_v8 = vand.u32 2147483647, %v580_v58  ;;  %v6750_v51 = vld [vmem:[%s8939_s3 + $0x38] sm:$0xff]  ;;  %v6762_v53 = vld [vmem:[%s8939_s3 + $0x48] sm:$0xff] }
  0x74   : > { %v6270_v4 = vpop.eup %6269  ;;  %v585_v6 = vmin.f32 %v573_v44, %v581_v60  ;;  %v579_v10 = vsub.f32 6.2831855, %v575_v61  ;;  %6277 = vpow2.f32 %v502_v52  ;;  %v506_v11 = vmul.f32 1.442695, %v500_v56  ;;  %v6723_v44 = vld [vmem:[%s8939_s3 + $0x20] sm:$0xff]  ;;  %v6776_v57 = vld [vmem:[%s8939_s3 + $0x50] sm:$0xff] }
  0x75   : > { %v590_v9 = vmul.f32 %v586_v0, %v586_v0  ;;  %6279 = vpow2.f32 %v508_v63  ;;  %v588_v14 = vmin.f32 %v576_v49, %v584_v8  ;;  %v8959_v19 = vand.u32 4294901760, %v6685_v32  ;;  %v6757_v52 = vld [vmem:[%s8939_s3 + $0x40] sm:$0xff]  ;;  %v6781_v58 = vld [vmem:[%s8939_s3 + $0x58] sm:$0xff]  ;;  %v668_v8 = vld [vmem:[%s6617_s11 + $0x10] sm:$0xff]  ;;  %s5050_s5 = sshll.u32 %s6613_s6, 5 }
  0x76   : > { %v6272_v12 = vpop.eup %6271  ;;  %328 = vrot.lane.b32.xlu0 %v6266_v59, %s6456_s7  ;;  %v589_v13 = vmul.f32 %v585_v6, %v585_v6  ;;  %v583_v15 = vand.u32 2147483647, %v579_v10  ;;  %6281 = vpow2.f32 %v506_v11  ;;  %v8958_v35 = vand.u32 4294901760, %v6690_v33  ;;  %v667_v6 = vld [vmem:[%s6617_s11 + $0x8] sm:$0xff]  ;;  %v669_v11 = vld [vmem:[%s6617_s11 + $0x18] sm:$0xff]  ;;  %s245_s10 = scalar_lea.vmem [#allocation7], %s5050_s5 }
  0x77   : > { %420 = vrot.lane.b32.xlu1 %v6268_v62, %s6456_s7  ;;  %v595_v16 = vmul.f32 %v593_v5, %v590_v9  ;;  %v592_v18 = vmul.f32 %v588_v14, %v588_v14  ;;  %v8957_v41 = vand.u32 4294901760, %v6699_v36  ;;  %v8954_v43 = vand.u32 4294901760, %v6704_v38  ;;  %v666_v62 = vld [vmem:[%s6617_s11] sm:$0xff]  ;;  %v6818_v10 = vld [vmem:[%s8939_s3 + $0x68] sm:$0xff]  ;;  %s4943_s9 = sshll.u32 %s245_s10, 4  ;;  %s8893_s9 = int_to_ptr.vmem [resolvable:$true] %s4943_s9 }
  0x78   : > { %v594_v17 = vmul.f32 %v593_v5, %v589_v13  ;;  %v587_v20 = vmin.f32 %v575_v61, %v583_v15  ;;  %v6711_v39 = vpack.c.bf16 %v8958_v35, %v8959_v19  ;;  %v8953_v49 = vand.u32 4294901760, %v6723_v44 }
  0x79   : > { %v600_v21 = vmul.f32 1.442695, %v595_v16  ;;  %v597_v25 = vmul.f32 %v593_v5, %v592_v18  ;;  %v6735_v46 = vpack.c.bf16 %v8954_v43, %v8957_v41  ;;  %v8952_v50 = vand.u32 4294901760, %v6728_v45  ;;  %v671_v16 = vld [vmem:[%s6617_s11 + $0x28] sm:$0xff]  ;;  %v673_v18 = vld [vmem:[%s6617_s11 + $0x38] sm:$0xff] }
  0x7a   : > { %v6274_v22 = vpop.eup %6273  ;;  %418 = vrot.lane.b32.xlu0 %v6270_v4, %s6456_s7  ;;  %v598_v23 = vmul.f32 1.442695, %v594_v17  ;;  %v591_v26 = vmul.f32 %v587_v20, %v587_v20  ;;  %5844 = vmatprep.subr.bf16.mxu1 %v6711_v39  ;;  %v8951_v55 = vand.u32 4294901760, %v6741_v48  ;;  %v8950_v56 = vand.u32 4294901760, %v6750_v51  ;;  %v672_v17 = vld [vmem:[%s6617_s11 + $0x30] sm:$0xff] }
  0x7b   : > { %424 = vrot.lane.b32.xlu1 %v6272_v12, %s6456_s7  ;;  %6283 = vpow2.f32 %v600_v21  ;;  %v604_v28 = vmul.f32 1.442695, %v597_v25  ;;  %5940 = vmatprep.subr.bf16.mxu0 %v6711_v39  ;;  %v6769_v54 = vpack.c.bf16 %v8952_v50, %v8953_v49  ;;  %v8947_v59 = vand.u32 4294901760, %v6757_v52  ;;  %v670_v12 = vld [vmem:[%s6617_s11 + $0x20] sm:$0xff] }
  0x7c   : > { %v6276_v27 = vpop.eup %6275  ;;  %v596_v24 = vmul.f32 %v593_v5, %v591_v26  ;;  %6285 = vpow2.f32 %v598_v23  ;;  %5846 = vmatpush3.bf16.msra.mxu1 %v6711_v39  ;;  %5942 = vmatpush3.bf16.msra.mxu0 %v6711_v39  ;;  %v8946_v60 = vand.u32 4294901760, %v6762_v53  ;;  %v6795_v61 = vpack.c.bf16 %v8950_v56, %v8951_v55  ;;  %v6809_v5 = vld [vmem:[%s8939_s3 + $0x60] sm:$0xff]  ;;  %v6856_v26 = vld [vmem:[%s8939_s3 + $0x78] sm:$0xff] }
  0x7d   : > { %6287 = vpow2.f32 %v604_v28  ;;  %5848 = vmatprep.subr.bf16.mxu1 %v6735_v46  ;;  %5944 = vmatprep.subr.bf16.mxu0 %v6735_v46  ;;  %9105 = vst [vmem:[#allocation11_spill] sm:$0xff] %v6769_v54  ;;  %v8945_v0 = vand.u32 4294901760, %v6776_v57  ;;  %v8944_v4 = vand.u32 4294901760, %v6781_v58  ;;  %v6821_v9 = vand.u32 4294901760, %v666_v62  ;;  %v678_v55 = vld [vmem:[%s6617_s11 + $0x60] sm:$0xff] }
  0x7e   : > { %422 = vrot.lane.b32.xlu0 %v6274_v22, %s6456_s7  ;;  %v602_v29 = vmul.f32 1.442695, %v596_v24  ;;  %v6278_v30 = vpop.eup %6277  ;;  %9106 = vst [vmem:[#allocation12_spill] sm:$0xff] %v6795_v61  ;;  %v6802_v63 = vpack.c.bf16 %v8946_v60, %v8947_v59  ;;  %v8949_v13 = vand.u32 4294901760, %v6809_v5  ;;  %v6827_v14 = vand.u32 4294901760, %v667_v6  ;;  %v6846_v22 = vld [vmem:[%s8939_s3 + $0x70] sm:$0xff] }
  0x7f   : > { %516 = vrot.lane.b32.xlu1 %v6276_v27, %s6456_s7  ;;  %v6280_v31 = vpop.eup %6279  ;;  %v6829_v15 = vand.u32 4294901760, %v668_v8  ;;  %v6840_v20 = vpack.c.bf16 %v8944_v4, %v8945_v0  ;;  %v8948_v21 = vand.u32 4294901760, %v6818_v10  ;;  %v6849_v23 = vsub.f32 %v666_v62, %v6821_v9  ;;  %v674_v60 = vld [vmem:[%s6617_s11 + $0x40] sm:$0xff] }
  0x80   : > { %6289 = vpow2.f32 %v602_v29  ;;  %v6282_v34 = vpop.eup %6281  ;;  %5850 = vmatpush3.bf16.msra.mxu1 %v6735_v46  ;;  %5946 = vmatpush3.bf16.msra.mxu0 %v6735_v46  ;;  %9107 = vst [vmem:[#allocation13_spill] sm:$0xff] %v6802_v63  ;;  %v6851_v25 = vand.u32 4294901760, %v669_v11  ;;  %v6859_v27 = vsub.f32 %v667_v6, %v6827_v14  ;;  %v6861_v28 = vand.u32 4294901760, %v670_v12 }
  0x81   : > { %5852 = vmatprep.subr.bf16.mxu1 %v6769_v54  ;;  %5948 = vmatprep.subr.bf16.mxu0 %v6769_v54  ;;  %9108 = vst [vmem:[#allocation14_spill] sm:$0xff] %v6840_v20  ;;  %9109 = vst [vmem:[#allocation15_spill] sm:$0xff] %v6849_v23  ;;  %v797_v24 = vand.u32 4294901760, %v6849_v23  ;;  %v6864_v29 = vand.u32 4294901760, %v671_v16 }
  0x82   : > { %514 = vrot.lane.b32.xlu0 %v6278_v30, %s6456_s7  ;;  %9110 = vst [vmem:[#allocation16_spill] sm:$0xff] %v6859_v27  ;;  %9111 = vst [vmem:[#allocation17_spill] sm:$0xff] %v6861_v28  ;;  %v6866_v30 = vand.u32 4294901760, %v672_v17  ;;  %v6892_v6 = vsub.f32 %v669_v11, %v6851_v25  ;;  %v8960_v4 = vand.u32 4294901760, %v6859_v27  ;;  %v6898_v0 = vsub.f32 %v670_v12, %v6861_v28 }
  0x83   : > { %520 = vrot.lane.b32.xlu1 %v6280_v31, %s6456_s7  ;;  %9112 = vst [vmem:[#allocation18_spill] sm:$0xff] %v6864_v29  ;;  %v6868_v31 = vand.u32 4294901760, %v673_v18  ;;  %v798_v62 = vsub.f32 %v6849_v23, %v797_v24  ;;  %5635 = vmatprep.mubr.f32.mxu0 %v797_v24  ;;  %v676_v24 = vld [vmem:[%s6617_s11 + $0x50] sm:$0xff] }
  0x84   : > { %5854 = vmatpush3.bf16.msra.mxu1 %v6769_v54  ;;  %5950 = vmatpush3.bf16.msra.mxu0 %v6769_v54  ;;  %9113 = vst [vmem:[#allocation19_spill] sm:$0xff] %v6866_v30  ;;  %9117 = vst [vmem:[#allocation23_spill] sm:$0xff] %v6892_v6  ;;  %v6940_v43 = vand.u32 4294901760, %v676_v24  ;;  %v9131_v23 = vand.u32 4294901760, %v6892_v6 }
  0x85   : > { %v6284_v37 = vpop.eup %6283  ;;  %5856 = vmatprep.subr.bf16.mxu1 %v6795_v61  ;;  %5952 = vmatprep.subr.bf16.mxu0 %v6795_v61  ;;  %9114 = vst [vmem:[#allocation20_spill] sm:$0xff] %v6868_v31  ;;  %9118 = vst [vmem:[#allocation24_spill] sm:$0xff] %v6898_v0  ;;  %v799_v59 = vand.u32 4294901760, %v798_v62  ;;  %v6908_v11 = vsub.f32 %v673_v18, %v6868_v31  ;;  %v6930_v18 = vand.u32 4294901760, %v674_v60  ;;  %v677_v62 = vld [vmem:[%s6617_s11 + $0x58] sm:$0xff] }
  0x86   : > { %518 = vrot.lane.b32.xlu0 %v6282_v34, %s6456_s7  ;;  %v6286_v40 = vpop.eup %6285  ;;  %9125 = vst [vmem:[#allocation31_spill] sm:$0xff] %v6940_v43  ;;  %v6952_v50 = vand.u32 4294901760, %v677_v62 }
  0x87   : > { %612 = vrot.lane.b32.xlu1 %v6284_v37, %s6456_s7  ;;  %v6288_v42 = vpop.eup %6287  ;;  %v8956_v37 = vand.u32 4294901760, %v6846_v22  ;;  %9121 = vst [vmem:[#allocation27_spill] sm:$0xff] %v6908_v11  ;;  %9123 = vst [vmem:[#allocation29_spill] sm:$0xff] %v6930_v18  ;;  %5395 = vmatprep.mubr.f32.mxu1 %v799_v59  ;;  %v679_v59 = vld [vmem:[%s6617_s11 + $0x68] sm:$0xff] }
  0x88   : > { %5858 = vmatpush3.bf16.msra.mxu1 %v6795_v61  ;;  %5954 = vmatpush3.bf16.msra.mxu0 %v6795_v61  ;;  %9127 = vst [vmem:[#allocation33_spill] sm:$0xff] %v6952_v50 }
  0x89   : > { %5860 = vmatprep.subr.bf16.mxu1 %v6802_v63  ;;  %5956 = vmatprep.subr.bf16.mxu0 %v6802_v63 }
  0x8a   : > { %610 = vrot.lane.b32.xlu0 %v6286_v40, %s6456_s7  ;;  %v6290_v47 = vpop.eup %6289  ;;  %v6877_v40 = vsub.f32 %v668_v8, %v6829_v15 }
  0x8b   : > { %616 = vrot.lane.b32.xlu1 %v6288_v42, %s6456_s7  ;;  %v6887_v42 = vpack.c.bf16 %v8948_v21, %v8949_v13  ;;  %v6902_v21 = vsub.f32 %v671_v16, %v6864_v29  ;;  %v6905_v13 = vsub.f32 %v672_v17, %v6866_v30  ;;  %v6958_v17 = vstv %s6879_s12  ;;  %s6380_s12 = scalar_lea.vmem %s8893_s9, 512 }
  0x8c   : > { %5862 = vmatpush3.bf16.msra.mxu1 %v6802_v63  ;;  %5958 = vmatpush3.bf16.msra.mxu0 %v6802_v63  ;;  %9115 = vst [vmem:[#allocation21_spill] sm:$0xff] %v6877_v40  ;;  %v817_v12 = vand.u32 4294901760, %v6877_v40  ;;  %v6976_v63 = vand.u32 4294901760, %v679_v59  ;;  %p6381_p12 = scmp.ne.s32.totalorder %s8893_s9, %s6380_s12 }
  0x8d   : > { %5864 = vmatprep.subr.bf16.mxu1 %v6840_v20  ;;  %5960 = vmatprep.subr.bf16.mxu0 %v6840_v20  ;;  %9116 = vst [vmem:[#allocation22_spill] sm:$0xff] %v6887_v42  ;;  %9119 = vst [vmem:[#allocation25_spill] sm:$0xff] %v6902_v21  ;;  %v9134_v31 = vand.u32 4294901760, %v6902_v21  ;;  %v9161_v28 = vand.u32 4294901760, %v6902_v21 }
  0x8e   : > { %614 = vrot.lane.b32.xlu0 %v6290_v47, %s6456_s7  ;;  %s6787_s7 = sld [smem:[#allocation6]]  ;;  %v8955_v47 = vand.u32 4294901760, %v6856_v26  ;;  %9120 = vst [vmem:[#allocation26_spill] sm:$0xff] %v6905_v13  ;;  %v818_v19 = vsub.f32 %v6877_v40, %v817_v12  ;;  %v6968_v40 = vsub.f32 %v676_v24, %v6940_v43  ;;  %9133 = vst [vmem:[#allocation37_spill] sm:$0xff] %v6976_v63  ;;  %p6382_p9 = pnand %p6381_p12, %p9438_p8 }
  0x90   : > { %5866 = vmatpush3.bf16.msra.mxu1 %v6840_v20  ;;  %5962 = vmatpush3.bf16.msra.mxu0 %v6840_v20  ;;  %9130 = vst [vmem:[#allocation36_spill] sm:$0xff] %v6968_v40  ;;  %v9132_v20 = vand.u32 4294901760, %v6898_v0  ;;  %p6383_p10 = pneg %p6382_p9 }
  0x91   : > { %5868 = vmatprep.subr.bf16.mxu1 %v6887_v42  ;;  %5964 = vmatprep.subr.bf16.mxu0 %v6887_v42 }
  0x94   : > { %v6871_v34 = vstv %s6787_s7  ;;  %5870 = vmatpush3.bf16.msra.mxu1 %v6887_v42  ;;  %5966 = vmatpush3.bf16.msra.mxu0 %v6887_v42  ;;  %v828_v42 = vsub.f32 %v6892_v6, %v9131_v23  ;;  %s6457_s7 = smov 16  }
  0x95   : > { %v265_v8 = vsub.f32 %v6634_v1, %v6871_v34  ;;  %v675_v1 = vld [vmem:[%s6617_s11 + $0x48] sm:$0xff]  ;;  %v6914_v56 = vsub.f32 %v6646_v7, %v6871_v34  ;;  %v266_v16 = vsub.f32 %v6637_v2, %v6871_v34  ;;  %v6927_v7 = vpack.c.bf16 %v8955_v47, %v8956_v37  ;;  %v680_v37 = vld [vmem:[%s6617_s11 + $0x70] sm:$0xff] }
  0x96   : > { %v808_v2 = vsub.f32 %v6859_v27, %v8960_v4  ;;  %v6938_v49 = vand.u32 4294901760, %v675_v1  ;;  %v6950_v4 = vsub.f32 %v674_v60, %v6930_v18  ;;  %v681_v18 = vld [vmem:[%s6617_s11 + $0x78] sm:$0xff]  ;;  %v6992_v43 = vand.u32 4294901760, %v680_v37 }
  0x97   : > { %9122 = vst [vmem:[#allocation28_spill] sm:$0xff] %v6927_v7  ;;  %v269_v47 = vmul.f32 %v265_v8, %v265_v8  ;;  %v6954_v8 = vand.u32 4294901760, %v678_v55  ;;  %v6960_v41 = vmul.f32 %v266_v16, %v266_v16  ;;  %5872 = vmatprep.subr.bf16.mxu1 %v6927_v7  ;;  %5968 = vmatprep.subr.bf16.mxu0 %v6927_v7  ;;  %v7009_v54 = vand.u32 4294901760, %v681_v18 }
  0x98   : > { %9124 = vst [vmem:[#allocation30_spill] sm:$0xff] %v6938_v49  ;;  %9126 = vst [vmem:[#allocation32_spill] sm:$0xff] %v6950_v4  ;;  %v6965_v35 = vsub.f32 %v675_v1, %v6938_v49  ;;  %v809_v60 = vand.u32 4294901760, %v808_v2  ;;  %v838_v16 = vsub.f32 %v6898_v0, %v9132_v20  ;;  %v848_v1 = vsub.f32 %v6902_v21, %v9134_v31 }
  0x99   : > { %9128 = vst [vmem:[#allocation34_spill] sm:$0xff] %v6954_v8  ;;  %v9135_v49 = vand.u32 4294901760, %v6905_v13  ;;  %v9136_v2 = vand.u32 4294901760, %v6908_v11  ;;  %9137 = vst [vmem:[#allocation38_spill] sm:$0xff] %v6992_v43  ;;  %5874 = vmatpush3.bf16.msra.mxu1 %v6927_v7  ;;  %5970 = vmatpush3.bf16.msra.mxu0 %v6927_v7  ;;  %v819_v20 = vand.u32 4294901760, %v818_v19  ;;  %v6998_v31 = vsub.f32 %v677_v62, %v6952_v50 }
  0x9a   : > { %9129 = vst [vmem:[#allocation35_spill] sm:$0xff] %v6965_v35  ;;  %9140 = vst [vmem:[#allocation41_spill] sm:$0xff] %v7009_v54  ;;  %v7012_v19 = vmul.f32 %v6958_v17, %v269_v47  ;;  %v829_v62 = vand.u32 4294901760, %v828_v42  ;;  %v839_v61 = vand.u32 4294901760, %v838_v16  ;;  %v7015_v7 = vsub.f32 %v679_v59, %v6976_v63  ;;  %v682_v47 = vld [vmem:[%s6617_s11 + $0x80] sm:$0xff] }
  0x9b   : > { %v6985_v24 = vsub.f32 %v6905_v13, %v9135_v49  ;;  %v6990_v23 = vsub.f32 %v6908_v11, %v9136_v2  ;;  %9138 = vst [vmem:[#allocation39_spill] sm:$0xff] %v6998_v31  ;;  %v7001_v49 = vsub.f32 %v678_v55, %v6954_v8  ;;  %v7005_v2 = vsub.f32 %v6640_v3, %v6871_v34 }
  0x9c   : > { %9141 = vst [vmem:[#allocation42_spill] sm:$0xff] %v7015_v7  ;;  %5396 = vmatmul.mubr.f32.vlgmr.msra.gmra.mrb[0].mxu1 %v809_v60  ;;  %v9142_v55 = vand.u32 4294901760, %v6859_v27  ;;  %v849_v3 = vand.u32 4294901760, %v848_v1  ;;  %v7022_v30 = vsub.f32 %v680_v37, %v6992_v43  ;;  %v9144_v42 = vand.u32 4294901760, %v6950_v4  ;;  %v683_v1 = vld [vmem:[%s6617_s11 + $0x88] sm:$0xff] }
  0x9d   : > { %9139 = vst [vmem:[#allocation40_spill] sm:$0xff] %v7001_v49  ;;  %v859_v34 = vand.u32 4294901760, %v6985_v24  ;;  %5398 = vmatprep.mubr.f32.mxu1 %v819_v20  ;;  %v9145_v24 = vand.u32 4294901760, %v6685_v32  ;;  %v9147_v37 = vand.u32 4294901760, %v6965_v35  ;;  %v7049_v29 = vsub.f32 %v681_v18, %v7009_v54 }
  0x9e   : > { %5636 = vmatmul.mubr.f32.vlgmr.msra.gmra.mrb[0].mxu0 %v9142_v55  ;;  %9143 = vst [vmem:[#allocation43_spill] sm:$0xff] %v7022_v30  ;;  %v7028_v59 = vsub.f32 %v6950_v4, %v9144_v42  ;;  %v9150_v16 = vand.u32 4294901760, %v6690_v33  ;;  %v9153_v27 = vand.u32 4294901760, %v6699_v36  ;;  %v9154_v18 = vand.u32 4294901760, %v6892_v6  ;;  %v684_v6 = vld [vmem:[%s6617_s11 + $0x90] sm:$0xff] }
  0x9f   : > { %5638 = vmatprep.mubr.f32.mxu0 %v817_v12  ;;  %v7036_v55 = vsub.f32 %v6685_v32, %v9145_v24  ;;  %v7041_v20 = vsub.f32 %v6965_v35, %v9147_v37  ;;  %v9148_v12 = vand.u32 4294901760, %v6968_v40  ;;  %9149 = vst [vmem:[#allocation45_spill] sm:$0xff] %v7049_v29  ;;  %v7057_v24 = vand.u32 4294901760, %v682_v47 }
  0xa0   : > { %v7054_v60 = vsub.f32 %v6690_v33, %v9150_v16  ;;  %5399 = vmatmul.mubr.f32.gmra.mrb[2].mxu1 %v829_v62  ;;  %v7068_v16 = vand.u32 4294901760, %v683_v1  ;;  %v9156_v54 = vand.u32 4294901760, %v6704_v38  ;;  %v9158_v62 = vand.u32 4294901760, %v6998_v31 }
  0xa1   : > { %9146 = vst [vmem:[#allocation44_spill] sm:$0xff] %v7036_v55  ;;  %v7046_v42 = vsub.f32 %v6968_v40, %v9148_v12  ;;  %9152 = vst [vmem:[#allocation47_spill] sm:$0xff] %v7057_v24  ;;  %v1118_v37 = vand.u32 4294901760, %v7036_v55  ;;  %v7063_v12 = vsub.f32 %v6699_v36, %v9153_v27  ;;  %5401 = vmatprep.mubr.f32.mxu1 %v839_v61  ;;  %v9157_v36 = vand.u32 4294901760, %v6898_v0 }
  0xa2   : > { %9151 = vst [vmem:[#allocation46_spill] sm:$0xff] %v7054_v60  ;;  %5639 = vmatmul.mubr.f32.gmra.mrb[2].mxu0 %v9154_v18  ;;  %9155 = vst [vmem:[#allocation48_spill] sm:$0xff] %v7068_v16  ;;  %v1125_v32 = vand.u32 4294901760, %v7054_v60  ;;  %v7074_v43 = vsub.f32 %v6704_v38, %v9156_v54  ;;  %v879_v27 = vand.u32 4294901760, %v7028_v59  ;;  %v7082_v18 = vsub.f32 %v6998_v31, %v9158_v62 }
  0xa3   : > { %5641 = vmatprep.mubr.f32.mxu0 %v9157_v36  ;;  %v1119_v33 = vsub.f32 %v7036_v55, %v1118_v37  ;;  %v1132_v63 = vand.u32 4294901760, %v7063_v12  ;;  %v9159_v8 = vand.u32 4294901760, %v7001_v49  ;;  %v685_v36 = vld [vmem:[%s6617_s11 + $0x98] sm:$0xff]  ;;  %v889_v0 = vand.u32 4294901760, %v7041_v20 }
  0xa4   : > { %v1126_v61 = vsub.f32 %v7054_v60, %v1125_v32  ;;  %v5971_v59 = vpack.c.bf16 %v1125_v32, %v1118_v37  ;;  %v7097_v62 = vsub.f32 %v682_v47, %v7057_v24  ;;  %5402 = vmatmul.mubr.f32.gmra.mrb[4].mxu1 %v849_v3  ;;  %v7105_v60 = vand.u32 4294901760, %v684_v6 }
  0xa5   : > { %v7090_v38 = vsub.f32 %v7001_v49, %v9159_v8  ;;  %v1120_v50 = vand.u32 4294901760, %v1119_v33  ;;  %v1133_v55 = vsub.f32 %v7063_v12, %v1132_v63  ;;  %v7103_v8 = vsub.f32 %v683_v1, %v7068_v16  ;;  %5404 = vmatprep.mubr.f32.mxu1 %v859_v34 }
  0xa6   : > { %9160 = vst [vmem:[#allocation49_spill] sm:$0xff] %v7097_v62  ;;  %5642 = vmatmul.mubr.f32.gmra.mrb[4].mxu0 %v9161_v28  ;;  %v1127_v54 = vand.u32 4294901760, %v1126_v61  ;;  %9163 = vst [vmem:[#allocation51_spill] sm:$0xff] %v7105_v60  ;;  %v1139_v32 = vand.u32 4294901760, %v7074_v43  ;;  %v9164_v47 = vand.u32 4294901760, %v6905_v13  ;;  %v899_v20 = vand.u32 4294901760, %v7046_v42  ;;  %5972 = vmatprep.subr.bf16.mxu0 %v5971_v59 }
  0xa7   : > { %9162 = vst [vmem:[#allocation50_spill] sm:$0xff] %v7103_v8  ;;  %v9165_v3 = vand.u32 4294901760, %v7015_v7  ;;  %v9166_v28 = vand.u32 4294901760, %v7022_v30  ;;  %v7121_v33 = vand.u32 4294901760, %v685_v36  ;;  %v1134_v34 = vand.u32 4294901760, %v1133_v55  ;;  %v686_v42 = vld [vmem:[%s6617_s11 + $0xa0] sm:$0xff]  ;;  %5974 = vmatpush3.bf16.msra.mxu0 %v5971_v59 }
  0xa8   : > { %5644 = vmatprep.mubr.f32.mxu0 %v9164_v47  ;;  %v5875_v61 = vpack.c.bf16 %v1127_v54, %v1120_v50  ;;  %v1140_v47 = vsub.f32 %v7074_v43, %v1139_v32  ;;  %v5975_v13 = vpack.c.bf16 %v1139_v32, %v1132_v63  ;;  %v909_v21 = vand.u32 4294901760, %v7082_v18  ;;  %v687_v54 = vld [vmem:[%s6617_s11 + $0xa8] sm:$0xff]  ;;  %v689_v63 = vld [vmem:[%s6617_s11 + $0xb8] sm:$0xff] }
  0xa9   : > { %v7114_v37 = vsub.f32 %v7015_v7, %v9165_v3  ;;  %v7119_v1 = vsub.f32 %v7022_v30, %v9166_v28  ;;  %9167 = vst [vmem:[#allocation52_spill] sm:$0xff] %v7121_v33  ;;  %v919_v3 = vand.u32 4294901760, %v7090_v38  ;;  %v9011_v16 = vand.u32 4294901760, %v7097_v62 }
  0xaa   : > { %v9168_v28 = vand.u32 4294901760, %v6723_v44  ;;  %v9169_v50 = vand.u32 4294901760, %v6990_v23  ;;  %v9170_v55 = vand.u32 4294901760, %v6908_v11  ;;  %v7139_v18 = vsub.f32 %v684_v6, %v7105_v60  ;;  %5876 = vmatprep.subr.bf16.mxu1 %v5875_v61  ;;  %5976 = vmatprep.subr.bf16.mxu0 %v5975_v13 }
  0xab   : > { %v1141_v38 = vand.u32 4294901760, %v1140_v47  ;;  %v9172_v59 = vand.u32 4294901760, %v6728_v45  ;;  %v9173_v23 = vand.u32 4294901760, %v6950_v4  ;;  %v9174_v32 = vand.u32 4294901760, %v7049_v29  ;;  %5878 = vmatpush3.bf16.msra.mxu1 %v5875_v61  ;;  %5978 = vmatpush3.bf16.msra.mxu0 %v5975_v13 }
  0xac   : > { %v7131_v24 = vsub.f32 %v6723_v44, %v9168_v28  ;;  %5405 = vmatmul.mubr.f32.gmra.mrb[6].mxu1 %v9169_v50  ;;  %5645 = vmatmul.mubr.f32.gmra.mrb[6].mxu0 %v9170_v55  ;;  %9171 = vst [vmem:[#allocation53_spill] sm:$0xff] %v7139_v18  ;;  %v7154_v6 = vand.u32 4294901760, %v686_v42  ;;  %v9175_v50 = vand.u32 4294901760, %v6741_v48  ;;  %v7172_v4 = vsub.f32 %v7097_v62, %v9011_v16 }
  0xad   : > { %v7145_v44 = vsub.f32 %v6728_v45, %v9172_v59  ;;  %5407 = vmatprep.mubr.f32.mxu1 %v879_v27  ;;  %5647 = vmatprep.mubr.f32.mxu0 %v9173_v23  ;;  %v7152_v28 = vsub.f32 %v7049_v29, %v9174_v32  ;;  %v929_v45 = vand.u32 4294901760, %v7114_v37  ;;  %v7164_v27 = vsub.f32 %v685_v36, %v7121_v33  ;;  %v688_v32 = vld [vmem:[%s6617_s11 + $0xb0] sm:$0xff] }
  0xae   : > { %v1146_v47 = vand.u32 4294901760, %v7131_v24  ;;  %v7160_v55 = vsub.f32 %v6741_v48, %v9175_v50  ;;  %v5879_v59 = vpack.c.bf16 %v1141_v38, %v1134_v34  ;;  %v7174_v48 = vand.u32 4294901760, %v687_v54 }
  0xaf   : > { %9176 = vst [vmem:[#allocation54_spill] sm:$0xff] %v7164_v27  ;;  %v1153_v23 = vand.u32 4294901760, %v7145_v44  ;;  %v9177_v34 = vand.u32 4294901760, %v6965_v35  ;;  %v9178_v38 = vand.u32 4294901760, %v7103_v8  ;;  %v9179_v11 = vand.u32 4294901760, %v6968_v40 }
  0xb0   : > { %v1147_v37 = vsub.f32 %v7131_v24, %v1146_v47  ;;  %v1160_v36 = vand.u32 4294901760, %v7160_v55  ;;  %5408 = vmatmul.mubr.f32.gmra.mrb[8].mxu1 %v889_v0  ;;  %v7190_v33 = vsub.f32 %v686_v42, %v7154_v6  ;;  %v7192_v35 = vand.u32 4294901760, %v688_v32  ;;  %5880 = vmatprep.subr.bf16.mxu1 %v5879_v59 }
  0xb1   : > { %5648 = vmatmul.mubr.f32.gmra.mrb[8].mxu0 %v9177_v34  ;;  %v7183_v50 = vsub.f32 %v7103_v8, %v9178_v38  ;;  %v1154_v61 = vsub.f32 %v7145_v44, %v1153_v23  ;;  %v5979_v13 = vpack.c.bf16 %v1153_v23, %v1146_v47  ;;  %5410 = vmatprep.mubr.f32.mxu1 %v899_v20  ;;  %v7194_v34 = vand.u32 4294901760, %v689_v63 }
  0xb2   : > { %5650 = vmatprep.mubr.f32.mxu0 %v9179_v11  ;;  %9180 = vst [vmem:[#allocation55_spill] sm:$0xff] %v7190_v33  ;;  %v1148_v0 = vand.u32 4294901760, %v1147_v37  ;;  %v939_v38 = vand.u32 4294901760, %v7119_v1  ;;  %v1161_v47 = vsub.f32 %v7160_v55, %v1160_v36  ;;  %v9182_v20 = vand.u32 4294901760, %v6750_v51  ;;  %5882 = vmatpush3.bf16.msra.mxu1 %v5879_v59  ;;  %v690_v37 = vld [vmem:[%s6617_s11 + $0xc0] sm:$0xff] }
  0xb3   : > { %9181 = vst [vmem:[#allocation56_spill] sm:$0xff] %v7194_v34  ;;  %v1155_v60 = vand.u32 4294901760, %v1154_v61  ;;  %5980 = vmatprep.subr.bf16.mxu0 %v5979_v13  ;;  %v949_v42 = vand.u32 4294901760, %v7152_v28  ;;  %v959_v23 = vand.u32 4294901760, %v7172_v4  ;;  %v7207_v1 = vsub.f32 %v687_v54, %v7174_v48 }
  0xb4   : > { %v7201_v11 = vsub.f32 %v6750_v51, %v9182_v20  ;;  %5982 = vmatpush3.bf16.msra.mxu0 %v5979_v13  ;;  %5411 = vmatmul.mubr.f32.gmra.mrb[10].mxu1 %v909_v21  ;;  %v9184_v61 = vand.u32 4294901760, %v6998_v31  ;;  %v9185_v51 = vand.u32 4294901760, %v7139_v18  ;;  %v9186_v54 = vand.u32 4294901760, %v7001_v49 }
  0xb5   : > { %9183 = vst [vmem:[#allocation57_spill] sm:$0xff] %v7207_v1  ;;  %v5883_v28 = vpack.c.bf16 %v1155_v60, %v1148_v0  ;;  %5413 = vmatprep.mubr.f32.mxu1 %v919_v3  ;;  %v7223_v59 = vsub.f32 %v688_v32, %v7192_v35  ;;  %v7226_v13 = vsub.f32 %v689_v63, %v7194_v34  ;;  %v1162_v0 = vand.u32 4294901760, %v1161_v47  ;;  %v691_v47 = vld [vmem:[%s6617_s11 + $0xc8] sm:$0xff] }
  0xb6   : > { %5651 = vmatmul.mubr.f32.gmra.mrb[10].mxu0 %v9184_v61  ;;  %v7215_v20 = vsub.f32 %v7139_v18, %v9185_v51  ;;  %v1167_v4 = vand.u32 4294901760, %v7201_v11  ;;  %v9189_v61 = vand.u32 4294901760, %v6757_v52  ;;  %v9191_v32 = vand.u32 4294901760, %v7164_v27 }
  0xb7   : > { %5653 = vmatprep.mubr.f32.mxu0 %v9186_v54  ;;  %9187 = vst [vmem:[#allocation58_spill] sm:$0xff] %v7223_v59  ;;  %9188 = vst [vmem:[#allocation59_spill] sm:$0xff] %v7226_v13  ;;  %5884 = vmatprep.subr.bf16.mxu1 %v5883_v28  ;;  %v9190_v54 = vand.u32 4294901760, %v6762_v53  ;;  %v9196_v49 = vand.u32 4294901760, %v7190_v33 }
  0xb8   : > { %v7231_v60 = vsub.f32 %v6757_v52, %v9189_v61  ;;  %v1168_v3 = vsub.f32 %v7201_v11, %v1167_v4  ;;  %v5983_v51 = vpack.c.bf16 %v1167_v4, %v1160_v36  ;;  %v7242_v63 = vsub.f32 %v7164_v27, %v9191_v32  ;;  %5886 = vmatpush3.bf16.msra.mxu1 %v5883_v28 }
  0xb9   : > { %v7237_v16 = vsub.f32 %v6762_v53, %v9190_v54  ;;  %v7245_v52 = vand.u32 4294901760, %v690_v37  ;;  %5414 = vmatmul.mubr.f32.gmra.mrb[12].mxu1 %v929_v45  ;;  %v9193_v36 = vand.u32 4294901760, %v7015_v7  ;;  %v979_v53 = vand.u32 4294901760, %v7215_v20  ;;  %v692_v7 = vld [vmem:[%s6617_s11 + $0xd0] sm:$0xff] }
  0xba   : > { %v1174_v61 = vand.u32 4294901760, %v7231_v60  ;;  %v1169_v4 = vand.u32 4294901760, %v1168_v3  ;;  %v9194_v32 = vand.u32 4294901760, %v6776_v57  ;;  %5416 = vmatprep.mubr.f32.mxu1 %v939_v38  ;;  %v9195_v28 = vand.u32 4294901760, %v7022_v30  ;;  %5984 = vmatprep.subr.bf16.mxu0 %v5983_v51 }
  0xbb   : > { %9192 = vst [vmem:[#allocation60_spill] sm:$0xff] %v7245_v52  ;;  %5654 = vmatmul.mubr.f32.gmra.mrb[12].mxu0 %v9193_v36  ;;  %v1181_v54 = vand.u32 4294901760, %v7237_v16  ;;  %v7263_v45 = vsub.f32 %v7190_v33, %v9196_v49  ;;  %v9198_v49 = vand.u32 4294901760, %v7207_v1  ;;  %v7279_v20 = vsub.f32 %v690_v37, %v7245_v52 }
  0xbc   : > { %v7256_v21 = vsub.f32 %v6776_v57, %v9194_v32  ;;  %5656 = vmatprep.mubr.f32.mxu0 %v9195_v28  ;;  %v1175_v3 = vsub.f32 %v7231_v60, %v1174_v61  ;;  %v5887_v31 = vpack.c.bf16 %v1169_v4, %v1162_v0  ;;  %v7269_v57 = vand.u32 4294901760, %v691_v47  ;;  %5986 = vmatpush3.bf16.msra.mxu0 %v5983_v51 }
  0xbd   : > { %v1182_v38 = vsub.f32 %v7237_v16, %v1181_v54  ;;  %v5987_v32 = vpack.c.bf16 %v1181_v54, %v1174_v61  ;;  %v989_v28 = vand.u32 4294901760, %v7242_v63  ;;  %v7276_v30 = vsub.f32 %v7207_v1, %v9198_v49  ;;  %9199 = vst [vmem:[#allocation62_spill] sm:$0xff] %v7279_v20  ;;  %5417 = vmatmul.mubr.f32.gmra.mrb[14].mxu1 %v949_v42  ;;  %v693_v61 = vld [vmem:[%s6617_s11 + $0xd8] sm:$0xff] }
  0xbe   : > { %9197 = vst [vmem:[#allocation61_spill] sm:$0xff] %v7269_v57  ;;  %v1176_v36 = vand.u32 4294901760, %v1175_v3  ;;  %v9200_v0 = vand.u32 4294901760, %v7049_v29  ;;  %v7283_v40 = vand.u32 4294901760, %v692_v7  ;;  %v1188_v63 = vand.u32 4294901760, %v7256_v21  ;;  %5419 = vmatprep.mubr.f32.mxu1 %v959_v23  ;;  %5888 = vmatprep.subr.bf16.mxu1 %v5887_v31 }
  0xbf   : > { %v1183_v4 = vand.u32 4294901760, %v1182_v38  ;;  %v9202_v54 = vand.u32 4294901760, %v6781_v58  ;;  %v9203_v37 = vand.u32 4294901760, %v7097_v62  ;;  %v999_v42 = vand.u32 4294901760, %v7263_v45  ;;  %5988 = vmatprep.subr.bf16.mxu0 %v5987_v32  ;;  %5890 = vmatpush3.bf16.msra.mxu1 %v5887_v31 }
  0xc0   : > { %5657 = vmatmul.mubr.f32.gmra.mrb[14].mxu0 %v9200_v0  ;;  %9201 = vst [vmem:[#allocation63_spill] sm:$0xff] %v7283_v40  ;;  %v9204_v51 = vand.u32 4294901760, %v7223_v59  ;;  %v9205_v38 = vand.u32 4294901760, %v7226_v13  ;;  %v9206_v29 = vand.u32 4294901760, %v6809_v5  ;;  %v7315_v23 = vsub.f32 %v691_v47, %v7269_v57 }
  0xc1   : > { %v7290_v49 = vsub.f32 %v6781_v58, %v9202_v54  ;;  %5659 = vmatprep.mubr.f32.mxu0 %v9203_v37  ;;  %v5891_v45 = vpack.c.bf16 %v1183_v4, %v1176_v36  ;;  %v1189_v54 = vsub.f32 %v7256_v21, %v1188_v63  ;;  %5990 = vmatpush3.bf16.msra.mxu0 %v5987_v32  ;;  %v9209_v62 = vand.u32 4294901760, %v6818_v10 }
  0xc2   : > { %v7298_v3 = vsub.f32 %v7223_v59, %v9204_v51  ;;  %v7303_v0 = vsub.f32 %v7226_v13, %v9205_v38  ;;  %v7308_v58 = vsub.f32 %v6809_v5, %v9206_v29  ;;  %9207 = vst [vmem:[#allocation64_spill] sm:$0xff] %v7315_v23  ;;  %v694_v51 = vld [vmem:[%s6617_s11 + $0xe0] sm:$0xff]  ;;  %v7321_v29 = vand.u32 4294901760, %v693_v61 }
  0xc3   : > { %v1195_v37 = vand.u32 4294901760, %v7290_v49  ;;  %v7327_v47 = vsub.f32 %v6818_v10, %v9209_v62  ;;  %v9210_v36 = vand.u32 4294901760, %v7183_v50  ;;  %v9211_v4 = vand.u32 4294901760, %v7103_v8  ;;  %v695_v50 = vld [vmem:[%s6617_s11 + $0xe8] sm:$0xff]  ;;  %5892 = vmatprep.subr.bf16.mxu1 %v5891_v45 }
  0xc4   : > { %9208 = vst [vmem:[#allocation65_spill] sm:$0xff] %v7321_v29  ;;  %v1202_v38 = vand.u32 4294901760, %v7308_v58  ;;  %v7334_v31 = vsub.f32 %v692_v7, %v7283_v40  ;;  %v1190_v32 = vand.u32 4294901760, %v1189_v54  ;;  %v9213_v52 = vand.u32 4294901760, %v7139_v18  ;;  %5894 = vmatpush3.bf16.msra.mxu1 %v5891_v45 }
  0xc5   : > { %5420 = vmatmul.mubr.f32.gmra.mrb[16].mxu1 %v9210_v36  ;;  %5660 = vmatmul.mubr.f32.gmra.mrb[16].mxu0 %v9211_v4  ;;  %v1196_v5 = vsub.f32 %v7290_v49, %v1195_v37  ;;  %v5991_v57 = vpack.c.bf16 %v1195_v37, %v1188_v63  ;;  %v1009_v10 = vand.u32 4294901760, %v7276_v30  ;;  %v7340_v62 = vand.u32 4294901760, %v694_v51 }
  0xc6   : > { %9212 = vst [vmem:[#allocation66_spill] sm:$0xff] %v7334_v31  ;;  %5422 = vmatprep.mubr.f32.mxu1 %v979_v53  ;;  %5662 = vmatprep.mubr.f32.mxu0 %v9213_v52  ;;  %v1203_v36 = vsub.f32 %v7308_v58, %v1202_v38  ;;  %v1209_v4 = vand.u32 4294901760, %v7327_v47  ;;  %v1019_v7 = vand.u32 4294901760, %v7298_v3  ;;  %v696_v53 = vld [vmem:[%s6617_s11 + $0xf0] sm:$0xff]  ;;  %v9215_v63 = vand.u32 4294901760, %v6846_v22 }
  0xc7   : > { %9214 = vst [vmem:[#allocation67_spill] sm:$0xff] %v7340_v62  ;;  %v1197_v8 = vand.u32 4294901760, %v1196_v5  ;;  %5992 = vmatprep.subr.bf16.mxu0 %v5991_v57  ;;  %v9216_v30 = vand.u32 4294901760, %v7279_v20  ;;  %v7359_v3 = vsub.f32 %v693_v61, %v7321_v29  ;;  %v9219_v61 = vand.u32 4294901760, %v7190_v33 }
  0xc8   : > { %v7351_v52 = vsub.f32 %v6846_v22, %v9215_v63  ;;  %5994 = vmatpush3.bf16.msra.mxu0 %v5991_v57  ;;  %v1204_v54 = vand.u32 4294901760, %v1203_v36  ;;  %v1210_v5 = vsub.f32 %v7327_v47, %v1209_v4  ;;  %v9217_v22 = vand.u32 4294901760, %v7164_v27 }
  0xc9   : > { %v7356_v37 = vsub.f32 %v7279_v20, %v9216_v30  ;;  %5423 = vmatmul.mubr.f32.gmra.mrb[18].mxu1 %v989_v28  ;;  %v5895_v18 = vpack.c.bf16 %v1197_v8, %v1190_v32  ;;  %v7365_v30 = vand.u32 4294901760, %v695_v50  ;;  %v5995_v45 = vpack.c.bf16 %v1209_v4, %v1202_v38  ;;  %v697_v28 = vld [vmem:[%s6617_s11 + $0xf8] sm:$0xff]  ;;  %s7417_s11 = sld [smem:[#allocation6 + $0x102]] }
  0xca   : > { %5663 = vmatmul.mubr.f32.gmra.mrb[18].mxu0 %v9217_v22  ;;  %5425 = vmatprep.mubr.f32.mxu1 %v999_v42  ;;  %v7370_v57 = vsub.f32 %v694_v51, %v7340_v62  ;;  %v1211_v36 = vand.u32 4294901760, %v1210_v5  ;;  %v7372_v29 = vand.u32 4294901760, %v696_v53  ;;  %v1216_v27 = vand.u32 4294901760, %v7351_v52 }
  0xcb   : > { %9218 = vst [vmem:[#allocation68_spill] sm:$0xff] %v7365_v30  ;;  %5665 = vmatprep.mubr.f32.mxu0 %v9219_v61  ;;  %v275_v22 = vmul.f32 %v6958_v17, %v6960_v41  ;;  %v354_v8 = vstv %s7310_s8  ;;  %v7380_v32 = vstv %s7312_s13  ;;  %5896 = vmatprep.subr.bf16.mxu1 %v5895_v18  ;;  %v9221_v42 = vand.u32 4294901760, %v6856_v26  ;;  %s6459_s8 = smov [#allocation7]  }
  0xcc   : > { %9220 = vst [vmem:[#allocation69_spill] sm:$0xff] %v7372_v29  ;;  %5996 = vmatprep.subr.bf16.mxu0 %v5995_v45  ;;  %v1029_v51 = vand.u32 4294901760, %v7303_v0  ;;  %v9222_v4 = vand.u32 4294901760, %v7315_v23  ;;  %5898 = vmatpush3.bf16.msra.mxu1 %v5895_v18  ;;  %v5899_v41 = vpack.c.bf16 %v1211_v36, %v1204_v54  ;;  %v1217_v61 = vsub.f32 %v7351_v52, %v1216_v27  ;;  %v7414_v36 = vld [vmem:[%s6631_s14 + $0x8] sm:$0xff]  ;;  %s6384_s13 = sshll.u32 %s6459_s8, 4  ;;  %s6385_s13 = int_to_ptr.vmem [resolvable:$false] %s6384_s13 }
  0xcd   : > { %v7385_v38 = vsub.f32 %v6856_v26, %v9221_v42  ;;  %5998 = vmatpush3.bf16.msra.mxu0 %v5995_v45  ;;  %5426 = vmatmul.mubr.f32.gmra.mrb[20].mxu1 %v1009_v10  ;;  %v9223_v63 = vand.u32 4294901760, %v7207_v1  ;;  %v7398_v42 = vsub.f32 %v695_v50, %v7365_v30  ;;  %v7400_v0 = vand.u32 4294901760, %v697_v28  ;;  %p6387_p1 = scmp.lt.s32.totalorder %s8893_s9, %s6385_s13 }
  0xce   : > { %v1048_v5 = vsub.f32 %v7315_v23, %v9222_v4  ;;  %5428 = vmatprep.mubr.f32.mxu1 %v1019_v7  ;;  %v9225_v18 = vand.u32 4294901760, %v7223_v59  ;;  %v1039_v54 = vand.u32 4294901760, %v7356_v37  ;;  %v9226_v10 = vand.u32 4294901760, %v7334_v31  ;;  %5900 = vmatprep.subr.bf16.mxu1 %v5899_v41 }
  0xcf   : > { %5666 = vmatmul.mubr.f32.gmra.mrb[20].mxu0 %v9223_v63  ;;  %9224 = vst [vmem:[#allocation70_spill] sm:$0xff] %v7400_v0  ;;  %v1223_v33 = vand.u32 4294901760, %v7385_v38  ;;  %v7411_v50 = vsub.f32 %v696_v53, %v7372_v29  ;;  %v356_v4 = vsub.f32 %v7414_v36, %v354_v8  ;;  %v1218_v7 = vand.u32 4294901760, %v1217_v61  ;;  %v7426_v53 = vld [vmem:[%s6631_s14 + $0x18] sm:$0xff] }
  0xd0   : > { %5668 = vmatprep.mubr.f32.mxu0 %v9225_v18  ;;  %v1058_v63 = vsub.f32 %v7334_v31, %v9226_v10  ;;  %v280_v10 = vmul.f32 1.442695, %v7012_v19  ;;  %v268_v45 = vmul.f32 %v7005_v2, %v7005_v2  ;;  %v358_v26 = vsub.f32 %v7426_v53, %v354_v8  ;;  %5902 = vmatpush3.bf16.msra.mxu1 %v5899_v41 }
  0xd1   : > { %v1224_v37 = vsub.f32 %v7385_v38, %v1223_v33  ;;  %v5999_v18 = vpack.c.bf16 %v1223_v33, %v1216_v27  ;;  %v1049_v59 = vand.u32 4294901760, %v1048_v5  ;;  %5429 = vmatmul.mubr.f32.gmra.mrb[22].mxu1 %v1029_v51  ;;  %v9227_v1 = vand.u32 4294901760, %v7226_v13 }
  0xd2   : > { %v9228_v61 = vand.u32 4294901760, %v7359_v3  ;;  %v7436_v2 = vsub.f32 %v697_v28, %v7400_v0  ;;  %v452_v5 = vsub.f32 %v7414_v36, %v7380_v32  ;;  %5431 = vmatprep.mubr.f32.mxu1 %v1039_v54  ;;  %v9229_v51 = vand.u32 4294901760, %v7279_v20  ;;  %v7447_v28 = vld [vmem:[%s6631_s14] sm:$0xff] }
  0xd3   : > { %5669 = vmatmul.mubr.f32.gmra.mrb[22].mxu0 %v9227_v1  ;;  %v1225_v27 = vand.u32 4294901760, %v1224_v37  ;;  %v1059_v1 = vand.u32 4294901760, %v1058_v63  ;;  %v9230_v41 = vand.u32 4294901760, %v7370_v57  ;;  %v282_v13 = vmul.f32 1.442695, %v275_v22  ;;  %6000 = vmatprep.subr.bf16.mxu0 %v5999_v18  ;;  %v7455_v63 = vld [vmem:[%s6631_s14 + $0x10] sm:$0xff] }
  0xd4   : > { %v1068_v33 = vsub.f32 %v7359_v3, %v9228_v61  ;;  %5671 = vmatprep.mubr.f32.mxu0 %v9229_v51  ;;  %v360_v29 = vmul.f32 %v356_v4, %v356_v4  ;;  %v355_v37 = vsub.f32 %v7447_v28, %v354_v8  ;;  %v273_v54 = vmul.f32 %v6958_v17, %v268_v45  ;;  %s7475_s14 = sld [smem:[#allocation6 + $0x103]] }
  0xd5   : > { %v1078_v61 = vsub.f32 %v7370_v57, %v9230_v41  ;;  %v5903_v0 = vpack.c.bf16 %v1225_v27, %v1218_v7  ;;  %v7452_v30 = vstv %s7387_s26  ;;  %v362_v51 = vmul.f32 %v358_v26, %v358_v26  ;;  %6002 = vmatpush3.bf16.msra.mxu0 %v5999_v18  ;;  %5432 = vmatmul.mubr.f32.gmra.mrb[24].mxu1 %v1049_v59  ;;  %s6386_s26 = scalar_lea.vmem %s6385_s13, 1024 }
  0xd6   : > { %v357_v20 = vsub.f32 %v7455_v63, %v354_v8  ;;  %v451_v22 = vsub.f32 %v7447_v28, %v7380_v32  ;;  %v9231_v4 = vand.u32 4294901760, %v7315_v23  ;;  %v1069_v7 = vand.u32 4294901760, %v1068_v33  ;;  %5434 = vmatprep.mubr.f32.mxu1 %v1059_v1  ;;  %6004 = vmatprep.subr.bf16.mxu0 %v6711_v39  ;;  %p6388_p4 = scmp.lt.s32.totalorder %s6386_s26, %s6380_s12 }
  0xd7   : > { %v9232_v45 = vand.u32 4294901760, %v7398_v42  ;;  %v1107_v26 = vand.u32 4294901760, %v7436_v2  ;;  %v456_v41 = vmul.f32 %v452_v5, %v452_v5  ;;  %v454_v8 = vsub.f32 %v7426_v53, %v7380_v32  ;;  %5904 = vmatprep.subr.bf16.mxu1 %v5903_v0 }
  0xd8   : > { %5672 = vmatmul.mubr.f32.gmra.mrb[24].mxu0 %v9231_v4  ;;  %v9233_v18 = vand.u32 4294901760, %v7334_v31  ;;  %v1079_v19 = vand.u32 4294901760, %v1078_v61  ;;  %v9234_v59 = vand.u32 4294901760, %v7411_v50  ;;  %v365_v33 = vmul.f32 %v7452_v30, %v360_v29  ;;  %5906 = vmatpush3.bf16.msra.mxu1 %v5903_v0  ;;  %p6389_p11 = por %p6388_p4, %p6387_p1 }
  0xd9   : > { %v1088_v27 = vsub.f32 %v7398_v42, %v9232_v45  ;;  %v359_v23 = vmul.f32 %v355_v37, %v355_v37  ;;  %v459_v62 = vstv %s7417_s11  ;;  %v546_v45 = vstv %s7419_s22  ;;  %5435 = vmatmul.mubr.f32.gmra.mrb[26].mxu1 %v1069_v7 }
  0xda   : > { %5674 = vmatprep.mubr.f32.mxu0 %v9233_v18  ;;  %v1098_v4 = vsub.f32 %v7411_v50, %v9234_v59  ;;  %6291 = vpow2.f32 %v280_v10  ;;  %v267_v5 = vmul.f32 %v6914_v56, %v6914_v56  ;;  %v278_v1 = vmul.f32 1.442695, %v273_v54  ;;  %5437 = vmatprep.mubr.f32.mxu1 %v1079_v19  ;;  %p6390_p0 = pnand %p6389_p11, %p6383_p10 }
  0xdb   : > { %v367_v61 = vmul.f32 %v7452_v30, %v362_v51  ;;  %v455_v18 = vmul.f32 %v451_v22, %v451_v22  ;;  %v453_v29 = vsub.f32 %v7455_v63, %v7380_v32  ;;  %v9235_v37 = vand.u32 4294901760, %v7359_v3 }
  0xdc   : > { %v1089_v59 = vand.u32 4294901760, %v1088_v27  ;;  %v1108_v31 = vsub.f32 %v7436_v2, %v1107_v26  ;;  %v461_v40 = vmul.f32 %v459_v62, %v456_v41  ;;  %v458_v10 = vmul.f32 %v454_v8, %v454_v8 }
  0xdd   : > { %5675 = vmatmul.mubr.f32.gmra.mrb[26].mxu0 %v9235_v37  ;;  %v548_v34 = vsub.f32 %v7414_v36, %v546_v45  ;;  %v9236_v56 = vand.u32 4294901760, %v7370_v57  ;;  %v1099_v0 = vand.u32 4294901760, %v1098_v4  ;;  %6293 = vpow2.f32 %v282_v13 }
  0xde   : > { %v370_v54 = vmul.f32 1.442695, %v365_v33  ;;  %v364_v32 = vmul.f32 %v7452_v30, %v359_v23  ;;  %v361_v51 = vmul.f32 %v357_v20, %v357_v20  ;;  %v272_v22 = vmul.f32 %v6958_v17, %v267_v5  ;;  %5438 = vmatmul.mubr.f32.gmra.mrb[28].mxu1 %v1089_v59 }
  0xdf   : > { %5677 = vmatprep.mubr.f32.mxu0 %v9236_v56  ;;  %6295 = vpow2.f32 %v278_v1  ;;  %v374_v7 = vmul.f32 1.442695, %v367_v61  ;;  %v460_v27 = vmul.f32 %v459_v62, %v455_v18  ;;  %v457_v41 = vmul.f32 %v453_v29, %v453_v29  ;;  %5440 = vmatprep.mubr.f32.mxu1 %v1099_v0 }
  0xe0   : > { %v547_v8 = vsub.f32 %v7447_v28, %v546_v45  ;;  %v9237_v19 = vand.u32 4294901760, %v7398_v42  ;;  %v1109_v37 = vand.u32 4294901760, %v1108_v31  ;;  %v466_v13 = vmul.f32 1.442695, %v461_v40 }
  0xe1   : > { %v7495_v4 = vpop.permute.xlu1 %330  ;;  %v463_v33 = vmul.f32 %v459_v62, %v458_v10  ;;  %v552_v23 = vmul.f32 %v548_v34, %v548_v34  ;;  %v550_v20 = vsub.f32 %v7426_v53, %v546_v45  ;;  %v9238_v17 = vand.u32 4294901760, %v7411_v50 }
  0xe2   : > { %5678 = vmatmul.mubr.f32.gmra.mrb[28].mxu0 %v9237_v19  ;;  %6297 = vpow2.f32 %v370_v54  ;;  %v368_v5 = vmul.f32 1.442695, %v364_v32  ;;  %v366_v1 = vmul.f32 %v7452_v30, %v361_v51  ;;  %v555_v61 = vstv %s7475_s14  ;;  %5441 = vmatmul.mubr.f32.gmra.mrb[30].mxu1 %v1109_v37 }
  0xe3   : > { %5680 = vmatprep.mubr.f32.mxu0 %v9238_v17  ;;  %v276_v18 = vmul.f32 1.442695, %v272_v22  ;;  %6299 = vpow2.f32 %v374_v7  ;;  %v464_v31 = vmul.f32 1.442695, %v460_v27  ;;  %v462_v59 = vmul.f32 %v459_v62, %v457_v41  ;;  %5475 = vmatprep.mubr.f32.mxu1 %v6821_v9 }
  0xe4   : > { %v7502_v29 = vpop.permute.xlu0 %326  ;;  %v551_v40 = vmul.f32 %v547_v8, %v547_v8  ;;  %v549_v34 = vsub.f32 %v7455_v63, %v546_v45  ;;  %v7505_v10 = vpop.eup %6291  ;;  %6301 = vpow2.f32 %v466_v13  ;;  %v470_v0 = vmul.f32 1.442695, %v463_v33 }
  0xe5   : > { %v333_v56 = vpop.permute.xlu1 %332  ;;  %v557_v54 = vmul.f32 %v555_v61, %v552_v23  ;;  %v554_v32 = vmul.f32 %v550_v20, %v550_v20  ;;  %6303 = vpow2.f32 %v368_v5  ;;  %v372_v30 = vmul.f32 1.442695, %v366_v1  ;;  %v9239_v5 = vld [vmem:[#allocation17_spill] sm:$0xff]  ;;  %v9240_v1 = vld [vmem:[#allocation11_spill] sm:$0xff] }
  0xe6   : > { %5681 = vmatmul.mubr.f32.gmra.mrb[30].mxu0 %v1107_v26  ;;  %6305 = vpow2.f32 %v276_v18  ;;  %v468_v45 = vmul.f32 1.442695, %v462_v59  ;;  %v556_v22 = vmul.f32 %v555_v61, %v551_v40  ;;  %v553_v26 = vmul.f32 %v549_v34, %v549_v34  ;;  %5476 = vmatmul.mubr.f32.vlgmr.msra.gmra.mrb[0].mxu1 %v6827_v14  ;;  %v9241_v34 = vld [vmem:[#allocation18_spill] sm:$0xff] }
  0xe7   : > { %5715 = vmatprep.mubr.f32.mxu0 %v6821_v9  ;;  %v6294_v62 = vpop.eup %6293  ;;  %6307 = vpow2.f32 %v464_v31  ;;  %v562_v41 = vmul.f32 1.442695, %v557_v54  ;;  %v559_v8 = vmul.f32 %v555_v61, %v554_v32  ;;  %5478 = vmatprep.mubr.f32.mxu1 %v6829_v15 }
  0xe8   : > { %v329_v51 = vpop.permute.xlu0 %328  ;;  %6309 = vpow2.f32 %v470_v0  ;;  %v560_v13 = vmul.f32 1.442695, %v556_v22  ;;  %v558_v33 = vmul.f32 %v555_v61, %v553_v26  ;;  %v341_v31 = vmul.f32 %v6294_v62, %v333_v56 }
  0xe9   : > { %v6296_v7 = vpop.eup %6295  ;;  %v421_v27 = vpop.permute.xlu1 %420  ;;  %6311 = vpow2.f32 %v372_v30  ;;  %v566_v17 = vmul.f32 1.442695, %v559_v8  ;;  %v340_v62 = vmul.f32 %v7505_v10, %v7495_v4  ;;  %v9244_v8 = vld [vmem:[#allocation20_spill] sm:$0xff] }
  0xea   : > { %5716 = vmatmul.mubr.f32.vlgmr.msra.gmra.mrb[0].mxu0 %v6827_v14  ;;  %6313 = vpow2.f32 %v468_v45  ;;  %5479 = vmatmul.mubr.f32.gmra.mrb[2].mxu1 %v6851_v25  ;;  %v564_v40 = vmul.f32 1.442695, %v558_v33  ;;  %v339_v54 = vmul.f32 %v6296_v7, %v329_v51  ;;  %v9242_v45 = vld [vmem:[#allocation19_spill] sm:$0xff]  ;;  %vm345_vm0 = vcmp.ne.f32.partialorder %v341_v31, %v341_v31  ;;  %v9245_v33 = vld [vmem:[#allocation29_spill] sm:$0xff] }
  0xeb   : > { %5718 = vmatprep.mubr.f32.mxu0 %v6829_v15  ;;  %6006 = vmatpush3.bf16.msra.mxu0 %v6711_v39  ;;  %6315 = vpow2.f32 %v562_v41  ;;  %vm344_vm5 = vcmp.ne.f32.partialorder %v340_v62, %v340_v62 }
  0xec   : > { %6008 = vmatprep.subr.bf16.mxu0 %v6735_v46  ;;  %v6298_v19 = vpop.eup %6297  ;;  %v419_v37 = vpop.permute.xlu0 %418  ;;  %5481 = vmatprep.mubr.f32.mxu1 %v9239_v5  ;;  %6317 = vpow2.f32 %v560_v13  ;;  %vm343_vm2 = vcmp.ne.f32.partialorder %v339_v54, %v339_v54 }
  0xed   : > { %v6300_v23 = vpop.eup %6299  ;;  %v425_v20 = vpop.permute.xlu1 %424  ;;  %v431_v61 = vmul.f32 %v6298_v19, %v421_v27  ;;  %6319 = vpow2.f32 %v566_v17  ;;  %v9243_v27 = vld [vmem:[#allocation12_spill] sm:$0xff] }
  0xee   : > { %5719 = vmatmul.mubr.f32.gmra.mrb[2].mxu0 %v6851_v25  ;;  %v6302_v39 = vpop.eup %6301  ;;  %5482 = vmatmul.mubr.f32.gmra.mrb[4].mxu1 %v9241_v34  ;;  %v433_v32 = vmul.f32 %v6300_v23, %v425_v20  ;;  %6321 = vpow2.f32 %v564_v40  ;;  %v7545_v40 = vsel %vm343_vm2, 0.0, %v339_v54  ;;  %vm4678_vm2 = vcmask 1042434  }
  0xef   : > { %5721 = vmatprep.mubr.f32.mxu0 %v9239_v5  ;;  %6010 = vmatpush3.bf16.msra.mxu0 %v6735_v46  ;;  %v6304_v18 = vpop.eup %6303  ;;  %vm435_vm1 = vcmp.ne.f32.partialorder %v431_v61, %v431_v61 }
  0xf0   : > { %6012 = vmatprep.subr.bf16.mxu0 %v9240_v1  ;;  %v423_v59 = vpop.permute.xlu0 %422  ;;  %v6306_v0 = vpop.eup %6305  ;;  %5484 = vmatprep.mubr.f32.mxu1 %v9242_v45  ;;  %v430_v26 = vmul.f32 %v6304_v18, %v419_v37  ;;  %vm437_vm3 = vcmp.ne.f32.partialorder %v433_v32, %v433_v32  ;;  %v9247_v37 = vld [vmem:[#allocation46_spill] sm:$0xff]  ;;  %v7538_v17 = vsel %vm435_vm1, 0.0, %v431_v61  ;;  %v7542_v18 = vsel %vm345_vm0, 0.0, %v341_v31  ;;  %v9253_v31 = vld [vmem:[#allocation31_spill] sm:$0xff] }
  0xf1   : > { %v517_v30 = vpop.permute.xlu1 %516  ;;  %v6308_v46 = vpop.eup %6307  ;;  %v338_v51 = vmul.f32 %v6306_v0, %v7502_v29  ;;  %v9246_v29 = vld [vmem:[#allocation44_spill] sm:$0xff]  ;;  %9248 = vst [vmem:[#allocation17_spill] sm:$0xff] %v7538_v17  ;;  %v7548_v0 = vsel %vm437_vm3, 0.0, %v433_v32  ;;  %v443_v32 = vadd.f32 %v7538_v17, %v7545_v40  ;;  %v9258_v17 = vld [vmem:[#allocation37_spill] sm:$0xff]  ;;  %vm2964_vm0 = vcmask 261120  }
  0xf2   : > { %5722 = vmatmul.mubr.f32.gmra.mrb[4].mxu0 %v9241_v34  ;;  %v527_v22 = vmul.f32 %v6302_v39, %v517_v30  ;;  %v6310_v56 = vpop.eup %6309  ;;  %5485 = vmatmul.mubr.f32.gmra.mrb[6].mxu1 %v9244_v8  ;;  %v5907_v23 = vpack.c.bf16 %v9247_v37, %v9246_v29  ;;  %vm434_vm6 = vcmp.ne.f32.partialorder %v430_v26, %v430_v26  ;;  %vm4676_vm1 = vcmask 1041409  }
  0xf3   : > { %5724 = vmatprep.mubr.f32.mxu0 %v9242_v45  ;;  %6014 = vmatpush3.bf16.msra.mxu0 %v9240_v1  ;;  %v6312_v41 = vpop.eup %6311  ;;  %v9249_v1 = vld [vmem:[#allocation13_spill] sm:$0xff]  ;;  %vm342_vm7 = vcmp.ne.f32.partialorder %v338_v51, %v338_v51  ;;  %9250 = vst [vmem:[#allocation11_spill] sm:$0xff] %v7548_v0  ;;  %v445_v29 = vadd.f32 %v7548_v0, %v7542_v18  ;;  %vm4680_vm3 = vcmask 1043459  }
  0xf4   : > { %6016 = vmatprep.subr.bf16.mxu0 %v9243_v27  ;;  %v515_v7 = vpop.permute.xlu0 %514  ;;  %5487 = vmatprep.mubr.f32.mxu1 %v9245_v33  ;;  %v6314_v4 = vpop.eup %6313  ;;  %vm531_vm4 = vcmp.ne.f32.partialorder %v527_v22, %v527_v22  ;;  %v432_v39 = vmul.f32 %v6312_v41, %v423_v59  ;;  %v5915_v0 = vpack.c.bf16 %v7145_v44, %v7131_v24 }
  0xf5   : > { %v526_v19 = vmul.f32 %v6308_v46, %v515_v7  ;;  %v521_v13 = vpop.permute.xlu1 %520  ;;  %v6316_v20 = vpop.eup %6315  ;;  %v9251_v46 = vld [vmem:[#allocation30_spill] sm:$0xff]  ;;  %v7553_v61 = vsel %vm531_vm4, 0.0, %v527_v22  ;;  %5908 = vmatprep.subr.bf16.mxu1 %v5907_v23  ;;  %v5911_v22 = vpack.c.bf16 %v7074_v43, %v7063_v12  ;;  %vm4682_vm4 = vcmask 1044484  }
  0xf6   : > { %5725 = vmatmul.mubr.f32.gmra.mrb[6].mxu0 %v9244_v8  ;;  %v529_v10 = vmul.f32 %v6310_v56, %v521_v13  ;;  %5488 = vmatmul.mubr.f32.gmra.mrb[8].mxu1 %v9251_v46  ;;  %9252 = vst [vmem:[#allocation18_spill] sm:$0xff] %v7553_v61  ;;  %v6318_v54 = vpop.eup %6317  ;;  %v7566_v13 = vsel %vm344_vm5, 0.0, %v340_v62  ;;  %vm436_vm10 = vcmp.ne.f32.partialorder %v432_v39, %v432_v39  ;;  %vm4684_vm5 = vcmask 1045509  }
  0xf7   : > { %5727 = vmatprep.mubr.f32.mxu0 %v9245_v33  ;;  %6018 = vmatpush3.bf16.msra.mxu0 %v9243_v27  ;;  %vm530_vm8 = vcmp.ne.f32.partialorder %v526_v19, %v526_v19  ;;  %v7560_v27 = vsel %vm434_vm6, 0.0, %v430_v26  ;;  %v6320_v7 = vpop.eup %6319  ;;  %v9254_v26 = vld [vmem:[#allocation14_spill] sm:$0xff]  ;;  %v539_v37 = vadd.f32 %v7553_v61, %v443_v32  ;;  %vm4686_vm6 = vcmask 1046534  }
  0xf8   : > { %6020 = vmatprep.subr.bf16.mxu0 %v9249_v1  ;;  %v519_v30 = vpop.permute.xlu0 %518  ;;  %vm533_vm9 = vcmp.ne.f32.partialorder %v529_v10, %v529_v10  ;;  %5490 = vmatprep.mubr.f32.mxu1 %v9253_v31  ;;  %v7576_v43 = vsel %vm530_vm8, 0.0, %v526_v19  ;;  %v6322_v19 = vpop.eup %6321  ;;  %vm3449_vm8 = vcmask 523520  }
  0xf9   : > { %v528_v59 = vmul.f32 %v6314_v4, %v519_v30  ;;  %v613_v56 = vpop.permute.xlu1 %612  ;;  %v7569_v4 = vsel %vm342_vm7, 0.0, %v338_v51  ;;  %5910 = vmatpush3.bf16.msra.mxu1 %v5907_v23  ;;  %v7579_v12 = vsel %vm533_vm9, 0.0, %v529_v10  ;;  %v7590_v10 = vsel %vm436_vm10, 0.0, %v432_v39 }
  0xfa   : > { %5728 = vmatmul.mubr.f32.gmra.mrb[8].mxu0 %v9251_v46  ;;  %v623_v41 = vmul.f32 %v6316_v20, %v613_v56  ;;  %v9255_v20 = vld [vmem:[#allocation33_spill] sm:$0xff]  ;;  %v442_v51 = vadd.f32 %v7560_v27, %v7569_v4  ;;  %v9256_v56 = vld [vmem:[#allocation34_spill] sm:$0xff]  ;;  %5912 = vmatprep.subr.bf16.mxu1 %v5911_v22  ;;  %v444_v24 = vadd.f32 %v7590_v10, %v7566_v13  ;;  %vm4688_vm7 = vcmask 1047559  }
  0xfb   : > { %5730 = vmatprep.mubr.f32.mxu0 %v9253_v31  ;;  %6022 = vmatpush3.bf16.msra.mxu0 %v9249_v1  ;;  %vm532_vm12 = vcmp.ne.f32.partialorder %v528_v59, %v528_v59  ;;  %vm3934_vm9 = vcmask 785920   ;;  %vm4419_vm10 = vcmask 1048320  }
  0xfc   : > { %6024 = vmatprep.subr.bf16.mxu0 %v9254_v26  ;;  %vm627_vm11 = vcmp.ne.f32.partialorder %v623_v41, %v623_v41  ;;  %v611_v62 = vpop.permute.xlu0 %610  ;;  %5491 = vmatmul.mubr.f32.gmra.mrb[10].mxu1 %v9255_v20  ;;  %v7600_v39 = vsel %vm532_vm12, 0.0, %v528_v59  ;;  %vm4916_vm12 = vcmask 785408  }
  0xfd   : > { %v7585_v23 = vsel %vm627_vm11, 0.0, %v623_v41  ;;  %v622_v1 = vmul.f32 %v6318_v54, %v611_v62  ;;  %v617_v30 = vpop.permute.xlu1 %616  ;;  %5493 = vmatprep.mubr.f32.mxu1 %v9256_v56  ;;  %v538_v54 = vadd.f32 %v7576_v43, %v442_v51  ;;  %v541_v41 = vadd.f32 %v7579_v12, %v445_v29  ;;  %5914 = vmatpush3.bf16.msra.mxu1 %v5911_v22  ;;  %v9257_v62 = vld [vmem:[#allocation22_spill] sm:$0xff] }
  0xfe   : > { %5731 = vmatmul.mubr.f32.gmra.mrb[10].mxu0 %v9255_v20  ;;  %v625_v32 = vmul.f32 %v6320_v7, %v617_v30  ;;  %v635_v61 = vadd.f32 %v7585_v23, %v539_v37  ;;  %5916 = vmatprep.subr.bf16.mxu1 %v5915_v0  ;;  %v540_v59 = vadd.f32 %v7600_v39, %v444_v24  ;;  %vm4911_vm11 = vcmask 523264  }
  0xff   : > { %5733 = vmatprep.mubr.f32.mxu0 %v9256_v56  ;;  %6026 = vmatpush3.bf16.msra.mxu0 %v9254_v26  ;;  %vm626_vm13 = vcmp.ne.f32.partialorder %v622_v1, %v622_v1  ;;  %v9259_v26 = vld [vmem:[#allocation38_spill] sm:$0xff]  ;;  %v5935_v24 = vpack.c.bf16 %v7385_v38, %v7351_v52  ;;  %v9270_v52 = vld [vmem:[#allocation65_spill] sm:$0xff]  ;;  %v9271_v38 = vld [vmem:[#allocation67_spill] sm:$0xff] }
 0x100   : > { %6028 = vmatprep.subr.bf16.mxu0 %v9257_v62  ;;  %v7602_v7 = vsel %vm626_vm13, 0.0, %v622_v1  ;;  %vm629_vm14 = vcmp.ne.f32.partialorder %v625_v32, %v625_v32  ;;  %v615_v37 = vpop.permute.xlu0 %614  ;;  %v639_v30 = vadd.f32 1e-30, %v635_v61  ;;  %5494 = vmatmul.mubr.f32.gmra.mrb[12].mxu1 %v9258_v17  ;;  %v5919_v1 = vpack.c.bf16 %v7201_v11, %v7160_v55  ;;  %v9262_v11 = vld [vmem:[#allocation28_spill] sm:$0xff] }
 0x101   : > { %v7608_v44 = vsel %vm629_vm14, 0.0, %v625_v32  ;;  %v624_v22 = vmul.f32 %v6322_v19, %v615_v37  ;;  %v634_v29 = vadd.f32 %v7602_v7, %v538_v54  ;;  %5496 = vmatprep.mubr.f32.mxu1 %v9259_v26  ;;  %5918 = vmatpush3.bf16.msra.mxu1 %v5915_v0  ;;  %v9260_v54 = vld [vmem:[#allocation41_spill] sm:$0xff]  ;;  %v9261_v37 = vld [vmem:[#allocation47_spill] sm:$0xff]  ;;  %v5923_v55 = vpack.c.bf16 %v7237_v16, %v7231_v60  ;;  %v9265_v16 = vld [vmem:[#allocation52_spill] sm:$0xff] }
 0x102   : > { %5734 = vmatmul.mubr.f32.gmra.mrb[12].mxu0 %v9258_v17  ;;  %648 = vrot.lane.b32.xlu1 %v639_v30, %s6457_s7  ;;  %v637_v61 = vadd.f32 %v7608_v44, %v541_v41  ;;  %v9264_v30 = vld [vmem:[#allocation51_spill] sm:$0xff]  ;;  %v5931_v60 = vpack.c.bf16 %v7327_v47, %v7308_v58  ;;  %v9268_v58 = vld [vmem:[#allocation61_spill] sm:$0xff] }
 0x103   : > { %5736 = vmatprep.mubr.f32.mxu0 %v9259_v26  ;;  %vm628_vm15 = vcmp.ne.f32.partialorder %v624_v22, %v624_v22  ;;  %v638_v51 = vadd.f32 1e-30, %v634_v29  ;;  %6030 = vmatpush3.bf16.msra.mxu0 %v9257_v62  ;;  %v9263_v62 = vld [vmem:[#allocation48_spill] sm:$0xff]  ;;  %v9269_v47 = vld [vmem:[#allocation63_spill] sm:$0xff] }
 0x104   : > { %v7618_v19 = vsel %vm628_vm15, 0.0, %v624_v22  ;;  %v641_v32 = vadd.f32 1e-30, %v637_v61  ;;  %5497 = vmatmul.mubr.f32.gmra.mrb[14].mxu1 %v9260_v54  ;;  %5920 = vmatprep.subr.bf16.mxu1 %v5919_v1  ;;  %v5927_v22 = vpack.c.bf16 %v7290_v49, %v7256_v21  ;;  %v9266_v21 = vld [vmem:[#allocation56_spill] sm:$0xff]  ;;  %v9273_v61 = vld [vmem:[#allocation69_spill] sm:$0xff] }
 0x105   : > { %646 = vrot.lane.b32.xlu0 %v638_v51, %s6457_s7  ;;  %v636_v41 = vadd.f32 %v7618_v19, %v540_v59  ;;  %5499 = vmatprep.mubr.f32.mxu1 %v9261_v37  ;;  %v9267_v49 = vld [vmem:[#allocation60_spill] sm:$0xff]  ;;  %v9274_v59 = vld [vmem:[#allocation70_spill] sm:$0xff]  ;;  %v9275_v51 = vld [vmem:[#allocation15_spill] sm:$0xff] }
 0x106   : > { %5737 = vmatmul.mubr.f32.gmra.mrb[14].mxu0 %v9260_v54  ;;  %652 = vrot.lane.b32.xlu1 %v641_v32, %s6457_s7  ;;  %v9272_v29 = vld [vmem:[#allocation68_spill] sm:$0xff]  ;;  %v9277_v32 = vld [vmem:[#allocation21_spill] sm:$0xff] }
 0x107   : > { %5739 = vmatprep.mubr.f32.mxu0 %v9261_v37  ;;  %v640_v0 = vadd.f32 1e-30, %v636_v41  ;;  %6032 = vmatprep.subr.bf16.mxu0 %v9262_v11  ;;  %v9278_v41 = vld [vmem:[#allocation23_spill] sm:$0xff] }
 0x108   : > { %5500 = vmatmul.mubr.f32.gmra.mrb[16].mxu1 %v9263_v62  ;;  %6034 = vmatpush3.bf16.msra.mxu0 %v9262_v11  ;;  %v9298_v11 = vld [vmem:[#allocation59_spill] sm:$0xff] }
 0x109   : > { %650 = vrot.lane.b32.xlu0 %v640_v0, %s6457_s7  ;;  %5502 = vmatprep.mubr.f32.mxu1 %v9264_v30  ;;  %v9279_v0 = vld [vmem:[#allocation24_spill] sm:$0xff] }
 0x10a   : > { %5740 = vmatmul.mubr.f32.gmra.mrb[16].mxu0 %v9263_v62  ;;  %5922 = vmatpush3.bf16.msra.mxu1 %v5919_v1  ;;  %v9276_v1 = vld [vmem:[#allocation16_spill] sm:$0xff] }
 0x10b   : > { %5742 = vmatprep.mubr.f32.mxu0 %v9264_v30  ;;  %5924 = vmatprep.subr.bf16.mxu1 %v5923_v55 }
 0x10c   : > { %5503 = vmatmul.mubr.f32.gmra.mrb[18].mxu1 %v9265_v16 }
 0x10d   : > { %5505 = vmatprep.mubr.f32.mxu1 %v7154_v6 }
 0x10e   : > { %5743 = vmatmul.mubr.f32.gmra.mrb[18].mxu0 %v9265_v16  ;;  %5926 = vmatpush3.bf16.msra.mxu1 %v5923_v55  ;;  %v9280_v55 = vld [vmem:[#allocation25_spill] sm:$0xff] }
 0x10f   : > { %5745 = vmatprep.mubr.f32.mxu0 %v7154_v6  ;;  %5928 = vmatprep.subr.bf16.mxu1 %v5927_v22 }
 0x110   : > { %5506 = vmatmul.mubr.f32.gmra.mrb[20].mxu1 %v7174_v48 }
 0x111   : > { %5508 = vmatprep.mubr.f32.mxu1 %v7192_v35 }
 0x112   : > { %5746 = vmatmul.mubr.f32.gmra.mrb[20].mxu0 %v7174_v48  ;;  %5930 = vmatpush3.bf16.msra.mxu1 %v5927_v22 }
 0x113   : > { %5748 = vmatprep.mubr.f32.mxu0 %v7192_v35  ;;  %5932 = vmatprep.subr.bf16.mxu1 %v5931_v60 }
 0x114   : > { %5509 = vmatmul.mubr.f32.gmra.mrb[22].mxu1 %v9266_v21 }
 0x115   : > { %5511 = vmatprep.mubr.f32.mxu1 %v9267_v49 }
 0x116   : > { %5749 = vmatmul.mubr.f32.gmra.mrb[22].mxu0 %v9266_v21  ;;  %5934 = vmatpush3.bf16.msra.mxu1 %v5931_v60 }
 0x117   : > { %5751 = vmatprep.mubr.f32.mxu0 %v9267_v49  ;;  %5936 = vmatprep.subr.bf16.mxu1 %v5935_v24 }
 0x118   : > { %5512 = vmatmul.mubr.f32.gmra.mrb[24].mxu1 %v9268_v58 }
 0x119   : > { %5514 = vmatprep.mubr.f32.mxu1 %v9269_v47 }
 0x11a   : > { %5752 = vmatmul.mubr.f32.gmra.mrb[24].mxu0 %v9268_v58  ;;  %5938 = vmatpush3.bf16.msra.mxu1 %v5935_v24 }
 0x11b   : > { %5754 = vmatprep.mubr.f32.mxu0 %v9269_v47 }
 0x11c   : > { %5515 = vmatmul.mubr.f32.gmra.mrb[26].mxu1 %v9270_v52 }
 0x11d   : > { %5517 = vmatprep.mubr.f32.mxu1 %v9271_v38 }
 0x11e   : > { %5755 = vmatmul.mubr.f32.gmra.mrb[26].mxu0 %v9270_v52 }
 0x11f   : > { %5757 = vmatprep.mubr.f32.mxu0 %v9271_v38 }
 0x120   : > { %5518 = vmatmul.mubr.f32.gmra.mrb[28].mxu1 %v9272_v29 }
 0x121   : > { %5520 = vmatprep.mubr.f32.mxu1 %v9273_v61 }
 0x122   : > { %5758 = vmatmul.mubr.f32.gmra.mrb[28].mxu0 %v9272_v29 }
 0x123   : > { %5760 = vmatprep.mubr.f32.mxu0 %v9273_v61 }
 0x124   : > { %5521 = vmatmul.mubr.f32.gmra.mrb[30].mxu1 %v9274_v59 }
 0x125   : > { %5555 = vmatprep.mubr.f32.mxu1 %v9275_v51 }
 0x126   : > { %5761 = vmatmul.mubr.f32.gmra.mrb[30].mxu0 %v9274_v59 }
 0x127   : > { %5795 = vmatprep.mubr.f32.mxu0 %v6821_v9  ;;  %v9281_v9 = vld [vmem:[#allocation26_spill] sm:$0xff] }
 0x128   : > { %5556 = vmatmul.mubr.f32.vlgmr.msra.gmra.mrb[0].mxu1 %v9276_v1 }
 0x129   : > { %5558 = vmatprep.mubr.f32.mxu1 %v9277_v32 }
 0x12a   : > { %5796 = vmatmul.mubr.f32.vlgmr.msra.gmra.mrb[0].mxu0 %v6827_v14  ;;  %v9282_v14 = vld [vmem:[#allocation27_spill] sm:$0xff] }
 0x12b   : > { %5798 = vmatprep.mubr.f32.mxu0 %v6829_v15  ;;  %v9283_v15 = vld [vmem:[#allocation32_spill] sm:$0xff] }
 0x12c   : > { %5559 = vmatmul.mubr.f32.gmra.mrb[2].mxu1 %v9278_v41 }
 0x12d   : > { %5561 = vmatprep.mubr.f32.mxu1 %v9279_v0 }
 0x12e   : > { %5799 = vmatmul.mubr.f32.gmra.mrb[2].mxu0 %v6851_v25  ;;  %v9284_v25 = vld [vmem:[#allocation35_spill] sm:$0xff] }
 0x12f   : > { %5801 = vmatprep.mubr.f32.mxu0 %v9239_v5  ;;  %v9285_v5 = vld [vmem:[#allocation36_spill] sm:$0xff] }
 0x130   : > { %5562 = vmatmul.mubr.f32.gmra.mrb[4].mxu1 %v9280_v55 }
 0x131   : > { %5564 = vmatprep.mubr.f32.mxu1 %v9281_v9 }
 0x132   : > { %5802 = vmatmul.mubr.f32.gmra.mrb[4].mxu0 %v9241_v34  ;;  %v9286_v34 = vld [vmem:[#allocation39_spill] sm:$0xff] }
 0x133   : > { %5804 = vmatprep.mubr.f32.mxu0 %v9242_v45  ;;  %v9287_v45 = vld [vmem:[#allocation40_spill] sm:$0xff] }
 0x134   : > { %5565 = vmatmul.mubr.f32.gmra.mrb[6].mxu1 %v9282_v14 }
 0x135   : > { %5567 = vmatprep.mubr.f32.mxu1 %v9283_v15 }
 0x136   : > { %5805 = vmatmul.mubr.f32.gmra.mrb[6].mxu0 %v9244_v8  ;;  %v9288_v8 = vld [vmem:[#allocation42_spill] sm:$0xff] }
 0x137   : > { %5807 = vmatprep.mubr.f32.mxu0 %v9245_v33  ;;  %v9289_v33 = vld [vmem:[#allocation43_spill] sm:$0xff] }
 0x138   : > { %5568 = vmatmul.mubr.f32.gmra.mrb[8].mxu1 %v9284_v25 }
 0x139   : > { %5570 = vmatprep.mubr.f32.mxu1 %v9285_v5 }
 0x13a   : > { %5808 = vmatmul.mubr.f32.gmra.mrb[8].mxu0 %v9251_v46  ;;  %v9290_v46 = vld [vmem:[#allocation45_spill] sm:$0xff] }
 0x13b   : > { %5810 = vmatprep.mubr.f32.mxu0 %v9253_v31  ;;  %v9291_v31 = vld [vmem:[#allocation49_spill] sm:$0xff] }
 0x13c   : > { %5571 = vmatmul.mubr.f32.gmra.mrb[10].mxu1 %v9286_v34 }
 0x13d   : > { %5573 = vmatprep.mubr.f32.mxu1 %v9287_v45 }
 0x13e   : > { %5811 = vmatmul.mubr.f32.gmra.mrb[10].mxu0 %v9255_v20  ;;  %v9292_v20 = vld [vmem:[#allocation50_spill] sm:$0xff] }
 0x13f   : > { %5813 = vmatprep.mubr.f32.mxu0 %v9256_v56  ;;  %v9293_v56 = vld [vmem:[#allocation53_spill] sm:$0xff] }
 0x140   : > { %5574 = vmatmul.mubr.f32.gmra.mrb[12].mxu1 %v9288_v8 }
 0x141   : > { %5576 = vmatprep.mubr.f32.mxu1 %v9289_v33 }
 0x142   : > { %5814 = vmatmul.mubr.f32.gmra.mrb[12].mxu0 %v9258_v17  ;;  %v9294_v17 = vld [vmem:[#allocation54_spill] sm:$0xff] }
 0x143   : > { %5816 = vmatprep.mubr.f32.mxu0 %v9259_v26  ;;  %v9295_v26 = vld [vmem:[#allocation55_spill] sm:$0xff] }
 0x144   : > { %5577 = vmatmul.mubr.f32.gmra.mrb[14].mxu1 %v9290_v46 }
 0x145   : > { %5579 = vmatprep.mubr.f32.mxu1 %v9291_v31 }
 0x146   : > { %5817 = vmatmul.mubr.f32.gmra.mrb[14].mxu0 %v9260_v54  ;;  %v9296_v54 = vld [vmem:[#allocation57_spill] sm:$0xff] }
 0x147   : > { %5819 = vmatprep.mubr.f32.mxu0 %v9261_v37  ;;  %v9297_v37 = vld [vmem:[#allocation58_spill] sm:$0xff] }
 0x148   : > { %5580 = vmatmul.mubr.f32.gmra.mrb[16].mxu1 %v9292_v20 }
 0x149   : > { %5582 = vmatprep.mubr.f32.mxu1 %v9293_v56 }
 0x14a   : > { %5820 = vmatmul.mubr.f32.gmra.mrb[16].mxu0 %v9263_v62  ;;  %v9299_v62 = vld [vmem:[#allocation62_spill] sm:$0xff] }
 0x14b   : > { %5822 = vmatprep.mubr.f32.mxu0 %v9264_v30  ;;  %v9300_v30 = vld [vmem:[#allocation64_spill] sm:$0xff] }
 0x14c   : > { %5583 = vmatmul.mubr.f32.gmra.mrb[18].mxu1 %v9294_v17 }
 0x14d   : > { %5585 = vmatprep.mubr.f32.mxu1 %v9295_v26 }
 0x14e   : > { %5823 = vmatmul.mubr.f32.gmra.mrb[18].mxu0 %v9265_v16 }
 0x14f   : > { %5825 = vmatprep.mubr.f32.mxu0 %v7154_v6  ;;  %v9301_v6 = vld [vmem:[#allocation66_spill] sm:$0xff] }
 0x150   : > { %5586 = vmatmul.mubr.f32.gmra.mrb[20].mxu1 %v9296_v54 }
 0x151   : > { %5588 = vmatprep.mubr.f32.mxu1 %v9297_v37 }
 0x152   : > { %5826 = vmatmul.mubr.f32.gmra.mrb[20].mxu0 %v7174_v48 }
 0x153   : > { %5828 = vmatprep.mubr.f32.mxu0 %v7192_v35 }
 0x154   : > { %5589 = vmatmul.mubr.f32.gmra.mrb[22].mxu1 %v9298_v11 }
 0x155   : > { %5591 = vmatprep.mubr.f32.mxu1 %v9299_v62 }
 0x156   : > { %5829 = vmatmul.mubr.f32.gmra.mrb[22].mxu0 %v9266_v21 }
 0x157   : > { %5831 = vmatprep.mubr.f32.mxu0 %v9267_v49  ;;  %v2708_v49 = vlaneseq }
 0x158   : > { %5592 = vmatmul.mubr.f32.gmra.mrb[24].mxu1 %v9300_v30 }
 0x159   : > { %5594 = vmatprep.mubr.f32.mxu1 %v9301_v6 }
 0x15a   : > { %5832 = vmatmul.mubr.f32.gmra.mrb[24].mxu0 %v9268_v58  ;;  %v2709_v58 = vshrl.u32 %v2708_v49, 7 }
 0x15b   : > { %5834 = vmatprep.mubr.f32.mxu0 %v9269_v47 }
 0x15c   : > { %5595 = vmatmul.mubr.f32.gmra.mrb[26].mxu1 %v7359_v3  ;;  %v7733_v47 = vsub.s32 1, %v2709_v58  ;;  %v7748_v41 = vsub.s32 5, %v2709_v58  ;;  %v7751_v0 = vsub.s32 4, %v2709_v58  ;;  %v7756_v34 = vsub.s32 7, %v2709_v58 }
 0x15d   : > { %5597 = vmatprep.mubr.f32.mxu1 %v7370_v57  ;;  %v7759_v8 = vsub.s32 6, %v2709_v58 }
 0x15e   : > { %5835 = vmatmul.mubr.f32.gmra.mrb[26].mxu0 %v9270_v52  ;;  %v7735_v52 = vsub.s32 0, %v2709_v58 }
 0x15f   : > { %5837 = vmatprep.mubr.f32.mxu0 %v9271_v38 }
 0x160   : > { %5598 = vmatmul.mubr.f32.gmra.mrb[28].mxu1 %v7398_v42 }
 0x161   : > { %5600 = vmatprep.mubr.f32.mxu1 %v7411_v50 }
 0x162   : > { %5838 = vmatmul.mubr.f32.gmra.mrb[28].mxu0 %v9272_v29  ;;  %v7743_v29 = vsub.s32 3, %v2709_v58 }
 0x163   : > { %5840 = vmatprep.mubr.f32.mxu0 %v9273_v61  ;;  %v7745_v61 = vsub.s32 2, %v2709_v58 }
 0x164   : > { %5601 = vmatmul.mubr.f32.gmra.mrb[30].mxu1 %v7436_v2 }
 0x166   : > { %5841 = vmatmul.mubr.f32.gmra.mrb[30].mxu0 %v9274_v59 }
 0x174   : > { %v649_v35 = vpop.permute.xlu1 %648 }
 0x175   : > { %6323 = vrcp.f32 %v649_v35 }
 0x177   : > { %v647_v48 = vpop.permute.xlu0 %646 }
 0x178   : > { %6325 = vrcp.f32 %v647_v48  ;;  %v653_v3 = vpop.permute.xlu1 %652 }
 0x179   : > { %6327 = vrcp.f32 %v653_v3 }
 0x17b   : > { %v651_v57 = vpop.permute.xlu0 %650 }
 0x17c   : > { %6329 = vrcp.f32 %v651_v57 }
 0x17f   : > { %v6324_v24 = vpop.eup %6323 }
 0x180   : > { %v661_v42 = vmul.f32 %v7414_v36, %v6324_v24 }
 0x182   : > { %v6326_v22 = vpop.eup %6325  ;;  %2694 = vrot.lane.b32.xlu1 %v661_v42, %s6458_s23 }
 0x183   : > { %v6328_v50 = vpop.eup %6327  ;;  %v659_v16 = vmul.f32 %v7447_v28, %v6326_v22 }
 0x184   : > { %v665_v2 = vmul.f32 %v7426_v53, %v6328_v50 }
 0x185   : > { %2692 = vrot.lane.b32.xlu0 %v659_v16, %s6458_s23 }
 0x186   : > { %v6330_v60 = vpop.eup %6329  ;;  %2698 = vrot.lane.b32.xlu1 %v665_v2, %s6458_s23 }
 0x187   : > { %v663_v21 = vmul.f32 %v7455_v63, %v6330_v60 }
 0x189   : > { %2696 = vrot.lane.b32.xlu0 %v663_v21, %s6458_s23 }
 0x1f4   : > { %v7753_v25 = vpop.permute.xlu1 %2694 }
 0x1f5   : > { %v2705_v56 = vmul.f32 %v7753_v25, %v7545_v40 }
 0x1f7   : > { %v7737_v36 = vpop.permute.xlu0 %2692  ;;  %v2774_v40 = vrot.slane %v2705_v56, %v7733_v47  ;;  %v2767_v24 = vrot.slane %v2705_v56, %v7735_v52  ;;  %v2788_v49 = vrot.slane %v2705_v56, %v7743_v29 }
 0x1f8   : > { %v2704_v38 = vmul.f32 %v7737_v36, %v7569_v4 }
 0x1fa   : > { %v2718_v28 = vrot.slane %v2704_v38, %v7733_v47  ;;  %v2711_v53 = vrot.slane %v2704_v38, %v7735_v52  ;;  %v2732_v32 = vrot.slane %v2704_v38, %v7743_v29  ;;  %v2725_v4 = vrot.slane %v2704_v38, %v7745_v61 }
 0x1fb   : > { %v5557_v63 = vpop.f32.mrb[0].mxu1  ;;  %v2746_v5 = vrot.slane %v2704_v38, %v7748_v41  ;;  %v2739_v45 = vrot.slane %v2704_v38, %v7751_v0  ;;  %v2760_v17 = vrot.slane %v2704_v38, %v7756_v34  ;;  %v2753_v26 = vrot.slane %v2704_v38, %v7759_v8 }
 0x1fc   : > { %2720 = vbcast.lane.b32.xlu1 %v2718_v28, 256  ;;  %v1552_v51 = vpop.f32.mrb[1].mxu1  ;;  %2713 = vbcast.lane.b32.xlu0 %v2711_v53, 256  ;;  %v2781_v38 = vrot.slane %v2705_v56, %v7745_v61 }
 0x1fd   : > { %v5797_v59 = vpop.f32.mrb[0].mxu0 }
 0x1fe   : > { %v2498_v1 = vpop.f32.mrb[1].mxu0  ;;  %v7765_v11 = vadd.f32 %v5797_v59, %v5557_v63  ;;  %v2802_v63 = vrot.slane %v2705_v56, %v7748_v41 }
 0x1ff   : > { %v5560_v55 = vpop.f32.mrb[2].mxu1  ;;  %v7767_v62 = vadd.f32 %v2498_v1, %v1552_v51 }
 0x200   : > { %2734 = vbcast.lane.b32.xlu1 %v2732_v32, 256  ;;  %v1566_v14 = vpop.f32.mrb[3].mxu1  ;;  %2727 = vbcast.lane.b32.xlu0 %v2725_v4, 256  ;;  %9302 = vst [vmem:[#allocation19_spill] sm:$0xff] %v7765_v11  ;;  %v7792_v32 = vpop.permute.xlu0 %2696  ;;  %v2795_v4 = vrot.slane %v2705_v56, %v7751_v0 }
 0x201   : > { %v5800_v9 = vpop.f32.mrb[2].mxu0  ;;  %9303 = vst [vmem:[#allocation12_spill] sm:$0xff] %v7767_v62 }
 0x202   : > { %v2510_v15 = vpop.f32.mrb[3].mxu0  ;;  %v7769_v35 = vadd.f32 %v5800_v9, %v5560_v55  ;;  %v7797_v9 = vpop.permute.xlu1 %2698 }
 0x203   : > { %v5563_v33 = vpop.f32.mrb[4].mxu1  ;;  %v7771_v48 = vadd.f32 %v2510_v15, %v1566_v14  ;;  %v2706_v14 = vmul.f32 %v7792_v32, %v7566_v13  ;;  %v2816_v15 = vrot.slane %v2705_v56, %v7756_v34  ;;  %v7813_v13 = vmul.f32 %v7797_v9, %v7579_v12 }
 0x204   : > { %2748 = vbcast.lane.b32.xlu1 %v2746_v5, 256  ;;  %v1580_v31 = vpop.f32.mrb[5].mxu1  ;;  %2741 = vbcast.lane.b32.xlu0 %v2739_v45, 256  ;;  %9304 = vst [vmem:[#allocation20_spill] sm:$0xff] %v7769_v35  ;;  %v7830_v12 = vmul.f32 %v7792_v32, %v7618_v19 }
 0x205   : > { %v5803_v46 = vpop.f32.mrb[4].mxu0  ;;  %9305 = vst [vmem:[#allocation29_spill] sm:$0xff] %v7771_v48 }
 0x206   : > { %v2522_v20 = vpop.f32.mrb[5].mxu0  ;;  %v7774_v3 = vadd.f32 %v5803_v46, %v5563_v33  ;;  %v7804_v33 = vmul.f32 %v7792_v32, %v7600_v39  ;;  %v2809_v46 = vrot.slane %v2705_v56, %v7759_v8  ;;  %v7821_v39 = vmul.f32 %v7737_v36, %v7602_v7 }
 0x207   : > { %v5566_v54 = vpop.f32.mrb[6].mxu1  ;;  %v7776_v57 = vadd.f32 %v2522_v20, %v1580_v31  ;;  %v7825_v56 = vmul.f32 %v7797_v9, %v7608_v44 }
 0x208   : > { %2762 = vbcast.lane.b32.xlu1 %v2760_v17, 256  ;;  %v1594_v30 = vpop.f32.mrb[7].mxu1  ;;  %2755 = vbcast.lane.b32.xlu0 %v2753_v26, 256  ;;  %9306 = vst [vmem:[#allocation44_spill] sm:$0xff] %v7774_v3 }
 0x209   : > { %v5806_v37 = vpop.f32.mrb[6].mxu0  ;;  %9307 = vst [vmem:[#allocation46_spill] sm:$0xff] %v7776_v57 }
 0x20a   : > { %v2534_v6 = vpop.f32.mrb[7].mxu0  ;;  %v7779_v50 = vadd.f32 %v5806_v37, %v5566_v54  ;;  %v7817_v54 = vmul.f32 %v7753_v25, %v7585_v23  ;;  %v2830_v37 = vrot.slane %v2706_v14, %v7733_v47 }
 0x20b   : > { %v5569_v42 = vpop.f32.mrb[8].mxu1  ;;  %v7781_v16 = vadd.f32 %v2534_v6, %v1594_v30 }
 0x20c   : > { %2776 = vbcast.lane.b32.xlu1 %v2774_v40, 256  ;;  %9308 = vst [vmem:[#allocation13_spill] sm:$0xff] %v7779_v50  ;;  %v1608_v2 = vpop.f32.mrb[9].mxu1  ;;  %2769 = vbcast.lane.b32.xlu0 %v2767_v24, 256  ;;  %v2823_v40 = vrot.slane %v2706_v14, %v7735_v52 }
 0x20d   : > { %v5809_v22 = vpop.f32.mrb[8].mxu0  ;;  %9309 = vst [vmem:[#allocation30_spill] sm:$0xff] %v7781_v16 }
 0x20e   : > { %v2546_v60 = vpop.f32.mrb[9].mxu0  ;;  %v7783_v21 = vadd.f32 %v5809_v22, %v5569_v42 }
 0x20f   : > { %v7786_v58 = vadd.f32 %v2546_v60, %v1608_v2  ;;  %v5572_v28 = vpop.f32.mrb[10].mxu1  ;;  %v2844_v2 = vrot.slane %v2706_v14, %v7743_v29 }
 0x210   : > { %9310 = vst [vmem:[#allocation31_spill] sm:$0xff] %v7783_v21  ;;  %2790 = vbcast.lane.b32.xlu1 %v2788_v49, 256  ;;  %2783 = vbcast.lane.b32.xlu0 %v2781_v38, 256  ;;  %v1622_v51 = vpop.f32.mrb[11].mxu1  ;;  %v2837_v38 = vrot.slane %v2706_v14, %v7745_v61 }
 0x211   : > { %9311 = vst [vmem:[#allocation14_spill] sm:$0xff] %v7786_v58  ;;  %v5812_v53 = vpop.f32.mrb[10].mxu0 }
 0x212   : > { %v7790_v59 = vadd.f32 %v5812_v53, %v5572_v28  ;;  %v2558_v1 = vpop.f32.mrb[11].mxu0 }
 0x213   : > { %v7795_v55 = vadd.f32 %v2558_v1, %v1622_v51  ;;  %v5575_v5 = vpop.f32.mrb[12].mxu1 }
 0x214   : > { %2804 = vbcast.lane.b32.xlu1 %v2802_v63, 256  ;;  %2797 = vbcast.lane.b32.xlu0 %v2795_v4, 256  ;;  %v1636_v20 = vpop.f32.mrb[13].mxu1 }
 0x215   : > { %v5815_v45 = vpop.f32.mrb[12].mxu0 }
 0x216   : > { %v7807_v31 = vadd.f32 %v5815_v45, %v5575_v5  ;;  %v2570_v17 = vpop.f32.mrb[13].mxu0 }
 0x217   : > { %v7809_v26 = vadd.f32 %v2570_v17, %v1636_v20  ;;  %v5578_v30 = vpop.f32.mrb[14].mxu1  ;;  %v2851_v20 = vrot.slane %v2706_v14, %v7751_v0 }
 0x218   : > { %2818 = vbcast.lane.b32.xlu1 %v2816_v15, 256  ;;  %2811 = vbcast.lane.b32.xlu0 %v2809_v46, 256  ;;  %v1650_v24 = vpop.f32.mrb[15].mxu1  ;;  %v2858_v46 = vrot.slane %v2706_v14, %v7748_v41 }
 0x219   : > { %v5818_v6 = vpop.f32.mrb[14].mxu0 }
 0x21a   : > { %v7833_v23 = vadd.f32 %v5818_v6, %v5578_v30  ;;  %v2582_v42 = vpop.f32.mrb[15].mxu0 }
 0x21b   : > { %v7837_v44 = vadd.f32 %v2582_v42, %v1650_v24  ;;  %v5581_v28 = vpop.f32.mrb[16].mxu1  ;;  %v2707_v24 = vmul.f32 %v7797_v9, %v7542_v18  ;;  %v2872_v42 = vrot.slane %v2706_v14, %v7756_v34 }
 0x21c   : > { %9312 = vst [vmem:[#allocation33_spill] sm:$0xff] %v7833_v23  ;;  %2832 = vbcast.lane.b32.xlu1 %v2830_v37, 256  ;;  %2825 = vbcast.lane.b32.xlu0 %v2823_v40, 256  ;;  %v1664_v15 = vpop.f32.mrb[17].mxu1 }
 0x21d   : > { %9313 = vst [vmem:[#allocation34_spill] sm:$0xff] %v7837_v44  ;;  %v5821_v53 = vpop.f32.mrb[16].mxu0  ;;  %v2893_v1 = vrot.slane %v2707_v24, %v7745_v61  ;;  %v2907_v63 = vrot.slane %v2707_v24, %v7751_v0 }
 0x21e   : > { %v7855_v4 = vadd.f32 %v5821_v53, %v5581_v28  ;;  %v2594_v5 = vpop.f32.mrb[17].mxu0 }
 0x21f   : > { %v7857_v45 = vadd.f32 %v2594_v5, %v1664_v15  ;;  %v5584_v17 = vpop.f32.mrb[18].mxu1  ;;  %v2886_v15 = vrot.slane %v2707_v24, %v7733_v47 }
 0x220   : > { %2846 = vbcast.lane.b32.xlu1 %v2844_v2, 256  ;;  %9314 = vst [vmem:[#allocation22_spill] sm:$0xff] %v7855_v4  ;;  %2839 = vbcast.lane.b32.xlu0 %v2837_v38, 256  ;;  %v1678_v6 = vpop.f32.mrb[19].mxu1  ;;  %v2865_v38 = vrot.slane %v2706_v14, %v7759_v8  ;;  %v2900_v14 = vrot.slane %v2707_v24, %v7743_v29 }
 0x221   : > { %v5824_v37 = vpop.f32.mrb[18].mxu0 }
 0x222   : > { %v7861_v30 = vadd.f32 %v5824_v37, %v5584_v17  ;;  %v2606_v40 = vpop.f32.mrb[19].mxu0  ;;  %v2879_v17 = vrot.slane %v2707_v24, %v7735_v52 }
 0x223   : > { %v7866_v2 = vadd.f32 %v2606_v40, %v1678_v6  ;;  %v5587_v28 = vpop.f32.mrb[20].mxu1 }
 0x224   : > { %2860 = vbcast.lane.b32.xlu1 %v2858_v46, 256  ;;  %2853 = vbcast.lane.b32.xlu0 %v2851_v20, 256  ;;  %v1692_v46 = vpop.f32.mrb[21].mxu1 }
 0x225   : > { %v5827_v53 = vpop.f32.mrb[20].mxu0 }
 0x226   : > { %v7870_v5 = vadd.f32 %v5827_v53, %v5587_v28  ;;  %v2618_v20 = vpop.f32.mrb[21].mxu0 }
 0x227   : > { %v7873_v37 = vadd.f32 %v2618_v20, %v1692_v46  ;;  %v5590_v18 = vpop.f32.mrb[22].mxu1  ;;  %v2914_v46 = vrot.slane %v2707_v24, %v7748_v41 }
 0x228   : > { %2874 = vbcast.lane.b32.xlu1 %v2872_v42, 256  ;;  %2867 = vbcast.lane.b32.xlu0 %v2865_v38, 256  ;;  %9315 = vst [vmem:[#allocation37_spill] sm:$0xff] %v7870_v5  ;;  %v1706_v42 = vpop.f32.mrb[23].mxu1 }
 0x229   : > { %v5830_v6 = vpop.f32.mrb[22].mxu0 }
 0x22a   : > { %v7876_v40 = vadd.f32 %v5830_v6, %v5590_v18  ;;  %v2630_v38 = vpop.f32.mrb[23].mxu0 }
 0x22b   : > { %v7879_v28 = vadd.f32 %v2630_v38, %v1706_v42  ;;  %v5593_v53 = vpop.f32.mrb[24].mxu1 }
 0x22c   : > { %2888 = vbcast.lane.b32.xlu1 %v2886_v15, 256  ;;  %2881 = vbcast.lane.b32.xlu0 %v2879_v17, 256  ;;  %9316 = vst [vmem:[#allocation38_spill] sm:$0xff] %v7876_v40  ;;  %v1720_v20 = vpop.f32.mrb[25].mxu1 }
 0x22d   : > { %v5833_v51 = vpop.f32.mrb[24].mxu0 }
 0x22e   : > { %v7882_v15 = vadd.f32 %v5833_v51, %v5593_v53  ;;  %v2642_v17 = vpop.f32.mrb[25].mxu0  ;;  %v2921_v53 = vrot.slane %v2707_v24, %v7759_v8 }
 0x22f   : > { %v7885_v18 = vadd.f32 %v2642_v17, %v1720_v20  ;;  %v5596_v6 = vpop.f32.mrb[26].mxu1 }
 0x230   : > { %2902 = vbcast.lane.b32.xlu1 %v2900_v14, 256  ;;  %2895 = vbcast.lane.b32.xlu0 %v2893_v1, 256  ;;  %9317 = vst [vmem:[#allocation41_spill] sm:$0xff] %v7882_v15  ;;  %v3189_v14 = vmul.f32 %v7737_v36, %v7560_v27  ;;  %v2928_v1 = vrot.slane %v2707_v24, %v7756_v34  ;;  %v1734_v38 = vpop.f32.mrb[27].mxu1 }
 0x231   : > { %v5836_v49 = vpop.f32.mrb[26].mxu0 }
 0x232   : > { %v7890_v42 = vadd.f32 %v5836_v49, %v5596_v6  ;;  %v2654_v51 = vpop.f32.mrb[27].mxu0  ;;  %v3196_v17 = vrot.slane %v3189_v14, %v7735_v52  ;;  %v3217_v24 = vrot.slane %v3189_v14, %v7743_v29 }
 0x233   : > { %v7893_v60 = vadd.f32 %v2654_v51, %v1734_v38 }
 0x234   : > { %2916 = vbcast.lane.b32.xlu1 %v2914_v46, 256  ;;  %2909 = vbcast.lane.b32.xlu0 %v2907_v63, 256  ;;  %9318 = vst [vmem:[#allocation47_spill] sm:$0xff] %v7890_v42  ;;  %v3203_v46 = vrot.slane %v3189_v14, %v7733_v47  ;;  %v5599_v63 = vpop.f32.mrb[28].mxu1 }
 0x235   : > { %9319 = vst [vmem:[#allocation28_spill] sm:$0xff] %v7893_v60  ;;  %v5839_v20 = vpop.f32.mrb[28].mxu0  ;;  %v1748_v27 = vpop.f32.mrb[29].mxu1 }
 0x236   : > { %v7897_v19 = vadd.f32 %v5839_v20, %v5599_v63  ;;  %v2666_v22 = vpop.f32.mrb[29].mxu0  ;;  %v3231_v63 = vrot.slane %v3189_v14, %v7748_v41 }
 0x237   : > { %v7899_v49 = vadd.f32 %v2666_v22, %v1748_v27  ;;  %v5602_v6 = vpop.f32.mrb[30].mxu1  ;;  %v3224_v22 = vrot.slane %v3189_v14, %v7751_v0  ;;  %v3238_v27 = vrot.slane %v3189_v14, %v7759_v8 }
 0x238   : > { %2930 = vbcast.lane.b32.xlu1 %v2928_v1, 256  ;;  %2923 = vbcast.lane.b32.xlu0 %v2921_v53, 256  ;;  %v3210_v1 = vrot.slane %v3189_v14, %v7745_v61  ;;  %v1762_v53 = vpop.f32.mrb[31].mxu1 }
 0x239   : > { %v5842_v38 = vpop.f32.mrb[30].mxu0 }
 0x23a   : > { %v7903_v51 = vadd.f32 %v5842_v38, %v5602_v6  ;;  %v2678_v7 = vpop.f32.mrb[31].mxu0 }
 0x23b   : > { %v7905_v60 = vadd.f32 %v2678_v7, %v1762_v53 }
 0x23c   : > { %3205 = vbcast.lane.b32.xlu1 %v3203_v46, 256  ;;  %3198 = vbcast.lane.b32.xlu0 %v3196_v17, 256  ;;  %9320 = vst [vmem:[#allocation48_spill] sm:$0xff] %v7903_v51  ;;  %v9322_v46 = vld [vmem:[#allocation17_spill] sm:$0xff]  ;;  %v3245_v17 = vrot.slane %v3189_v14, %v7756_v34  ;;  %v3191_v14 = vmul.f32 %v7792_v32, %v7590_v10 }
 0x23d   : > { %9321 = vst [vmem:[#allocation51_spill] sm:$0xff] %v7905_v60  ;;  %v3190_v20 = vmul.f32 %v7753_v25, %v9322_v46 }
 0x23e   : > { %v3315_v46 = vrot.slane %v3191_v14, %v7733_v47  ;;  %v3343_v32 = vrot.slane %v3191_v14, %v7748_v41 }
 0x23f   : > { %v3252_v7 = vrot.slane %v3190_v20, %v7735_v52  ;;  %v3273_v6 = vrot.slane %v3190_v20, %v7743_v29  ;;  %v3266_v38 = vrot.slane %v3190_v20, %v7745_v61  ;;  %v3280_v53 = vrot.slane %v3190_v20, %v7751_v0 }
 0x240   : > { %3219 = vbcast.lane.b32.xlu1 %v3217_v24, 256  ;;  %3212 = vbcast.lane.b32.xlu0 %v3210_v1, 256  ;;  %v3259_v24 = vrot.slane %v3190_v20, %v7733_v47  ;;  %v3287_v1 = vrot.slane %v3190_v20, %v7748_v41 }
 0x244   : > { %3233 = vbcast.lane.b32.xlu1 %v3231_v63, 256  ;;  %3226 = vbcast.lane.b32.xlu0 %v3224_v22, 256  ;;  %v3301_v63 = vrot.slane %v3190_v20, %v7756_v34  ;;  %v3294_v22 = vrot.slane %v3190_v20, %v7759_v8  ;;  %v7934_v20 = vmul.f32 %v7737_v36, %v7576_v43 }
 0x248   : > { %3247 = vbcast.lane.b32.xlu1 %v3245_v17, 256  ;;  %3240 = vbcast.lane.b32.xlu0 %v3238_v27, 256  ;;  %v3308_v17 = vrot.slane %v3191_v14, %v7735_v52  ;;  %v3329_v27 = vrot.slane %v3191_v14, %v7743_v29 }
 0x24c   : > { %3261 = vbcast.lane.b32.xlu1 %v3259_v24, 256  ;;  %3254 = vbcast.lane.b32.xlu0 %v3252_v7, 256  ;;  %v3322_v24 = vrot.slane %v3191_v14, %v7745_v61  ;;  %v9323_v7 = vld [vmem:[#allocation11_spill] sm:$0xff] }
 0x24d   : > { %v7929_v10 = vmul.f32 %v7797_v9, %v9323_v7 }
 0x24f   : > { %v3371_v9 = vrot.slane %v7929_v10, %v7733_v47  ;;  %v3385_v43 = vrot.slane %v7929_v10, %v7743_v29  ;;  %v3378_v36 = vrot.slane %v7929_v10, %v7745_v61 }
 0x250   : > { %3275 = vbcast.lane.b32.xlu1 %v3273_v6, 256  ;;  %3268 = vbcast.lane.b32.xlu0 %v3266_v38, 256  ;;  %v3336_v6 = vrot.slane %v3191_v14, %v7751_v0  ;;  %v9324_v38 = vld [vmem:[#allocation18_spill] sm:$0xff] }
 0x254   : > { %3289 = vbcast.lane.b32.xlu1 %v3287_v1, 256  ;;  %3282 = vbcast.lane.b32.xlu0 %v3280_v53, 256  ;;  %v7939_v1 = vmul.f32 %v7753_v25, %v9324_v38  ;;  %v3357_v53 = vrot.slane %v3191_v14, %v7756_v34  ;;  %v3399_v25 = vrot.slane %v7929_v10, %v7748_v41 }
 0x258   : > { %3303 = vbcast.lane.b32.xlu1 %v3301_v63, 256  ;;  %3296 = vbcast.lane.b32.xlu0 %v3294_v22, 256  ;;  %v3350_v63 = vrot.slane %v3191_v14, %v7759_v8  ;;  %v3364_v22 = vrot.slane %v7929_v10, %v7735_v52  ;;  %v3392_v14 = vrot.slane %v7929_v10, %v7751_v0 }
 0x25c   : > { %3317 = vbcast.lane.b32.xlu1 %v3315_v46, 256  ;;  %3310 = vbcast.lane.b32.xlu0 %v3308_v17, 256 }
 0x260   : > { %3331 = vbcast.lane.b32.xlu1 %v3329_v27, 256  ;;  %3324 = vbcast.lane.b32.xlu0 %v3322_v24, 256 }
 0x264   : > { %3345 = vbcast.lane.b32.xlu1 %v3343_v32, 256  ;;  %3338 = vbcast.lane.b32.xlu0 %v3336_v6, 256 }
 0x268   : > { %3359 = vbcast.lane.b32.xlu1 %v3357_v53, 256  ;;  %3352 = vbcast.lane.b32.xlu0 %v3350_v63, 256 }
 0x26c   : > { %3373 = vbcast.lane.b32.xlu1 %v3371_v9, 256  ;;  %3366 = vbcast.lane.b32.xlu0 %v3364_v22, 256 }
 0x26e   : > { %v2721_v63 = vpop.permute.xlu1 %2720  ;;  %v2714_v53 = vpop.permute.xlu0 %2713 }
 0x26f   : > { %v2933_v38 = vmul.f32 %v7765_v11, %v2721_v63  ;;  %v2932_v32 = vmul.f32 %v7767_v62, %v2714_v53 }
 0x270   : > { %3387 = vbcast.lane.b32.xlu1 %v3385_v43, 256  ;;  %3380 = vbcast.lane.b32.xlu0 %v3378_v36, 256 }
 0x271   : > { %v2972_v9 = vsel %vm2964_vm0, %v2933_v38, 0.0  ;;  %v2965_v22 = vsel %vm2964_vm0, %v2932_v32, 0.0 }
 0x272   : > { %v2973_v53 = vrot.slane %v2972_v9, 4  ;;  %v2735_v27 = vpop.permute.xlu1 %2734  ;;  %v2966_v36 = vrot.slane %v2965_v22, 4  ;;  %v2728_v17 = vpop.permute.xlu0 %2727 }
 0x273   : > { %v2935_v63 = vmul.f32 %v7769_v35, %v2735_v27  ;;  %v2934_v32 = vmul.f32 %v7771_v48, %v2728_v17 }
 0x274   : > { %v2974_v24 = vadd.f32 %v2973_v53, %v2972_v9  ;;  %3401 = vbcast.lane.b32.xlu1 %v3399_v25, 256  ;;  %v2967_v6 = vadd.f32 %v2966_v36, %v2965_v22  ;;  %3394 = vbcast.lane.b32.xlu0 %v3392_v14, 256  ;;  %v9326_v14 = vrot.slane %v7929_v10, %v7759_v8 }
 0x275   : > { %v2986_v7 = vsel %vm2964_vm0, %v2935_v63, 0.0  ;;  %v2979_v38 = vsel %vm2964_vm0, %v2934_v32, 0.0  ;;  %v9325_v32 = vrot.slane %v7929_v10, %v7756_v34 }
 0x276   : > { %v2975_v25 = vrot.slane %v2974_v24, 2  ;;  %v2987_v53 = vrot.slane %v2986_v7, 4  ;;  %v2749_v43 = vpop.permute.xlu1 %2748  ;;  %v2968_v36 = vrot.slane %v2967_v6, 2  ;;  %v2980_v63 = vrot.slane %v2979_v38, 4  ;;  %v2742_v46 = vpop.permute.xlu0 %2741 }
 0x277   : > { %v2937_v27 = vmul.f32 %v7774_v3, %v2749_v43  ;;  %v2936_v9 = vmul.f32 %v7776_v57, %v2742_v46 }
 0x278   : > { %v2976_v17 = vadd.f32 %v2975_v25, %v2974_v24  ;;  %v2988_v48 = vadd.f32 %v2987_v53, %v2986_v7  ;;  %3415 = vbcast.lane.b32.xlu1 %v9325_v32, 256  ;;  %v2969_v35 = vadd.f32 %v2968_v36, %v2967_v6  ;;  %v2981_v62 = vadd.f32 %v2980_v63, %v2979_v38 }
 0x279   : > { %v3000_v43 = vsel %vm2964_vm0, %v2937_v27, 0.0  ;;  %3408 = vbcast.lane.b32.xlu0 %v9326_v14, 256  ;;  %v2993_v53 = vsel %vm2964_vm0, %v2936_v9, 0.0  ;;  %v9327_v14 = vrot.slane %v7934_v20, %v7733_v47 }
 0x27a   : > { %v2977_v46 = vrot.slane %v2976_v17, 1  ;;  %v2989_v7 = vrot.slane %v2988_v48, 2  ;;  %v3001_v25 = vrot.slane %v3000_v43, 4  ;;  %v2763_v32 = vpop.permute.xlu1 %2762  ;;  %v2970_v57 = vrot.slane %v2969_v35, 1  ;;  %v2756_v27 = vpop.permute.xlu0 %2755 }
 0x27b   : > { %v2982_v22 = vrot.slane %v2981_v62, 2  ;;  %v2994_v6 = vrot.slane %v2993_v53, 4  ;;  %v2939_v38 = vmul.f32 %v7779_v50, %v2763_v32  ;;  %v2938_v10 = vmul.f32 %v7781_v16, %v2756_v27 }
 0x27c   : > { %v2978_v36 = vadd.f32 %v2977_v46, %v2976_v17  ;;  %v2990_v63 = vadd.f32 %v2989_v7, %v2988_v48  ;;  %v3002_v3 = vadd.f32 %v3001_v25, %v3000_v43  ;;  %3690 = vbcast.lane.b32.xlu1 %v9327_v14, 256  ;;  %v2971_v24 = vadd.f32 %v2970_v57, %v2969_v35 }
 0x27d   : > { %v2983_v11 = vadd.f32 %v2982_v22, %v2981_v62  ;;  %v2995_v9 = vadd.f32 %v2994_v6, %v2993_v53  ;;  %v3014_v60 = vsel %vm2964_vm0, %v2939_v38, 0.0  ;;  %v9328_v32 = vrot.slane %v7934_v20, %v7735_v52 }
 0x27e   : > { %v2991_v17 = vrot.slane %v2990_v63, 1  ;;  %v3003_v48 = vrot.slane %v3002_v3, 2  ;;  %v3015_v43 = vrot.slane %v3014_v60, 4  ;;  %v3007_v46 = vsel %vm2964_vm0, %v2938_v10, 0.0  ;;  %v2777_v7 = vpop.permute.xlu1 %2776  ;;  %v2770_v62 = vpop.permute.xlu0 %2769 }
 0x27f   : > { %3683 = vbcast.lane.b32.xlu0 %v9328_v32, 256  ;;  %v4677_v25 = vsel %vm4676_vm1, %v2978_v36, %v2971_v24  ;;  %v2984_v27 = vrot.slane %v2983_v11, 1  ;;  %v2996_v14 = vrot.slane %v2995_v9, 2  ;;  %v3008_v35 = vrot.slane %v3007_v46, 4 }
 0x280   : > { %v2992_v57 = vadd.f32 %v2991_v17, %v2990_v63  ;;  %v3004_v22 = vadd.f32 %v3003_v48, %v3002_v3  ;;  %v3016_v53 = vadd.f32 %v3015_v43, %v3014_v60  ;;  %v2941_v6 = vmul.f32 %v7783_v21, %v2777_v7 }
 0x281   : > { %v9329_v38 = vrot.slane %v7934_v20, %v7743_v29  ;;  %v2985_v32 = vadd.f32 %v2984_v27, %v2983_v11  ;;  %v2997_v16 = vadd.f32 %v2996_v14, %v2995_v9  ;;  %v3009_v10 = vadd.f32 %v3008_v35, %v3007_v46 }
 0x282   : > { %v2940_v24 = vmul.f32 %v7786_v58, %v2770_v62  ;;  %v9330_v36 = vrot.slane %v7934_v20, %v7745_v61  ;;  %v3005_v63 = vrot.slane %v3004_v22, 1  ;;  %v3017_v3 = vrot.slane %v3016_v53, 2  ;;  %v2791_v17 = vpop.permute.xlu1 %2790  ;;  %v2784_v46 = vpop.permute.xlu0 %2783 }
 0x283   : > { %3704 = vbcast.lane.b32.xlu1 %v9329_v38, 256  ;;  %v3028_v60 = vsel %vm2964_vm0, %v2941_v6, 0.0  ;;  %v4679_v43 = vsel %vm4678_vm2, %v2985_v32, %v4677_v25  ;;  %v2998_v11 = vrot.slane %v2997_v16, 1  ;;  %v3010_v9 = vrot.slane %v3009_v10, 2 }
 0x284   : > { %3697 = vbcast.lane.b32.xlu0 %v9330_v36, 256  ;;  %v3029_v7 = vrot.slane %v3028_v60, 4  ;;  %v3006_v27 = vadd.f32 %v3005_v63, %v3004_v22  ;;  %v4681_v14 = vsel %vm4680_vm3, %v2992_v57, %v4679_v43  ;;  %v3018_v35 = vadd.f32 %v3017_v3, %v3016_v53 }
 0x285   : > { %v3021_v62 = vsel %vm2964_vm0, %v2940_v24, 0.0  ;;  %v9331_v38 = vrot.slane %v7934_v20, %v7748_v41  ;;  %v2999_v6 = vadd.f32 %v2998_v11, %v2997_v16  ;;  %v3011_v36 = vadd.f32 %v3010_v9, %v3009_v10 }
 0x286   : > { %v3030_v58 = vadd.f32 %v3029_v7, %v3028_v60  ;;  %v3022_v48 = vrot.slane %v3021_v62, 4  ;;  %v9332_v25 = vrot.slane %v7934_v20, %v7751_v0  ;;  %v3019_v32 = vrot.slane %v3018_v35, 1  ;;  %v2805_v53 = vpop.permute.xlu1 %2804  ;;  %v2798_v60 = vpop.permute.xlu0 %2797 }
 0x287   : > { %3718 = vbcast.lane.b32.xlu1 %v9331_v38, 256  ;;  %v2943_v22 = vmul.f32 %v7790_v59, %v2791_v17  ;;  %v2942_v57 = vmul.f32 %v7795_v55, %v2784_v46  ;;  %v4683_v63 = vsel %vm4682_vm4, %v2999_v6, %v4681_v14  ;;  %v3012_v3 = vrot.slane %v3011_v36, 1 }
 0x288   : > { %3711 = vbcast.lane.b32.xlu0 %v9332_v25, 256  ;;  %v3031_v16 = vrot.slane %v3030_v58, 2  ;;  %v3023_v10 = vadd.f32 %v3022_v48, %v3021_v62  ;;  %v3020_v43 = vadd.f32 %v3019_v32, %v3018_v35  ;;  %v4685_v11 = vsel %vm4684_vm5, %v3006_v27, %v4683_v63 }
 0x289   : > { %v3042_v9 = vsel %vm2964_vm0, %v2943_v22, 0.0  ;;  %v3035_v7 = vsel %vm2964_vm0, %v2942_v57, 0.0  ;;  %v9333_v17 = vrot.slane %v7934_v20, %v7756_v34  ;;  %v3013_v46 = vadd.f32 %v3012_v3, %v3011_v36 }
 0x28a   : > { %v3032_v38 = vadd.f32 %v3031_v16, %v3030_v58  ;;  %v3024_v25 = vrot.slane %v3023_v10, 2  ;;  %v3043_v24 = vrot.slane %v3042_v9, 4  ;;  %v9334_v14 = vrot.slane %v7934_v20, %v7759_v8  ;;  %v2819_v62 = vpop.permute.xlu1 %2818  ;;  %v2812_v57 = vpop.permute.xlu0 %2811 }
 0x28b   : > { %3732 = vbcast.lane.b32.xlu1 %v9333_v17, 256  ;;  %v3036_v48 = vrot.slane %v3035_v7, 4  ;;  %v2945_v35 = vmul.f32 %v7807_v31, %v2805_v53  ;;  %v2944_v27 = vmul.f32 %v7809_v26, %v2798_v60  ;;  %v4687_v32 = vsel %vm4686_vm6, %v3013_v46, %v4685_v11 }
 0x28c   : > { %3725 = vbcast.lane.b32.xlu0 %v9334_v14, 256  ;;  %v3033_v22 = vrot.slane %v3032_v38, 1  ;;  %v3025_v36 = vadd.f32 %v3024_v25, %v3023_v10  ;;  %v3044_v58 = vadd.f32 %v3043_v24, %v3042_v9  ;;  %v8140_v63 = vsel %vm4688_vm7, %v3020_v43, %v4687_v32 }
 0x28d   : > { %9335 = vst [vmem:[#allocation52_spill] sm:$0xff] %v8140_v63  ;;  %v3037_v20 = vadd.f32 %v3036_v48, %v3035_v7  ;;  %v3056_v3 = vsel %vm2964_vm0, %v2945_v35, 0.0  ;;  %v3049_v53 = vsel %vm2964_vm0, %v2944_v27, 0.0  ;;  %v9336_v16 = vrot.slane %v7939_v1, %v7733_v47 }
 0x28e   : > { %v3034_v60 = vadd.f32 %v3033_v22, %v3032_v38  ;;  %v3026_v17 = vrot.slane %v3025_v36, 1  ;;  %v3045_v14 = vrot.slane %v3044_v58, 2  ;;  %v3057_v11 = vrot.slane %v3056_v3, 4  ;;  %v2833_v46 = vpop.permute.xlu1 %2832  ;;  %v2826_v38 = vpop.permute.xlu0 %2825 }
 0x28f   : > { %3746 = vbcast.lane.b32.xlu1 %v9336_v16, 256  ;;  %v9337_v24 = vrot.slane %v7939_v1, %v7735_v52  ;;  %v3038_v10 = vrot.slane %v3037_v20, 2  ;;  %v3050_v43 = vrot.slane %v3049_v53, 4  ;;  %v2947_v9 = vmul.f32 %v7833_v23, %v2819_v62 }
 0x290   : > { %v2946_v7 = vmul.f32 %v7837_v44, %v2812_v57  ;;  %v3027_v25 = vadd.f32 %v3026_v17, %v3025_v36  ;;  %v3046_v48 = vadd.f32 %v3045_v14, %v3044_v58  ;;  %v3058_v35 = vadd.f32 %v3057_v11, %v3056_v3 }
 0x291   : > { %3739 = vbcast.lane.b32.xlu0 %v9337_v24, 256  ;;  %v2949_v27 = vmul.f32 %v7855_v4, %v2833_v46  ;;  %v3039_v32 = vadd.f32 %v3038_v10, %v3037_v20  ;;  %v3051_v22 = vadd.f32 %v3050_v43, %v3049_v53  ;;  %v3070_v16 = vsel %vm2964_vm0, %v2947_v9, 0.0 }
 0x292   : > { %v3063_v6 = vsel %vm2964_vm0, %v2946_v7, 0.0  ;;  %v9338_v24 = vrot.slane %v7939_v1, %v7743_v29  ;;  %v4690_v62 = vsel %vm4676_vm1, %v3034_v60, %v3027_v25  ;;  %v3047_v57 = vrot.slane %v3046_v48, 1  ;;  %v2847_v14 = vpop.permute.xlu1 %2846  ;;  %v2840_v7 = vpop.permute.xlu0 %2839 }
 0x293   : > { %v3059_v44 = vrot.slane %v3058_v35, 2  ;;  %v3071_v36 = vrot.slane %v3070_v16, 4  ;;  %v9339_v58 = vrot.slane %v7939_v1, %v7745_v61  ;;  %v3040_v3 = vrot.slane %v3039_v32, 1 }
 0x294   : > { %3760 = vbcast.lane.b32.xlu1 %v9338_v24, 256  ;;  %v3052_v20 = vrot.slane %v3051_v22, 2  ;;  %v3064_v53 = vrot.slane %v3063_v6, 4  ;;  %v3084_v17 = vsel %vm2964_vm0, %v2949_v27, 0.0  ;;  %v3048_v11 = vadd.f32 %v3047_v57, %v3046_v48 }
 0x295   : > { %3753 = vbcast.lane.b32.xlu0 %v9339_v58, 256  ;;  %v3060_v10 = vadd.f32 %v3059_v44, %v3058_v35  ;;  %v3072_v43 = vadd.f32 %v3071_v36, %v3070_v16  ;;  %v3085_v9 = vrot.slane %v3084_v17, 4  ;;  %v3041_v46 = vadd.f32 %v3040_v3, %v3039_v32 }
 0x296   : > { %v3053_v60 = vadd.f32 %v3052_v20, %v3051_v22  ;;  %v3065_v25 = vadd.f32 %v3064_v53, %v3063_v6  ;;  %v2948_v24 = vmul.f32 %v7857_v45, %v2826_v38  ;;  %v9340_v4 = vrot.slane %v7939_v1, %v7748_v41  ;;  %v2861_v38 = vpop.permute.xlu1 %2860  ;;  %v2854_v36 = vpop.permute.xlu0 %2853 }
 0x297   : > { %v3061_v58 = vrot.slane %v3060_v10, 1  ;;  %v3073_v63 = vrot.slane %v3072_v43, 2  ;;  %v3086_v23 = vadd.f32 %v3085_v9, %v3084_v17  ;;  %v2951_v27 = vmul.f32 %v7861_v30, %v2847_v14 }
 0x298   : > { %3774 = vbcast.lane.b32.xlu1 %v9340_v4, 256  ;;  %v9341_v44 = vrot.slane %v7939_v1, %v7751_v0  ;;  %v4691_v48 = vsel %vm4678_vm2, %v3041_v46, %v4690_v62  ;;  %v3054_v35 = vrot.slane %v3053_v60, 1  ;;  %v3066_v32 = vrot.slane %v3065_v25, 2 }
 0x299   : > { %v3077_v6 = vsel %vm2964_vm0, %v2948_v24, 0.0  ;;  %v3062_v22 = vadd.f32 %v3061_v58, %v3060_v10  ;;  %v4692_v16 = vsel %vm4680_vm3, %v3048_v11, %v4691_v48  ;;  %v3074_v4 = vadd.f32 %v3073_v63, %v3072_v43 }
 0x29a   : > { %3767 = vbcast.lane.b32.xlu0 %v9341_v44, 256  ;;  %v3087_v57 = vrot.slane %v3086_v23, 2  ;;  %v3055_v3 = vadd.f32 %v3054_v35, %v3053_v60  ;;  %v3067_v20 = vadd.f32 %v3066_v32, %v3065_v25  ;;  %v3078_v53 = vrot.slane %v3077_v6, 4  ;;  %v2875_v25 = vpop.permute.xlu1 %2874 }
 0x29b   : > { %v3098_v17 = vsel %vm2964_vm0, %v2951_v27, 0.0  ;;  %v9342_v14 = vrot.slane %v7939_v1, %v7756_v34  ;;  %v3075_v62 = vrot.slane %v3074_v4, 1  ;;  %v2950_v24 = vmul.f32 %v7866_v2, %v2840_v7 }
 0x29c   : > { %v3088_v9 = vadd.f32 %v3087_v57, %v3086_v23  ;;  %v3099_v46 = vrot.slane %v3098_v17, 4  ;;  %v9343_v11 = vrot.slane %v7939_v1, %v7759_v8  ;;  %v4693_v63 = vsel %vm4682_vm4, %v3055_v3, %v4692_v16  ;;  %v2868_v23 = vpop.permute.xlu0 %2867 }
 0x29d   : > { %3788 = vbcast.lane.b32.xlu1 %v9342_v14, 256  ;;  %v3068_v10 = vrot.slane %v3067_v20, 1  ;;  %v3079_v43 = vadd.f32 %v3078_v53, %v3077_v6  ;;  %v2953_v60 = vmul.f32 %v7870_v5, %v2861_v38  ;;  %v3076_v58 = vadd.f32 %v3075_v62, %v3074_v4 }
 0x29e   : > { %3781 = vbcast.lane.b32.xlu0 %v9343_v11, 256  ;;  %v4694_v27 = vsel %vm4684_vm5, %v3062_v22, %v4693_v63  ;;  %v3089_v44 = vrot.slane %v3088_v9, 1  ;;  %v3100_v48 = vadd.f32 %v3099_v46, %v3098_v17  ;;  %v3091_v7 = vsel %vm2964_vm0, %v2950_v24, 0.0  ;;  %v2889_v14 = vpop.permute.xlu1 %2888 }
 0x29f   : > { %v3069_v35 = vadd.f32 %v3068_v10, %v3067_v20  ;;  %v3080_v32 = vrot.slane %v3079_v43, 2  ;;  %v3112_v1 = vsel %vm2964_vm0, %v2953_v60, 0.0  ;;  %v9344_v16 = vrot.slane %v7804_v33, %v7733_v47 }
 0x2a0   : > { %v3090_v6 = vadd.f32 %v3089_v44, %v3088_v9  ;;  %v3101_v57 = vrot.slane %v3100_v48, 2  ;;  %v3092_v38 = vrot.slane %v3091_v7, 4  ;;  %v3113_v3 = vrot.slane %v3112_v1, 4  ;;  %v2882_v11 = vpop.permute.xlu0 %2881 }
 0x2a1   : > { %3802 = vbcast.lane.b32.xlu1 %v9344_v16, 256  ;;  %v9345_v22 = vrot.slane %v7804_v33, %v7735_v52  ;;  %v4695_v4 = vsel %vm4686_vm6, %v3069_v35, %v4694_v27  ;;  %v3081_v20 = vadd.f32 %v3080_v32, %v3079_v43  ;;  %v2952_v53 = vmul.f32 %v7873_v37, %v2854_v36 }
 0x2a2   : > { %v2955_v17 = vmul.f32 %v7876_v40, %v2875_v25  ;;  %v8197_v62 = vsel %vm4688_vm7, %v3076_v58, %v4695_v4  ;;  %v3102_v46 = vadd.f32 %v3101_v57, %v3100_v48  ;;  %v3093_v9 = vadd.f32 %v3092_v38, %v3091_v7  ;;  %v2903_v16 = vpop.permute.xlu1 %2902 }
 0x2a3   : > { %3795 = vbcast.lane.b32.xlu0 %v9345_v22, 256  ;;  %v3114_v24 = vadd.f32 %v3113_v3, %v3112_v1  ;;  %v3082_v63 = vrot.slane %v3081_v20, 1  ;;  %v3105_v10 = vsel %vm2964_vm0, %v2952_v53, 0.0  ;;  %v2954_v27 = vmul.f32 %v7879_v28, %v2868_v23 }
 0x2a4   : > { %v3126_v60 = vsel %vm2964_vm0, %v2955_v17, 0.0  ;;  %v9346_v36 = vrot.slane %v7804_v33, %v7743_v29  ;;  %v3103_v43 = vrot.slane %v3102_v46, 1  ;;  %v3094_v25 = vrot.slane %v3093_v9, 2  ;;  %v2896_v22 = vpop.permute.xlu0 %2895 }
 0x2a5   : > { %v3115_v44 = vrot.slane %v3114_v24, 2  ;;  %v3106_v58 = vrot.slane %v3105_v10, 4  ;;  %v9347_v48 = vrot.slane %v7804_v33, %v7745_v61  ;;  %v3083_v35 = vadd.f32 %v3082_v63, %v3081_v20 }
 0x2a6   : > { %3816 = vbcast.lane.b32.xlu1 %v9346_v36, 256  ;;  %v3127_v32 = vrot.slane %v3126_v60, 4  ;;  %v3119_v7 = vsel %vm2964_vm0, %v2954_v27, 0.0  ;;  %v2957_v1 = vmul.f32 %v7882_v15, %v2889_v14  ;;  %v3104_v23 = vadd.f32 %v3103_v43, %v3102_v46 }
 0x2a7   : > { %3809 = vbcast.lane.b32.xlu0 %v9347_v48, 256  ;;  %v3095_v57 = vadd.f32 %v3094_v25, %v3093_v9  ;;  %v3116_v38 = vadd.f32 %v3115_v44, %v3114_v24  ;;  %v3107_v3 = vadd.f32 %v3106_v58, %v3105_v10  ;;  %v4697_v4 = vsel %vm4676_vm1, %v3090_v6, %v3083_v35 }
 0x2a8   : > { %v3128_v53 = vadd.f32 %v3127_v32, %v3126_v60  ;;  %v3120_v17 = vrot.slane %v3119_v7, 4  ;;  %v3140_v36 = vsel %vm2964_vm0, %v2957_v1, 0.0  ;;  %v9348_v20 = vrot.slane %v7804_v33, %v7748_v41  ;;  %v2917_v60 = vpop.permute.xlu1 %2916  ;;  %v2910_v35 = vpop.permute.xlu0 %2909 }
 0x2a9   : > { %v3096_v63 = vrot.slane %v3095_v57, 1  ;;  %v3117_v27 = vrot.slane %v3116_v38, 1  ;;  %v3108_v48 = vrot.slane %v3107_v3, 2  ;;  %v3141_v14 = vrot.slane %v3140_v36, 4 }
 0x2aa   : > { %3830 = vbcast.lane.b32.xlu1 %v9348_v20, 256  ;;  %v9349_v46 = vrot.slane %v7804_v33, %v7751_v0  ;;  %v3129_v9 = vrot.slane %v3128_v53, 2  ;;  %v3121_v24 = vadd.f32 %v3120_v17, %v3119_v7  ;;  %v2956_v6 = vmul.f32 %v7885_v18, %v2882_v11 }
 0x2ab   : > { %v2959_v10 = vmul.f32 %v7890_v42, %v2903_v16  ;;  %v3097_v43 = vadd.f32 %v3096_v63, %v3095_v57  ;;  %v3118_v25 = vadd.f32 %v3117_v27, %v3116_v38  ;;  %v3109_v44 = vadd.f32 %v3108_v48, %v3107_v3 }
 0x2ac   : > { %3823 = vbcast.lane.b32.xlu0 %v9349_v46, 256  ;;  %v3142_v58 = vadd.f32 %v3141_v14, %v3140_v36  ;;  %v3130_v32 = vadd.f32 %v3129_v9, %v3128_v53  ;;  %v3122_v1 = vrot.slane %v3121_v24, 2  ;;  %v3133_v20 = vsel %vm2964_vm0, %v2956_v6, 0.0  ;;  %v2931_v63 = vpop.permute.xlu1 %2930  ;;  %v9352_v9 = vld [vmem:[#allocation28_spill] sm:$0xff] }
 0x2ad   : > { %v3154_v15 = vsel %vm2964_vm0, %v2959_v10, 0.0  ;;  %v9350_v46 = vrot.slane %v7813_v13, %v7733_v47  ;;  %v4698_v11 = vsel %vm4678_vm2, %v3097_v43, %v4697_v4  ;;  %v3110_v7 = vrot.slane %v3109_v44, 1  ;;  %v2924_v4 = vpop.permute.xlu0 %2923 }
 0x2ae   : > { %v3143_v16 = vrot.slane %v3142_v58, 2  ;;  %v3134_v17 = vrot.slane %v3133_v20, 4  ;;  %v9351_v57 = vrot.slane %v7813_v13, %v7735_v52  ;;  %v4699_v38 = vsel %vm4680_vm3, %v3104_v23, %v4698_v11 }
 0x2af   : > { %3858 = vbcast.lane.b32.xlu1 %v9350_v46, 256  ;;  %v3131_v3 = vrot.slane %v3130_v32, 1  ;;  %v3123_v53 = vadd.f32 %v3122_v1, %v3121_v24  ;;  %v3155_v36 = vrot.slane %v3154_v15, 4  ;;  %v3111_v27 = vadd.f32 %v3110_v7, %v3109_v44 }
 0x2b0   : > { %3851 = vbcast.lane.b32.xlu0 %v9351_v57, 256  ;;  %v3144_v48 = vadd.f32 %v3143_v16, %v3142_v58  ;;  %v3135_v14 = vadd.f32 %v3134_v17, %v3133_v20  ;;  %v2958_v6 = vmul.f32 %v9352_v9, %v2896_v22  ;;  %v2961_v42 = vmul.f32 %v7897_v19, %v2917_v60  ;;  %v3206_v60 = vpop.permute.xlu1 %3205 }
 0x2b1   : > { %v3132_v10 = vadd.f32 %v3131_v3, %v3130_v32  ;;  %v3124_v43 = vrot.slane %v3123_v53, 1  ;;  %v3156_v46 = vadd.f32 %v3155_v36, %v3154_v15  ;;  %v9353_v57 = vrot.slane %v7821_v39, %v7735_v52 }
 0x2b2   : > { %v4700_v23 = vsel %vm4682_vm4, %v3111_v27, %v4699_v38  ;;  %v3145_v24 = vrot.slane %v3144_v48, 1  ;;  %v3136_v1 = vrot.slane %v3135_v14, 2  ;;  %v3147_v44 = vsel %vm2964_vm0, %v2958_v6, 0.0  ;;  %v3199_v38 = vpop.permute.xlu0 %3198 }
 0x2b3   : > { %4168 = vbcast.lane.b32.xlu1 %v9353_v57, 256  ;;  %v9354_v58 = vrot.slane %v7813_v13, %v7745_v61  ;;  %v4701_v22 = vsel %vm4684_vm5, %v3118_v25, %v4700_v23  ;;  %v3125_v32 = vadd.f32 %v3124_v43, %v3123_v53  ;;  %v3157_v15 = vrot.slane %v3156_v46, 2 }
 0x2b4   : > { %v3148_v20 = vrot.slane %v3147_v44, 4  ;;  %v3146_v11 = vadd.f32 %v3145_v24, %v3144_v48  ;;  %v3137_v7 = vadd.f32 %v3136_v1, %v3135_v14  ;;  %v3168_v16 = vsel %vm2964_vm0, %v2961_v42, 0.0  ;;  %v3220_v24 = vpop.permute.xlu1 %3219 }
 0x2b5   : > { %3865 = vbcast.lane.b32.xlu0 %v9354_v58, 256  ;;  %v2960_v17 = vmul.f32 %v7899_v49, %v2910_v35  ;;  %v4702_v3 = vsel %vm4686_vm6, %v3125_v32, %v4701_v22  ;;  %v3158_v36 = vadd.f32 %v3157_v15, %v3156_v46  ;;  %v3169_v6 = vrot.slane %v3168_v16, 4  ;;  %v9358_v58 = vld [vmem:[#allocation51_spill] sm:$0xff] }
 0x2b6   : > { %v3149_v27 = vadd.f32 %v3148_v20, %v3147_v44  ;;  %v9355_v57 = vrot.slane %v7817_v54, %v7735_v52  ;;  %v8248_v25 = vsel %vm4688_vm7, %v3132_v10, %v4702_v3  ;;  %v3138_v53 = vrot.slane %v3137_v7, 1  ;;  %v9359_v22 = vld [vmem:[#allocation19_spill] sm:$0xff]  ;;  %v3213_v15 = vpop.permute.xlu0 %3212 }
 0x2b7   : > { %9356 = vst [vmem:[#allocation56_spill] sm:$0xff] %v8248_v25  ;;  %v3161_v48 = vsel %vm2964_vm0, %v2960_v17, 0.0  ;;  %v2963_v42 = vmul.f32 %v7903_v51, %v2931_v63  ;;  %v9357_v35 = vrot.slane %v7821_v39, %v7733_v47  ;;  %v3159_v14 = vrot.slane %v3158_v36, 1 }
 0x2b8   : > { %4224 = vbcast.lane.b32.xlu1 %v9355_v57, 256  ;;  %v3150_v43 = vrot.slane %v3149_v27, 2  ;;  %v3170_v46 = vadd.f32 %v3169_v6, %v3168_v16  ;;  %v3162_v23 = vrot.slane %v3161_v48, 4  ;;  %v3139_v1 = vadd.f32 %v3138_v53, %v3137_v7 }
 0x2b9   : > { %4175 = vbcast.lane.b32.xlu0 %v9357_v35, 256  ;;  %v3182_v44 = vsel %vm2964_vm0, %v2963_v42, 0.0  ;;  %v2962_v10 = vmul.f32 %v9358_v58, %v2924_v4  ;;  %v3418_v32 = vmul.f32 %v9359_v22, %v3206_v60  ;;  %v3160_v20 = vadd.f32 %v3159_v14, %v3158_v36 }
 0x2ba   : > { %v3151_v17 = vadd.f32 %v3150_v43, %v3149_v27  ;;  %v3171_v63 = vrot.slane %v3170_v46, 2  ;;  %v3163_v3 = vadd.f32 %v3162_v23, %v3161_v48  ;;  %v9360_v57 = vrot.slane %v7830_v12, %v7735_v52  ;;  %v3234_v48 = vpop.permute.xlu1 %3233  ;;  %v9362_v43 = vld [vmem:[#allocation12_spill] sm:$0xff] }
 0x2bb   : > { %v4704_v16 = vsel %vm4676_vm1, %v3146_v11, %v3139_v1  ;;  %v3183_v6 = vrot.slane %v3182_v44, 4  ;;  %v3175_v7 = vsel %vm2964_vm0, %v2962_v10, 0.0  ;;  %v3457_v53 = vsel %vm3449_vm8, %v3418_v32, 0.0  ;;  %v3227_v1 = vpop.permute.xlu0 %3226 }
 0x2bc   : > { %4280 = vbcast.lane.b32.xlu1 %v9360_v57, 256  ;;  %v9361_v4 = vrot.slane %v7817_v54, %v7733_v47  ;;  %v3152_v60 = vrot.slane %v3151_v17, 1  ;;  %v3172_v36 = vadd.f32 %v3171_v63, %v3170_v46  ;;  %v3164_v27 = vrot.slane %v3163_v3, 2  ;;  %v9363_v57 = vld [vmem:[#allocation20_spill] sm:$0xff] }
 0x2bd   : > { %v3176_v42 = vrot.slane %v3175_v7, 4  ;;  %v3184_v35 = vadd.f32 %v3183_v6, %v3182_v44  ;;  %v3458_v14 = vrot.slane %v3457_v53, 4  ;;  %v3417_v23 = vmul.f32 %v9362_v43, %v3199_v38 }
 0x2be   : > { %4231 = vbcast.lane.b32.xlu0 %v9361_v4, 256  ;;  %v3420_v11 = vmul.f32 %v9363_v57, %v3220_v24  ;;  %v3153_v25 = vadd.f32 %v3152_v60, %v3151_v17  ;;  %v3173_v10 = vrot.slane %v3172_v36, 1  ;;  %v3165_v22 = vadd.f32 %v3164_v27, %v3163_v3 }
 0x2bf   : > { %v3177_v32 = vadd.f32 %v3176_v42, %v3175_v7  ;;  %v9364_v58 = vrot.slane %v7825_v56, %v7735_v52  ;;  %v3185_v4 = vrot.slane %v3184_v35, 2  ;;  %v3459_v46 = vadd.f32 %v3458_v14, %v3457_v53  ;;  %v3248_v7 = vpop.permute.xlu1 %3247  ;;  %v3241_v53 = vpop.permute.xlu0 %3240 }
 0x2c0   : > { %v3450_v63 = vsel %vm3449_vm8, %v3417_v23, 0.0  ;;  %v3471_v44 = vsel %vm3449_vm8, %v3420_v11, 0.0  ;;  %v9365_v38 = vrot.slane %v7830_v12, %v7733_v47  ;;  %v4705_v24 = vsel %vm4678_vm2, %v3153_v25, %v4704_v16  ;;  %v9366_v11 = vld [vmem:[#allocation29_spill] sm:$0xff] }
 0x2c1   : > { %4336 = vbcast.lane.b32.xlu1 %v9364_v58, 256  ;;  %v3174_v17 = vadd.f32 %v3173_v10, %v3172_v36  ;;  %v3166_v6 = vrot.slane %v3165_v22, 1  ;;  %v3178_v3 = vrot.slane %v3177_v32, 2  ;;  %v4706_v60 = vsel %vm4680_vm3, %v3160_v20, %v4705_v24  ;;  %v9368_v10 = vld [vmem:[#allocation44_spill] sm:$0xff] }
 0x2c2   : > { %4287 = vbcast.lane.b32.xlu0 %v9365_v38, 256  ;;  %v3186_v52 = vadd.f32 %v3185_v4, %v3184_v35  ;;  %v3460_v58 = vrot.slane %v3459_v46, 2  ;;  %v3451_v27 = vrot.slane %v3450_v63, 4  ;;  %v3472_v23 = vrot.slane %v3471_v44, 4 }
 0x2c3   : > { %v3167_v42 = vadd.f32 %v3166_v6, %v3165_v22  ;;  %v3179_v14 = vadd.f32 %v3178_v3, %v3177_v32  ;;  %v3419_v57 = vmul.f32 %v9366_v11, %v3213_v15  ;;  %v9367_v38 = vrot.slane %v7813_v13, %v7743_v29  ;;  %v3262_v15 = vpop.permute.xlu1 %3261 }
 0x2c4   : > { %v3187_v25 = vrot.slane %v3186_v52, 1  ;;  %v3461_v16 = vadd.f32 %v3460_v58, %v3459_v46  ;;  %v3452_v36 = vadd.f32 %v3451_v27, %v3450_v63  ;;  %v3422_v43 = vmul.f32 %v9368_v10, %v3234_v48  ;;  %v3255_v46 = vpop.permute.xlu0 %3254 }
 0x2c5   : > { %3872 = vbcast.lane.b32.xlu1 %v9367_v38, 256  ;;  %v9369_v20 = vrot.slane %v7825_v56, %v7733_v47  ;;  %v4707_v35 = vsel %vm4682_vm4, %v3167_v42, %v4706_v60  ;;  %v3180_v22 = vrot.slane %v3179_v14, 1  ;;  %v3473_v32 = vadd.f32 %v3472_v23, %v3471_v44 }
 0x2c6   : > { %v3464_v4 = vsel %vm3449_vm8, %v3419_v57, 0.0  ;;  %v3188_v24 = vadd.f32 %v3187_v25, %v3186_v52  ;;  %v4708_v6 = vsel %vm4684_vm5, %v3174_v17, %v4707_v35  ;;  %v3462_v3 = vrot.slane %v3461_v16, 1  ;;  %v9371_v57 = vld [vmem:[#allocation46_spill] sm:$0xff] }
 0x2c7   : > { %4343 = vbcast.lane.b32.xlu0 %v9369_v20, 256  ;;  %v3453_v38 = vrot.slane %v3452_v36, 2  ;;  %v3181_v63 = vadd.f32 %v3180_v22, %v3179_v14  ;;  %v3474_v58 = vrot.slane %v3473_v32, 2  ;;  %v3465_v48 = vrot.slane %v3464_v4, 4 }
 0x2c8   : > { %v3485_v27 = vsel %vm3449_vm8, %v3422_v43, 0.0  ;;  %v9370_v47 = vrot.slane %v7817_v54, %v7745_v61  ;;  %v3463_v60 = vadd.f32 %v3462_v3, %v3461_v16  ;;  %v3421_v23 = vmul.f32 %v9371_v57, %v3227_v1  ;;  %v3276_v43 = vpop.permute.xlu1 %3275  ;;  %v3269_v3 = vpop.permute.xlu0 %3268 }
 0x2c9   : > { %v3454_v44 = vadd.f32 %v3453_v38, %v3452_v36  ;;  %v3486_v42 = vrot.slane %v3485_v27, 4  ;;  %v9372_v17 = vrot.slane %v7821_v39, %v7745_v61  ;;  %v4709_v52 = vsel %vm4686_vm6, %v3181_v63, %v4708_v6  ;;  %v9375_v63 = vld [vmem:[#allocation30_spill] sm:$0xff] }
 0x2ca   : > { %4238 = vbcast.lane.b32.xlu1 %v9370_v47, 256  ;;  %v3475_v14 = vadd.f32 %v3474_v58, %v3473_v32  ;;  %v3466_v25 = vadd.f32 %v3465_v48, %v3464_v4  ;;  %v3424_v20 = vmul.f32 %v7779_v50, %v3248_v7  ;;  %v8301_v35 = vsel %vm4688_vm7, %v3188_v24, %v4709_v52 }
 0x2cb   : > { %4182 = vbcast.lane.b32.xlu0 %v9372_v17, 256  ;;  %9373 = vst [vmem:[#allocation60_spill] sm:$0xff] %v8301_v35  ;;  %v3455_v22 = vrot.slane %v3454_v44, 1  ;;  %v3487_v16 = vadd.f32 %v3486_v42, %v3485_v27  ;;  %v3478_v36 = vsel %vm3449_vm8, %v3421_v23, 0.0  ;;  %v9374_v32 = vrot.slane %v7825_v56, %v7745_v61 }
 0x2cc   : > { %v3476_v1 = vrot.slane %v3475_v14, 1  ;;  %v3467_v38 = vrot.slane %v3466_v25, 2  ;;  %v3479_v47 = vrot.slane %v3478_v36, 4  ;;  %v3499_v17 = vsel %vm3449_vm8, %v3424_v20, 0.0  ;;  %v3290_v52 = vpop.permute.xlu1 %3289 }
 0x2cd   : > { %v3456_v4 = vadd.f32 %v3455_v22, %v3454_v44  ;;  %v3488_v7 = vrot.slane %v3487_v16, 2  ;;  %v3500_v6 = vrot.slane %v3499_v17, 4  ;;  %v3423_v24 = vmul.f32 %v9375_v63, %v3241_v53  ;;  %v3283_v22 = vpop.permute.xlu0 %3282 }
 0x2ce   : > { %4350 = vbcast.lane.b32.xlu1 %v9374_v32, 256  ;;  %v9376_v58 = vrot.slane %v7830_v12, %v7745_v61  ;;  %v3477_v48 = vadd.f32 %v3476_v1, %v3475_v14  ;;  %v3468_v27 = vadd.f32 %v3467_v38, %v3466_v25  ;;  %v3480_v42 = vadd.f32 %v3479_v47, %v3478_v36  ;;  %v9378_v36 = vld [vmem:[#allocation14_spill] sm:$0xff] }
 0x2cf   : > { %v3426_v23 = vmul.f32 %v7783_v21, %v3262_v15  ;;  %v4747_v20 = vsel %vm4676_vm1, %v3463_v60, %v3456_v4  ;;  %v3489_v35 = vadd.f32 %v3488_v7, %v3487_v16  ;;  %v3501_v50 = vadd.f32 %v3500_v6, %v3499_v17 }
 0x2d0   : > { %4294 = vbcast.lane.b32.xlu0 %v9376_v58, 256  ;;  %v3492_v44 = vsel %vm3449_vm8, %v3423_v24, 0.0  ;;  %v3469_v32 = vrot.slane %v3468_v27, 1  ;;  %v3481_v57 = vrot.slane %v3480_v42, 2  ;;  %v9377_v61 = vrot.slane %v7821_v39, %v7743_v29  ;;  %v3304_v4 = vpop.permute.xlu1 %3303 }
 0x2d1   : > { %v3493_v53 = vrot.slane %v3492_v44, 4  ;;  %v3513_v63 = vsel %vm3449_vm8, %v3426_v23, 0.0  ;;  %v3490_v14 = vrot.slane %v3489_v35, 1  ;;  %v3502_v25 = vrot.slane %v3501_v50, 2  ;;  %v3297_v23 = vpop.permute.xlu0 %3296 }
 0x2d2   : > { %4189 = vbcast.lane.b32.xlu1 %v9377_v61, 256  ;;  %v3514_v15 = vrot.slane %v3513_v63, 4  ;;  %v3425_v1 = vmul.f32 %v9378_v36, %v3255_v46  ;;  %v9379_v60 = vrot.slane %v7813_v13, %v7751_v0  ;;  %v3470_v16 = vadd.f32 %v3469_v32, %v3468_v27 }
 0x2d3   : > { %v3482_v38 = vadd.f32 %v3481_v57, %v3480_v42  ;;  %v3494_v47 = vadd.f32 %v3493_v53, %v3492_v44  ;;  %v3428_v17 = vmul.f32 %v7790_v59, %v3276_v43  ;;  %v3491_v7 = vadd.f32 %v3490_v14, %v3489_v35 }
 0x2d4   : > { %3879 = vbcast.lane.b32.xlu0 %v9379_v60, 256  ;;  %v3503_v6 = vadd.f32 %v3502_v25, %v3501_v50  ;;  %v3515_v24 = vadd.f32 %v3514_v15, %v3513_v63  ;;  %v3506_v58 = vsel %vm3449_vm8, %v3425_v1, 0.0  ;;  %v4748_v61 = vsel %vm4678_vm2, %v3470_v16, %v4747_v20  ;;  %v3318_v32 = vpop.permute.xlu1 %3317 }
 0x2d5   : > { %v3483_v21 = vrot.slane %v3482_v38, 1  ;;  %v3495_v46 = vrot.slane %v3494_v47, 2  ;;  %v3507_v36 = vrot.slane %v3506_v58, 4  ;;  %v9380_v60 = vrot.slane %v7830_v12, %v7743_v29 }
 0x2d6   : > { %v4749_v57 = vsel %vm4680_vm3, %v3477_v48, %v4748_v61  ;;  %v3504_v27 = vrot.slane %v3503_v6, 1  ;;  %v3516_v43 = vrot.slane %v3515_v24, 2  ;;  %v3527_v35 = vsel %vm3449_vm8, %v3428_v17, 0.0  ;;  %v3311_v48 = vpop.permute.xlu0 %3310 }
 0x2d7   : > { %4301 = vbcast.lane.b32.xlu1 %v9380_v60, 256  ;;  %v9381_v50 = vrot.slane %v7817_v54, %v7743_v29  ;;  %v3484_v63 = vadd.f32 %v3483_v21, %v3482_v38  ;;  %v3496_v42 = vadd.f32 %v3495_v46, %v3494_v47  ;;  %v3508_v20 = vadd.f32 %v3507_v36, %v3506_v58 }
 0x2d8   : > { %v3528_v44 = vrot.slane %v3527_v35, 4  ;;  %v3505_v53 = vadd.f32 %v3504_v27, %v3503_v6  ;;  %v3517_v14 = vadd.f32 %v3516_v43, %v3515_v24  ;;  %v3427_v25 = vmul.f32 %v7795_v55, %v3269_v3  ;;  %v3332_v46 = vpop.permute.xlu1 %3331 }
 0x2d9   : > { %4245 = vbcast.lane.b32.xlu0 %v9381_v50, 256  ;;  %v3430_v15 = vmul.f32 %v7807_v31, %v3290_v52  ;;  %v4750_v1 = vsel %vm4682_vm4, %v3484_v63, %v4749_v57  ;;  %v3497_v16 = vrot.slane %v3496_v42, 1  ;;  %v3509_v17 = vrot.slane %v3508_v20, 2 }
 0x2da   : > { %v3529_v61 = vadd.f32 %v3528_v44, %v3527_v35  ;;  %v9382_v60 = vrot.slane %v7813_v13, %v7748_v41  ;;  %v4751_v21 = vsel %vm4684_vm5, %v3491_v7, %v4750_v1  ;;  %v3518_v36 = vrot.slane %v3517_v14, 1  ;;  %v9384_v35 = vld [vmem:[#allocation33_spill] sm:$0xff]  ;;  %v8348_v50 = vpop.permute.xlu0 %3324  ;;  %v9387_v1 = vld [vmem:[#allocation52_spill] sm:$0xff] }
 0x2db   : > { %v3520_v38 = vsel %vm3449_vm8, %v3427_v25, 0.0  ;;  %v3541_v47 = vsel %vm3449_vm8, %v3430_v15, 0.0  ;;  %v9383_v3 = vrot.slane %v7825_v56, %v7743_v29  ;;  %v3498_v52 = vadd.f32 %v3497_v16, %v3496_v42 }
 0x2dc   : > { %3886 = vbcast.lane.b32.xlu1 %v9382_v60, 256  ;;  %v3510_v6 = vadd.f32 %v3509_v17, %v3508_v20  ;;  %v3530_v24 = vrot.slane %v3529_v61, 2  ;;  %v3521_v58 = vrot.slane %v3520_v38, 4  ;;  %v3519_v57 = vadd.f32 %v3518_v36, %v3517_v14 }
 0x2dd   : > { %4357 = vbcast.lane.b32.xlu0 %v9383_v3, 256  ;;  %v3542_v27 = vrot.slane %v3541_v47, 4  ;;  %v3429_v43 = vmul.f32 %v7809_v26, %v3283_v22  ;;  %v3432_v7 = vmul.f32 %v9384_v35, %v3304_v4  ;;  %v4752_v63 = vsel %vm4686_vm6, %v3498_v52, %v4751_v21  ;;  %v3346_v21 = vpop.permute.xlu1 %3345 }
 0x2de   : > { %v3511_v44 = vrot.slane %v3510_v6, 1  ;;  %v3531_v25 = vadd.f32 %v3530_v24, %v3529_v61  ;;  %v3522_v15 = vadd.f32 %v3521_v58, %v3520_v38  ;;  %v9385_v29 = vrot.slane %v7817_v54, %v7751_v0  ;;  %v8365_v52 = vpop.permute.xlu0 %3338 }
 0x2df   : > { %v4753_v42 = vsel %vm4688_vm7, %v3505_v53, %v4752_v63  ;;  %v3543_v20 = vadd.f32 %v3542_v27, %v3541_v47  ;;  %v3534_v14 = vsel %vm3449_vm8, %v3429_v43, 0.0  ;;  %v3555_v22 = vsel %vm3449_vm8, %v3432_v7, 0.0  ;;  %v9389_v47 = vld [vmem:[#allocation34_spill] sm:$0xff] }
 0x2e0   : > { %4252 = vbcast.lane.b32.xlu1 %v9385_v29, 256  ;;  %v9386_v4 = vrot.slane %v7821_v39, %v7751_v0  ;;  %v8362_v16 = vsel %vm2964_vm0, %v9387_v1, %v4753_v42  ;;  %v3512_v17 = vadd.f32 %v3511_v44, %v3510_v6  ;;  %v3532_v61 = vrot.slane %v3531_v25, 1  ;;  %v9390_v43 = vld [vmem:[#allocation22_spill] sm:$0xff] }
 0x2e1   : > { %9388 = vst [vmem:[#allocation61_spill] sm:$0xff] %v8362_v16  ;;  %v3523_v60 = vrot.slane %v3522_v15, 2  ;;  %v3544_v36 = vrot.slane %v3543_v20, 2  ;;  %v3535_v38 = vrot.slane %v3534_v14, 4  ;;  %v3556_v53 = vrot.slane %v3555_v22, 4 }
 0x2e2   : > { %4196 = vbcast.lane.b32.xlu0 %v9386_v4, 256  ;;  %v3431_v3 = vmul.f32 %v9389_v47, %v3297_v23  ;;  %v4754_v24 = vsel %vm4676_vm1, %v3519_v57, %v3512_v17  ;;  %v3533_v58 = vadd.f32 %v3532_v61, %v3531_v25  ;;  %v3434_v7 = vmul.f32 %v9390_v43, %v3318_v32  ;;  %v3360_v32 = vpop.permute.xlu1 %3359 }
 0x2e3   : > { %v3524_v27 = vadd.f32 %v3523_v60, %v3522_v15  ;;  %v9391_v63 = vrot.slane %v7825_v56, %v7751_v0  ;;  %v3545_v6 = vadd.f32 %v3544_v36, %v3543_v20  ;;  %v3536_v44 = vadd.f32 %v3535_v38, %v3534_v14  ;;  %v8378_v20 = vpop.permute.xlu0 %3352 }
 0x2e4   : > { %v3557_v29 = vadd.f32 %v3556_v53, %v3555_v22  ;;  %v3548_v42 = vsel %vm3449_vm8, %v3431_v3, 0.0  ;;  %v9392_v23 = vrot.slane %v7830_v12, %v7751_v0  ;;  %v3569_v57 = vsel %vm3449_vm8, %v3434_v7, 0.0 }
 0x2e5   : > { %4364 = vbcast.lane.b32.xlu1 %v9391_v63, 256  ;;  %v3525_v4 = vrot.slane %v3524_v27, 1  ;;  %v3549_v1 = vrot.slane %v3548_v42, 4  ;;  %v3433_v25 = vmul.f32 %v7857_v45, %v3311_v48  ;;  %v3546_v15 = vrot.slane %v3545_v6, 1 }
 0x2e6   : > { %4308 = vbcast.lane.b32.xlu0 %v9392_v23, 256  ;;  %v3537_v17 = vrot.slane %v3536_v44, 2  ;;  %v3558_v61 = vrot.slane %v3557_v29, 2  ;;  %v3570_v60 = vrot.slane %v3569_v57, 4  ;;  %v3436_v0 = vmul.f32 %v7861_v30, %v3332_v46 }
 0x2e7   : > { %v3526_v14 = vadd.f32 %v3525_v4, %v3524_v27  ;;  %v3550_v22 = vadd.f32 %v3549_v1, %v3548_v42  ;;  %v3562_v36 = vsel %vm3449_vm8, %v3433_v25, 0.0  ;;  %v9393_v38 = vrot.slane %v7813_v13, %v7759_v8  ;;  %v8390_v1 = vpop.permute.xlu1 %3373 }
 0x2e8   : > { %v3547_v53 = vadd.f32 %v3546_v15, %v3545_v6  ;;  %v3538_v3 = vadd.f32 %v3537_v17, %v3536_v44  ;;  %v3559_v48 = vadd.f32 %v3558_v61, %v3557_v29  ;;  %v3571_v7 = vadd.f32 %v3570_v60, %v3569_v57  ;;  %v8393_v44 = vpop.permute.xlu0 %3366 }
 0x2e9   : > { %3893 = vbcast.lane.b32.xlu1 %v9393_v38, 256  ;;  %v9394_v63 = vrot.slane %v7804_v33, %v7759_v8  ;;  %v4755_v23 = vsel %vm4678_vm2, %v3526_v14, %v4754_v24  ;;  %v3551_v27 = vrot.slane %v3550_v22, 2  ;;  %v3563_v42 = vrot.slane %v3562_v36, 4 }
 0x2ea   : > { %v3583_v4 = vsel %vm3449_vm8, %v3436_v0, 0.0  ;;  %v4756_v46 = vsel %vm4680_vm3, %v3533_v58, %v4755_v23  ;;  %v3539_v25 = vrot.slane %v3538_v3, 1  ;;  %v3560_v38 = vrot.slane %v3559_v48, 1 }
 0x2eb   : > { %3837 = vbcast.lane.b32.xlu0 %v9394_v63, 256  ;;  %v3572_v6 = vrot.slane %v3571_v7, 2  ;;  %v3552_v29 = vadd.f32 %v3551_v27, %v3550_v22  ;;  %v3564_v57 = vadd.f32 %v3563_v42, %v3562_v36  ;;  %v3584_v15 = vrot.slane %v3583_v4, 4  ;;  %v3388_v27 = vpop.permute.xlu1 %3387 }
 0x2ec   : > { %v3435_v17 = vmul.f32 %v7866_v2, %v8348_v50  ;;  %v9395_v24 = vrot.slane %v7817_v54, %v7748_v41  ;;  %v3540_v61 = vadd.f32 %v3539_v25, %v3538_v3  ;;  %v3561_v60 = vadd.f32 %v3560_v38, %v3559_v48  ;;  %v8407_v48 = vpop.permute.xlu0 %3380 }
 0x2ed   : > { %v3573_v14 = vadd.f32 %v3572_v6, %v3571_v7  ;;  %v3438_v58 = vmul.f32 %v7870_v5, %v3346_v21  ;;  %v9396_v0 = vrot.slane %v7821_v39, %v7748_v41  ;;  %v3553_v63 = vrot.slane %v3552_v29, 1 }
 0x2ee   : > { %4259 = vbcast.lane.b32.xlu1 %v9395_v24, 256  ;;  %v3565_v22 = vrot.slane %v3564_v57, 2  ;;  %v3585_v36 = vadd.f32 %v3584_v15, %v3583_v4  ;;  %v3576_v23 = vsel %vm3449_vm8, %v3435_v17, 0.0  ;;  %v4757_v50 = vsel %vm4682_vm4, %v3540_v61, %v4756_v46 }
 0x2ef   : > { %4203 = vbcast.lane.b32.xlu0 %v9396_v0, 256  ;;  %v3574_v42 = vrot.slane %v3573_v14, 1  ;;  %v3577_v16 = vrot.slane %v3576_v23, 4  ;;  %v3597_v3 = vsel %vm3449_vm8, %v3438_v58, 0.0  ;;  %v4758_v21 = vsel %vm4684_vm5, %v3547_v53, %v4757_v50  ;;  %v3402_v58 = vpop.permute.xlu1 %3401 }
 0x2f0   : > { %v3554_v7 = vadd.f32 %v3553_v63, %v3552_v29  ;;  %v3566_v25 = vadd.f32 %v3565_v22, %v3564_v57  ;;  %v3586_v38 = vrot.slane %v3585_v36, 2  ;;  %v9397_v6 = vrot.slane %v7825_v56, %v7748_v41  ;;  %v8422_v22 = vpop.permute.xlu0 %3394 }
 0x2f1   : > { %v3575_v4 = vadd.f32 %v3574_v42, %v3573_v14  ;;  %v3578_v15 = vadd.f32 %v3577_v16, %v3576_v23  ;;  %v3598_v17 = vrot.slane %v3597_v3, 4  ;;  %v3437_v46 = vmul.f32 %v7873_v37, %v8365_v52 }
 0x2f2   : > { %4371 = vbcast.lane.b32.xlu1 %v9397_v6, 256  ;;  %v9398_v24 = vrot.slane %v7830_v12, %v7748_v41  ;;  %v4759_v61 = vsel %vm4686_vm6, %v3554_v7, %v4758_v21  ;;  %v3567_v53 = vrot.slane %v3566_v25, 1  ;;  %v3587_v29 = vadd.f32 %v3586_v38, %v3585_v36 }
 0x2f3   : > { %v3440_v57 = vmul.f32 %v7876_v40, %v3360_v32  ;;  %v4760_v0 = vsel %vm4688_vm7, %v3561_v60, %v4759_v61  ;;  %v3579_v63 = vrot.slane %v3578_v15, 2  ;;  %v3599_v14 = vadd.f32 %v3598_v17, %v3597_v3  ;;  %v8438_v6 = vpop.permute.xlu1 %3415 }
 0x2f4   : > { %4315 = vbcast.lane.b32.xlu0 %v9398_v24, 256  ;;  %v3590_v16 = vsel %vm3449_vm8, %v3437_v46, 0.0  ;;  %v8426_v52 = vsel %vm2964_vm0, %v8197_v62, %v4760_v0  ;;  %v3568_v41 = vadd.f32 %v3567_v53, %v3566_v25  ;;  %v3588_v23 = vrot.slane %v3587_v29, 1  ;;  %v9402_v46 = vld [vmem:[#allocation41_spill] sm:$0xff]  ;;  %v8443_v61 = vpop.permute.xlu0 %3408 }
 0x2f5   : > { %9399 = vst [vmem:[#allocation63_spill] sm:$0xff] %v8426_v52  ;;  %v3591_v50 = vrot.slane %v3590_v16, 4  ;;  %v9400_v36 = vrot.slane %v7813_v13, %v7756_v34  ;;  %v3580_v32 = vadd.f32 %v3579_v63, %v3578_v15  ;;  %v3600_v42 = vrot.slane %v3599_v14, 2 }
 0x2f6   : > { %v3611_v60 = vsel %vm3449_vm8, %v3440_v57, 0.0  ;;  %v3439_v3 = vmul.f32 %v7879_v28, %v8378_v20  ;;  %v9401_v21 = vrot.slane %v7804_v33, %v7756_v34  ;;  %v4761_v62 = vsel %vm4676_vm1, %v3575_v4, %v3568_v41 }
 0x2f7   : > { %3900 = vbcast.lane.b32.xlu1 %v9400_v36, 256  ;;  %v3589_v7 = vadd.f32 %v3588_v23, %v3587_v29  ;;  %v3592_v25 = vadd.f32 %v3591_v50, %v3590_v16  ;;  %v3612_v38 = vrot.slane %v3611_v60, 4  ;;  %v3581_v13 = vrot.slane %v3580_v32, 1 }
 0x2f8   : > { %3844 = vbcast.lane.b32.xlu0 %v9401_v21, 256  ;;  %v3601_v17 = vadd.f32 %v3600_v42, %v3599_v14  ;;  %v3604_v15 = vsel %vm3449_vm8, %v3439_v3, 0.0  ;;  %v3442_v24 = vmul.f32 %v9402_v46, %v8390_v1  ;;  %v3441_v4 = vmul.f32 %v7885_v18, %v8393_v44  ;;  %v9404_v14 = vld [vmem:[#allocation47_spill] sm:$0xff]  ;;  %v8455_v42 = vpop.permute.xlu1 %3690  ;;  %v8460_v21 = vpop.permute.xlu0 %3683 }
 0x2f9   : > { %v3593_v20 = vrot.slane %v3592_v25, 2  ;;  %v3613_v53 = vadd.f32 %v3612_v38, %v3611_v60  ;;  %v3605_v33 = vrot.slane %v3604_v15, 4  ;;  %v9403_v29 = vrot.slane %v7817_v54, %v7759_v8 }
 0x2fa   : > { %v3582_v57 = vadd.f32 %v3581_v13, %v3580_v32  ;;  %v3602_v0 = vrot.slane %v3601_v17, 1  ;;  %v3625_v63 = vsel %vm3449_vm8, %v3442_v24, 0.0  ;;  %v3444_v16 = vmul.f32 %v9404_v14, %v3388_v27 }
 0x2fb   : > { %4266 = vbcast.lane.b32.xlu1 %v9403_v29, 256  ;;  %v9405_v1 = vrot.slane %v7821_v39, %v7759_v8  ;;  %v3594_v41 = vadd.f32 %v3593_v20, %v3592_v25  ;;  %v3614_v23 = vrot.slane %v3613_v53, 2  ;;  %v3606_v50 = vadd.f32 %v3605_v33, %v3604_v15 }
 0x2fc   : > { %v3626_v36 = vrot.slane %v3625_v63, 4  ;;  %v4762_v44 = vsel %vm4678_vm2, %v3582_v57, %v4761_v62  ;;  %v3603_v60 = vadd.f32 %v3602_v0, %v3601_v17  ;;  %v3618_v32 = vsel %vm3449_vm8, %v3441_v4, 0.0  ;;  %v3705_v57 = vpop.permute.xlu1 %3704 }
 0x2fd   : > { %4210 = vbcast.lane.b32.xlu0 %v9405_v1, 256  ;;  %v3639_v3 = vsel %vm3449_vm8, %v3444_v16, 0.0  ;;  %v4763_v27 = vsel %vm4680_vm3, %v3589_v7, %v4762_v44  ;;  %v3595_v38 = vrot.slane %v3594_v41, 1  ;;  %v3615_v13 = vadd.f32 %v3614_v23, %v3613_v53  ;;  %v8473_v23 = vpop.permute.xlu0 %3697 }
 0x2fe   : > { %v3607_v24 = vrot.slane %v3606_v50, 2  ;;  %v9406_v25 = vrot.slane %v7825_v56, %v7759_v8  ;;  %v3627_v15 = vadd.f32 %v3626_v36, %v3625_v63  ;;  %v3619_v20 = vrot.slane %v3618_v32, 4 }
 0x2ff   : > { %v3640_v33 = vrot.slane %v3639_v3, 4  ;;  %v3443_v62 = vmul.f32 %v9352_v9, %v8407_v48  ;;  %v9407_v17 = vrot.slane %v7830_v12, %v7759_v8  ;;  %v3596_v4 = vadd.f32 %v3595_v38, %v3594_v41 }
 0x300   : > { %4378 = vbcast.lane.b32.xlu1 %v9406_v25, 256  ;;  %v3616_v29 = vrot.slane %v3615_v13, 1  ;;  %v3608_v7 = vadd.f32 %v3607_v24, %v3606_v50  ;;  %v3446_v53 = vmul.f32 %v7897_v19, %v3402_v58  ;;  %v3628_v0 = vrot.slane %v3627_v15, 2 }
 0x301   : > { %4322 = vbcast.lane.b32.xlu0 %v9407_v17, 256  ;;  %v3620_v16 = vadd.f32 %v3619_v20, %v3618_v32  ;;  %v3641_v1 = vadd.f32 %v3640_v33, %v3639_v3  ;;  %v3632_v63 = vsel %vm3449_vm8, %v3443_v62, 0.0  ;;  %v4764_v36 = vsel %vm4682_vm4, %v3596_v4, %v4763_v27  ;;  %v8486_v20 = vpop.permute.xlu1 %3718 }
 0x302   : > { %v3617_v48 = vadd.f32 %v3616_v29, %v3615_v13  ;;  %v3609_v44 = vrot.slane %v3608_v7, 1  ;;  %v3633_v25 = vrot.slane %v3632_v63, 4  ;;  %v9408_v8 = vrot.slane %v7817_v54, %v7756_v34 }
 0x303   : > { %v4765_v41 = vsel %vm4684_vm5, %v3603_v60, %v4764_v36  ;;  %v3629_v58 = vadd.f32 %v3628_v0, %v3627_v15  ;;  %v3621_v50 = vrot.slane %v3620_v16, 2  ;;  %v3642_v38 = vrot.slane %v3641_v1, 2  ;;  %v8488_v15 = vpop.permute.xlu0 %3711 }
 0x304   : > { %4273 = vbcast.lane.b32.xlu1 %v9408_v8, 256  ;;  %v9409_v32 = vrot.slane %v7821_v39, %v7756_v34  ;;  %v3610_v3 = vadd.f32 %v3609_v44, %v3608_v7  ;;  %v3634_v24 = vadd.f32 %v3633_v25, %v3632_v63  ;;  %v3653_v27 = vsel %vm3449_vm8, %v3446_v53, 0.0 }
 0x305   : > { %v3445_v13 = vmul.f32 %v7899_v49, %v8422_v22  ;;  %v3630_v54 = vrot.slane %v3629_v58, 1  ;;  %v3622_v33 = vadd.f32 %v3621_v50, %v3620_v16  ;;  %v3643_v62 = vadd.f32 %v3642_v38, %v3641_v1 }
 0x306   : > { %4217 = vbcast.lane.b32.xlu0 %v9409_v32, 256  ;;  %v3654_v60 = vrot.slane %v3653_v27, 4  ;;  %v4766_v17 = vsel %vm4686_vm6, %v3610_v3, %v4765_v41  ;;  %v3635_v4 = vrot.slane %v3634_v24, 2  ;;  %v3448_v29 = vmul.f32 %v7903_v51, %v8438_v6  ;;  %v8504_v6 = vpop.permute.xlu1 %3732 }
 0x307   : > { %v3646_v39 = vsel %vm3449_vm8, %v3445_v13, 0.0  ;;  %v9410_v7 = vrot.slane %v7825_v56, %v7756_v34  ;;  %v8498_v22 = vsel %vm4688_vm7, %v3617_v48, %v4766_v17  ;;  %v3631_v53 = vadd.f32 %v3630_v54, %v3629_v58  ;;  %v9413_v48 = vld [vmem:[#allocation51_spill] sm:$0xff]  ;;  %v8508_v58 = vpop.permute.xlu0 %3725 }
 0x308   : > { %9411 = vst [vmem:[#allocation65_spill] sm:$0xff] %v8498_v22  ;;  %v3623_v0 = vrot.slane %v3622_v33, 1  ;;  %v3644_v16 = vrot.slane %v3643_v62, 1  ;;  %v9412_v1 = vrot.slane %v7830_v12, %v7756_v34  ;;  %v3636_v63 = vadd.f32 %v3635_v4, %v3634_v24 }
 0x309   : > { %4385 = vbcast.lane.b32.xlu1 %v9410_v7, 256  ;;  %v3655_v36 = vadd.f32 %v3654_v60, %v3653_v27  ;;  %v3647_v44 = vrot.slane %v3646_v39, 4  ;;  %v3667_v25 = vsel %vm3449_vm8, %v3448_v29, 0.0  ;;  %v3447_v50 = vmul.f32 %v9413_v48, %v8443_v61  ;;  %v9414_v27 = vld [vmem:[#allocation19_spill] sm:$0xff]  ;;  %v9416_v7 = vld [vmem:[#allocation20_spill] sm:$0xff] }
 0x30a   : > { %4329 = vbcast.lane.b32.xlu0 %v9412_v1, 256  ;;  %v3624_v8 = vadd.f32 %v3623_v0, %v3622_v33  ;;  %v3645_v56 = vadd.f32 %v3644_v16, %v3643_v62  ;;  %v3668_v41 = vrot.slane %v3667_v25, 4  ;;  %v3637_v38 = vrot.slane %v3636_v63, 1  ;;  %v8514_v17 = vpop.permute.xlu1 %3746 }
 0x30b   : > { %v3656_v32 = vrot.slane %v3655_v36, 2  ;;  %v3648_v3 = vadd.f32 %v3647_v44, %v3646_v39  ;;  %v3660_v24 = vsel %vm3449_vm8, %v3447_v50, 0.0  ;;  %v3903_v13 = vmul.f32 %v9414_v27, %v8455_v42  ;;  %v9415_v39 = vld [vmem:[#allocation12_spill] sm:$0xff]  ;;  %v8520_v0 = vpop.permute.xlu0 %3739 }
 0x30c   : > { %v4768_v34 = vsel %vm4676_vm1, %v3631_v53, %v3624_v8  ;;  %v3669_v12 = vadd.f32 %v3668_v41, %v3667_v25  ;;  %v3638_v54 = vadd.f32 %v3637_v38, %v3636_v63  ;;  %v3661_v60 = vrot.slane %v3660_v24, 4 }
 0x30d   : > { %v3657_v33 = vadd.f32 %v3656_v32, %v3655_v36  ;;  %v3649_v62 = vrot.slane %v3648_v3, 2  ;;  %v3942_v4 = vsel %vm3934_vm9, %v3903_v13, 0.0  ;;  %v3902_v29 = vmul.f32 %v9415_v39, %v8460_v21 }
 0x30e   : > { %v3670_v61 = vrot.slane %v3669_v12, 2  ;;  %v3905_v53 = vmul.f32 %v9416_v7, %v3705_v57  ;;  %v4769_v16 = vsel %vm4678_vm2, %v3638_v54, %v4768_v34  ;;  %v3662_v63 = vadd.f32 %v3661_v60, %v3660_v24  ;;  %v8525_v21 = vpop.permute.xlu1 %3760 }
 0x30f   : > { %v3658_v1 = vrot.slane %v3657_v33, 1  ;;  %v3650_v42 = vadd.f32 %v3649_v62, %v3648_v3  ;;  %v4770_v36 = vsel %vm4680_vm3, %v3645_v56, %v4769_v16  ;;  %v3943_v25 = vrot.slane %v3942_v4, 4  ;;  %v8530_v34 = vpop.permute.xlu0 %3753 }
 0x310   : > { %v3671_v44 = vadd.f32 %v3670_v61, %v3669_v12  ;;  %v3935_v8 = vsel %vm3934_vm9, %v3902_v29, 0.0  ;;  %v3663_v38 = vrot.slane %v3662_v63, 2  ;;  %v3956_v52 = vsel %vm3934_vm9, %v3905_v53, 0.0 }
 0x311   : > { %v3659_v41 = vadd.f32 %v3658_v1, %v3657_v33  ;;  %v3651_v50 = vrot.slane %v3650_v42, 1  ;;  %v3936_v32 = vrot.slane %v3935_v8, 4  ;;  %v3944_v13 = vadd.f32 %v3943_v25, %v3942_v4 }
 0x312   : > { %v3672_v57 = vrot.slane %v3671_v44, 1  ;;  %v3904_v3 = vmul.f32 %v9366_v11, %v8473_v23  ;;  %v3664_v12 = vadd.f32 %v3663_v38, %v3662_v63  ;;  %v3957_v54 = vrot.slane %v3956_v52, 4  ;;  %v8536_v1 = vpop.permute.xlu1 %3774 }
 0x313   : > { %v3652_v56 = vadd.f32 %v3651_v50, %v3650_v42  ;;  %v3937_v24 = vadd.f32 %v3936_v32, %v3935_v8  ;;  %v3945_v33 = vrot.slane %v3944_v13, 2  ;;  %v3907_v61 = vmul.f32 %v9368_v10, %v8486_v20 }
 0x314   : > { %v3673_v62 = vadd.f32 %v3672_v57, %v3671_v44  ;;  %v3949_v60 = vsel %vm3934_vm9, %v3904_v3, 0.0  ;;  %v3665_v29 = vrot.slane %v3664_v12, 1  ;;  %v3958_v16 = vadd.f32 %v3957_v54, %v3956_v52  ;;  %v8540_v44 = vpop.permute.xlu0 %3767  ;;  %v9418_v52 = vld [vmem:[#allocation13_spill] sm:$0xff] }
 0x315   : > { %v4771_v4 = vsel %vm4682_vm4, %v3652_v56, %v4770_v36  ;;  %v3938_v53 = vrot.slane %v3937_v24, 2  ;;  %v3946_v42 = vadd.f32 %v3945_v33, %v3944_v13  ;;  %v3950_v63 = vrot.slane %v3949_v60, 4  ;;  %v9417_v36 = vld [vmem:[#allocation46_spill] sm:$0xff] }
 0x316   : > { %v4772_v23 = vsel %vm4684_vm5, %v3659_v41, %v4771_v4  ;;  %v3970_v25 = vsel %vm3934_vm9, %v3907_v61, 0.0  ;;  %v3666_v8 = vadd.f32 %v3665_v29, %v3664_v12  ;;  %v3959_v38 = vrot.slane %v3958_v16, 2  ;;  %v8547_v61 = vpop.permute.xlu1 %3788 }
 0x317   : > { %v3939_v50 = vadd.f32 %v3938_v53, %v3937_v24  ;;  %v3971_v32 = vrot.slane %v3970_v25, 4  ;;  %v3947_v20 = vrot.slane %v3946_v42, 1  ;;  %v3951_v57 = vadd.f32 %v3950_v63, %v3949_v60 }
 0x318   : > { %v3906_v3 = vmul.f32 %v9417_v36, %v8488_v15  ;;  %v3909_v56 = vmul.f32 %v9418_v52, %v8504_v6  ;;  %v4773_v41 = vsel %vm4686_vm6, %v3666_v8, %v4772_v23  ;;  %v3960_v54 = vadd.f32 %v3959_v38, %v3958_v16  ;;  %v8553_v29 = vpop.permute.xlu0 %3781  ;;  %v9420_v16 = vld [vmem:[#allocation30_spill] sm:$0xff]  ;;  %v9421_v8 = vld [vmem:[#allocation31_spill] sm:$0xff] }
 0x319   : > { %v3940_v13 = vrot.slane %v3939_v50, 1  ;;  %v3972_v33 = vadd.f32 %v3971_v32, %v3970_v25  ;;  %v8550_v12 = vsel %vm4688_vm7, %v3673_v62, %v4773_v41  ;;  %v3948_v24 = vadd.f32 %v3947_v20, %v3946_v42 }
 0x31a   : > { %9419 = vst [vmem:[#allocation67_spill] sm:$0xff] %v8550_v12  ;;  %v3952_v4 = vrot.slane %v3951_v57, 2  ;;  %v3963_v60 = vsel %vm3934_vm9, %v3906_v3, 0.0  ;;  %v3961_v53 = vrot.slane %v3960_v54, 1  ;;  %v3984_v23 = vsel %vm3934_vm9, %v3909_v56, 0.0  ;;  %v8561_v3 = vpop.permute.xlu1 %3802 }
 0x31b   : > { %v3941_v15 = vadd.f32 %v3940_v13, %v3939_v50  ;;  %v3973_v63 = vrot.slane %v3972_v33, 2  ;;  %v3964_v6 = vrot.slane %v3963_v60, 4  ;;  %v3908_v25 = vmul.f32 %v9420_v16, %v8508_v58 }
 0x31c   : > { %v3953_v52 = vadd.f32 %v3952_v4, %v3951_v57  ;;  %v3911_v62 = vmul.f32 %v9421_v8, %v8514_v17  ;;  %v3962_v38 = vadd.f32 %v3961_v53, %v3960_v54  ;;  %v3985_v41 = vrot.slane %v3984_v23, 4  ;;  %v8565_v56 = vpop.permute.xlu0 %3795  ;;  %v9422_v54 = vld [vmem:[#allocation14_spill] sm:$0xff] }
 0x31d   : > { %v4811_v42 = vsel %vm4676_vm1, %v3948_v24, %v3941_v15  ;;  %v3974_v32 = vadd.f32 %v3973_v63, %v3972_v33  ;;  %v3965_v20 = vadd.f32 %v3964_v6, %v3963_v60  ;;  %v3977_v13 = vsel %vm3934_vm9, %v3908_v25, 0.0 }
 0x31e   : > { %v3954_v50 = vrot.slane %v3953_v52, 1  ;;  %v3998_v57 = vsel %vm3934_vm9, %v3911_v62, 0.0  ;;  %v3978_v16 = vrot.slane %v3977_v13, 4  ;;  %v3986_v22 = vadd.f32 %v3985_v41, %v3984_v23  ;;  %v8571_v6 = vpop.permute.xlu1 %3816 }
 0x31f   : > { %v3975_v4 = vrot.slane %v3974_v32, 1  ;;  %v3966_v58 = vrot.slane %v3965_v20, 2  ;;  %v3999_v40 = vrot.slane %v3998_v57, 4  ;;  %v3910_v33 = vmul.f32 %v9422_v54, %v8520_v0 }
 0x320   : > { %v3955_v17 = vadd.f32 %v3954_v50, %v3953_v52  ;;  %v3913_v24 = vmul.f32 %v7790_v59, %v8525_v21  ;;  %v3979_v53 = vadd.f32 %v3978_v16, %v3977_v13  ;;  %v3987_v62 = vrot.slane %v3986_v22, 2  ;;  %v8576_v23 = vpop.permute.xlu0 %3809 }
 0x321   : > { %v3976_v60 = vadd.f32 %v3975_v4, %v3974_v32  ;;  %v3967_v15 = vadd.f32 %v3966_v58, %v3965_v20  ;;  %v4000_v63 = vadd.f32 %v3999_v40, %v3998_v57  ;;  %v3991_v12 = vsel %vm3934_vm9, %v3910_v33, 0.0 }
 0x322   : > { %v4812_v25 = vsel %vm4678_vm2, %v3955_v17, %v4811_v42  ;;  %v4012_v52 = vsel %vm3934_vm9, %v3913_v24, 0.0  ;;  %v3980_v41 = vrot.slane %v3979_v53, 2  ;;  %v3988_v32 = vadd.f32 %v3987_v62, %v3986_v22  ;;  %v8583_v58 = vpop.permute.xlu1 %3830 }
 0x323   : > { %v4813_v0 = vsel %vm4680_vm3, %v3962_v38, %v4812_v25  ;;  %v3968_v50 = vrot.slane %v3967_v15, 1  ;;  %v4001_v21 = vrot.slane %v4000_v63, 2  ;;  %v3992_v20 = vrot.slane %v3991_v12, 4 }
 0x324   : > { %v4013_v16 = vrot.slane %v4012_v52, 4  ;;  %v3912_v40 = vmul.f32 %v7795_v55, %v8530_v34  ;;  %v3981_v42 = vadd.f32 %v3980_v41, %v3979_v53  ;;  %v3915_v4 = vmul.f32 %v7807_v31, %v8536_v1  ;;  %v8586_v25 = vpop.permute.xlu0 %3823 }
 0x325   : > { %v3969_v13 = vadd.f32 %v3968_v50, %v3967_v15  ;;  %v4002_v57 = vadd.f32 %v4001_v21, %v4000_v63  ;;  %v3989_v17 = vrot.slane %v3988_v32, 1  ;;  %v3993_v33 = vadd.f32 %v3992_v20, %v3991_v12 }
 0x326   : > { %v4014_v38 = vadd.f32 %v4013_v16, %v4012_v52  ;;  %v4005_v24 = vsel %vm3934_vm9, %v3912_v40, 0.0  ;;  %v3982_v62 = vrot.slane %v3981_v42, 1  ;;  %v4026_v12 = vsel %vm3934_vm9, %v3915_v4, 0.0  ;;  %v8591_v52 = vpop.permute.xlu1 %3858 }
 0x327   : > { %v4814_v22 = vsel %vm4682_vm4, %v3969_v13, %v4813_v0  ;;  %v4003_v51 = vrot.slane %v4002_v57, 1  ;;  %v4006_v34 = vrot.slane %v4005_v24, 4  ;;  %v3990_v15 = vadd.f32 %v3989_v17, %v3988_v32 }
 0x328   : > { %v4815_v53 = vsel %vm4684_vm5, %v3976_v60, %v4814_v22  ;;  %v3994_v63 = vrot.slane %v3993_v33, 2  ;;  %v4015_v50 = vrot.slane %v4014_v38, 2  ;;  %v3983_v1 = vadd.f32 %v3982_v62, %v3981_v42  ;;  %v8595_v13 = vpop.permute.xlu0 %3851 }
 0x329   : > { %v4004_v41 = vadd.f32 %v4003_v51, %v4002_v57  ;;  %v4007_v21 = vadd.f32 %v4006_v34, %v4005_v24  ;;  %v4027_v40 = vrot.slane %v4026_v12, 4  ;;  %v3914_v0 = vmul.f32 %v7809_v26, %v8540_v44 }
 0x32a   : > { %v3995_v20 = vadd.f32 %v3994_v63, %v3993_v33  ;;  %v4016_v16 = vadd.f32 %v4015_v50, %v4014_v38  ;;  %v4816_v32 = vsel %vm4686_vm6, %v3983_v1, %v4815_v53  ;;  %v3917_v42 = vmul.f32 %v9384_v35, %v8547_v61  ;;  %v8608_v62 = vpop.permute.xlu1 %4168 }
 0x32b   : > { %v4008_v60 = vrot.slane %v4007_v21, 2  ;;  %v3916_v51 = vmul.f32 %v9389_v47, %v8553_v29  ;;  %v8603_v57 = vsel %vm4688_vm7, %v3990_v15, %v4816_v32  ;;  %v4028_v33 = vadd.f32 %v4027_v40, %v4026_v12 }
 0x32c   : > { %9423 = vst [vmem:[#allocation68_spill] sm:$0xff] %v8603_v57  ;;  %v3996_v4 = vrot.slane %v3995_v20, 1  ;;  %v4017_v17 = vrot.slane %v4016_v16, 1  ;;  %v4019_v44 = vsel %vm3934_vm9, %v3914_v0, 0.0  ;;  %v4040_v24 = vsel %vm3934_vm9, %v3917_v42, 0.0  ;;  %v8610_v29 = vpop.permute.xlu0 %3865 }
 0x32d   : > { %v4009_v38 = vadd.f32 %v4008_v60, %v4007_v21  ;;  %v4033_v22 = vsel %vm3934_vm9, %v3916_v51, 0.0  ;;  %v4029_v53 = vrot.slane %v4028_v33, 2  ;;  %v4020_v63 = vrot.slane %v4019_v44, 4 }
 0x32e   : > { %v3997_v34 = vadd.f32 %v3996_v4, %v3995_v20  ;;  %v4018_v61 = vadd.f32 %v4017_v17, %v4016_v16  ;;  %v4041_v50 = vrot.slane %v4040_v24, 4  ;;  %v4034_v1 = vrot.slane %v4033_v22, 4  ;;  %v8618_v51 = vpop.permute.xlu1 %4224 }
 0x32f   : > { %v4010_v15 = vrot.slane %v4009_v38, 1  ;;  %v3919_v21 = vmul.f32 %v9390_v43, %v8561_v3  ;;  %v4030_v40 = vadd.f32 %v4029_v53, %v4028_v33  ;;  %v4021_v0 = vadd.f32 %v4020_v63, %v4019_v44 }
 0x330   : > { %v4818_v12 = vsel %vm4676_vm1, %v4004_v41, %v3997_v34  ;;  %v3918_v32 = vmul.f32 %v7857_v45, %v8565_v56  ;;  %v4042_v20 = vadd.f32 %v4041_v50, %v4040_v24  ;;  %v4035_v16 = vadd.f32 %v4034_v1, %v4033_v22  ;;  %v8621_v3 = vpop.permute.xlu0 %4175 }
 0x331   : > { %v4011_v60 = vadd.f32 %v4010_v15, %v4009_v38  ;;  %v4054_v42 = vsel %vm3934_vm9, %v3919_v21, 0.0  ;;  %v4031_v4 = vrot.slane %v4030_v40, 1  ;;  %v4022_v17 = vrot.slane %v4021_v0, 2 }
 0x332   : > { %v4055_v57 = vrot.slane %v4054_v42, 4  ;;  %v4047_v35 = vsel %vm3934_vm9, %v3918_v32, 0.0  ;;  %v4043_v33 = vrot.slane %v4042_v20, 2  ;;  %v4036_v44 = vrot.slane %v4035_v16, 2  ;;  %v8627_v1 = vpop.permute.xlu1 %4280 }
 0x333   : > { %v4819_v41 = vsel %vm4678_vm2, %v4011_v60, %v4818_v12  ;;  %v4048_v34 = vrot.slane %v4047_v35, 4  ;;  %v4032_v56 = vadd.f32 %v4031_v4, %v4030_v40  ;;  %v4023_v24 = vadd.f32 %v4022_v17, %v4021_v0 }
 0x334   : > { %v4820_v38 = vsel %vm4680_vm3, %v4018_v61, %v4819_v41  ;;  %v4056_v22 = vadd.f32 %v4055_v57, %v4054_v42  ;;  %v4044_v53 = vadd.f32 %v4043_v33, %v4042_v20  ;;  %v4037_v63 = vadd.f32 %v4036_v44, %v4035_v16  ;;  %v8633_v60 = vpop.permute.xlu0 %4231 }
 0x335   : > { %v4049_v15 = vadd.f32 %v4048_v34, %v4047_v35  ;;  %v3921_v50 = vmul.f32 %v7861_v30, %v8571_v6  ;;  %v4024_v21 = vrot.slane %v4023_v24, 1  ;;  %v3920_v12 = vmul.f32 %v7866_v2, %v8576_v23 }
 0x336   : > { %v4057_v32 = vrot.slane %v4056_v22, 2  ;;  %v3923_v40 = vmul.f32 %v7870_v5, %v8583_v58  ;;  %v4045_v61 = vrot.slane %v4044_v53, 1  ;;  %v4038_v57 = vrot.slane %v4037_v63, 1  ;;  %v8637_v23 = vpop.permute.xlu1 %4336 }
 0x337   : > { %v4050_v0 = vrot.slane %v4049_v15, 2  ;;  %v4068_v35 = vsel %vm3934_vm9, %v3921_v50, 0.0  ;;  %v4025_v20 = vadd.f32 %v4024_v21, %v4023_v24  ;;  %v4061_v42 = vsel %vm3934_vm9, %v3920_v12, 0.0 }
 0x338   : > { %v4058_v16 = vadd.f32 %v4057_v32, %v4056_v22  ;;  %v4069_v6 = vrot.slane %v4068_v35, 4  ;;  %v4046_v4 = vadd.f32 %v4045_v61, %v4044_v53  ;;  %v4039_v17 = vadd.f32 %v4038_v57, %v4037_v63  ;;  %v8641_v5 = vpop.permute.xlu0 %4287 }
 0x339   : > { %v4051_v41 = vadd.f32 %v4050_v0, %v4049_v15  ;;  %v4062_v33 = vrot.slane %v4061_v42, 4  ;;  %v4821_v58 = vsel %vm4682_vm4, %v4025_v20, %v4820_v38  ;;  %v4082_v47 = vsel %vm3934_vm9, %v3923_v40, 0.0 }
 0x33a   : > { %v4059_v44 = vrot.slane %v4058_v16, 1  ;;  %v4070_v34 = vadd.f32 %v4069_v6, %v4068_v35  ;;  %v4822_v24 = vsel %vm4684_vm5, %v4032_v56, %v4821_v58  ;;  %v4083_v21 = vrot.slane %v4082_v47, 4  ;;  %v8650_v57 = vpop.permute.xlu1 %3872 }
 0x33b   : > { %v4052_v22 = vrot.slane %v4051_v41, 1  ;;  %v4063_v50 = vadd.f32 %v4062_v33, %v4061_v42  ;;  %v4823_v53 = vsel %vm4686_vm6, %v4039_v17, %v4822_v24  ;;  %v3922_v32 = vmul.f32 %v7873_v37, %v8586_v25 }
 0x33c   : > { %v4060_v63 = vadd.f32 %v4059_v44, %v4058_v16  ;;  %v4071_v15 = vrot.slane %v4070_v34, 2  ;;  %v8648_v38 = vsel %vm4688_vm7, %v4046_v4, %v4823_v53  ;;  %v4084_v40 = vadd.f32 %v4083_v21, %v4082_v47  ;;  %v8657_v16 = vpop.permute.xlu0 %4343 }
 0x33d   : > { %v4053_v12 = vadd.f32 %v4052_v22, %v4051_v41  ;;  %v4064_v61 = vrot.slane %v4063_v50, 2  ;;  %v4075_v56 = vsel %vm3934_vm9, %v3922_v32, 0.0  ;;  %v3927_v35 = vmul.f32 %v9402_v46, %v8591_v52 }
 0x33e   : > { %v4072_v0 = vadd.f32 %v4071_v15, %v4070_v34  ;;  %v3926_v20 = vmul.f32 %v7885_v18, %v8595_v13  ;;  %v4085_v42 = vrot.slane %v4084_v40, 2  ;;  %v4076_v4 = vrot.slane %v4075_v56, 4 }
 0x33f   : > { %v4825_v25 = vsel %vm4676_vm1, %v4060_v63, %v4053_v12  ;;  %v4065_v6 = vadd.f32 %v4064_v61, %v4063_v50  ;;  %v4110_v47 = vsel %vm3934_vm9, %v3927_v35, 0.0  ;;  %v4387_v13 = vmul.f32 %v9415_v39, %v8608_v62  ;;  %v8666_v50 = vpop.permute.xlu1 %4238 }
 0x340   : > { %v4073_v17 = vrot.slane %v4072_v0, 1  ;;  %v4103_v41 = vsel %vm3934_vm9, %v3926_v20, 0.0  ;;  %v4086_v58 = vadd.f32 %v4085_v42, %v4084_v40  ;;  %v4077_v44 = vadd.f32 %v4076_v4, %v4075_v56 }
 0x341   : > { %v4066_v33 = vrot.slane %v4065_v6, 1  ;;  %v4111_v52 = vrot.slane %v4110_v47, 4  ;;  %v4104_v24 = vrot.slane %v4103_v41, 4  ;;  %v3928_v22 = vmul.f32 %v9352_v9, %v8610_v29 }
 0x342   : > { %v4074_v34 = vadd.f32 %v4073_v17, %v4072_v0  ;;  %v4087_v53 = vrot.slane %v4086_v58, 1  ;;  %v4078_v63 = vrot.slane %v4077_v44, 2  ;;  %v4420_v12 = vsel %vm4419_vm10, %v4387_v13, 0.0  ;;  %v8672_v0 = vpop.permute.xlu0 %4182 }
 0x343   : > { %v4067_v21 = vadd.f32 %v4066_v33, %v4065_v6  ;;  %v4112_v15 = vadd.f32 %v4111_v52, %v4110_v47  ;;  %v4105_v32 = vadd.f32 %v4104_v24, %v4103_v41  ;;  %v4117_v61 = vsel %vm3934_vm9, %v3928_v22, 0.0 }
 0x344   : > { %v4395_v40 = vmul.f32 %v9422_v54, %v8618_v51  ;;  %v8675_v62 = vadd.f32 %v4087_v53, %v4086_v58  ;;  %v4079_v29 = vadd.f32 %v4078_v63, %v4077_v44  ;;  %v4421_v6 = vrot.slane %v4420_v12, 4  ;;  %v8681_v58 = vpop.permute.xlu1 %4350 }
 0x345   : > { %v4826_v39 = vsel %vm4678_vm2, %v4067_v21, %v4825_v25  ;;  %v4113_v56 = vrot.slane %v4112_v15, 2  ;;  %v4106_v20 = vrot.slane %v4105_v32, 2  ;;  %v4118_v42 = vrot.slane %v4117_v61, 4 }
 0x346   : > { %v4827_v35 = vsel %vm4680_vm3, %v4074_v34, %v4826_v39  ;;  %v4080_v4 = vrot.slane %v4079_v29, 1  ;;  %v4476_v47 = vsel %vm4419_vm10, %v4395_v40, 0.0  ;;  %v4388_v54 = vmul.f32 %v9414_v27, %v8621_v3  ;;  %v8686_v63 = vpop.permute.xlu0 %4294 }
 0x347   : > { %v4114_v17 = vadd.f32 %v4113_v56, %v4112_v15  ;;  %v4107_v51 = vadd.f32 %v4106_v20, %v4105_v32  ;;  %v4422_v41 = vadd.f32 %v4421_v6, %v4420_v12  ;;  %v4119_v33 = vadd.f32 %v4118_v42, %v4117_v61 }
 0x348   : > { %v4477_v25 = vrot.slane %v4476_v47, 4  ;;  %v4081_v44 = vadd.f32 %v4080_v4, %v4079_v29  ;;  %v4427_v34 = vsel %vm4419_vm10, %v4388_v54, 0.0  ;;  %v4403_v24 = vmul.f32 %v7857_v45, %v8627_v1  ;;  %v8697_v4 = vpop.permute.xlu1 %4189 }
 0x349   : > { %v4115_v52 = vrot.slane %v4114_v17, 1  ;;  %v4108_v13 = vrot.slane %v4107_v51, 1  ;;  %v4423_v22 = vrot.slane %v4422_v41, 2  ;;  %v4120_v21 = vrot.slane %v4119_v33, 2 }
 0x34a   : > { %v4478_v53 = vadd.f32 %v4477_v25, %v4476_v47  ;;  %v8689_v27 = vsel %vm4682_vm4, %v4081_v44, %v4827_v35  ;;  %v4428_v15 = vrot.slane %v4427_v34, 4  ;;  %v4532_v32 = vsel %vm4419_vm10, %v4403_v24, 0.0 }
 0x34b   : > { %v4116_v3 = vadd.f32 %v4115_v52, %v4114_v17  ;;  %v4109_v12 = vadd.f32 %v4108_v13, %v4107_v51  ;;  %v4424_v61 = vadd.f32 %v4423_v22, %v4422_v41  ;;  %v4121_v40 = vadd.f32 %v4120_v21, %v4119_v33 }
 0x34c   : > { %v4479_v39 = vrot.slane %v4478_v53, 2  ;;  %v4429_v29 = vadd.f32 %v4428_v15, %v4427_v34  ;;  %v4533_v56 = vrot.slane %v4532_v32, 4  ;;  %v4396_v45 = vmul.f32 %v9421_v8, %v8633_v60  ;;  %v8701_v60 = vpop.permute.xlu0 %3879 }
 0x34d   : > { %v4411_v1 = vmul.f32 %v7885_v18, %v8637_v23  ;;  %v4832_v20 = vsel %vm4676_vm1, %v4116_v3, %v4109_v12  ;;  %v4425_v35 = vrot.slane %v4424_v61, 1  ;;  %v4122_v6 = vrot.slane %v4121_v40, 1 }
 0x34e   : > { %v4480_v42 = vadd.f32 %v4479_v39, %v4478_v53  ;;  %v4430_v17 = vrot.slane %v4429_v29, 2  ;;  %v4534_v47 = vadd.f32 %v4533_v56, %v4532_v32  ;;  %v4483_v54 = vsel %vm4419_vm10, %v4396_v45, 0.0 }
 0x34f   : > { %v4588_v51 = vsel %vm4419_vm10, %v4411_v1, 0.0  ;;  %v4426_v41 = vadd.f32 %v4425_v35, %v4424_v61  ;;  %v4123_v33 = vadd.f32 %v4122_v6, %v4121_v40  ;;  %v4484_v8 = vrot.slane %v4483_v54, 4 }
 0x350   : > { %v4481_v25 = vrot.slane %v4480_v42, 1  ;;  %v4431_v18 = vadd.f32 %v4430_v17, %v4429_v29  ;;  %v4535_v23 = vrot.slane %v4534_v47, 2  ;;  %v4589_v44 = vrot.slane %v4588_v51, 4  ;;  %v8719_v35 = vpop.permute.xlu0 %4245 }
 0x351   : > { %v4404_v52 = vmul.f32 %v9390_v43, %v8641_v5  ;;  %v8706_v34 = vsel %vm4678_vm2, %v4123_v33, %v4832_v20  ;;  %v4485_v13 = vadd.f32 %v4484_v8, %v4483_v54  ;;  %v3929_v22 = vmul.f32 %v9404_v14, %v8650_v57  ;;  %v8714_v43 = vpop.permute.xlu1 %4301 }
 0x352   : > { %v4482_v24 = vadd.f32 %v4481_v25, %v4480_v42  ;;  %v4432_v21 = vrot.slane %v4431_v18, 1  ;;  %v4536_v53 = vadd.f32 %v4535_v23, %v4534_v47  ;;  %v4590_v3 = vadd.f32 %v4589_v44, %v4588_v51 }
 0x353   : > { %v4539_v15 = vsel %vm4419_vm10, %v4404_v52, 0.0  ;;  %v4486_v32 = vrot.slane %v4485_v13, 2  ;;  %v4124_v61 = vsel %vm3934_vm9, %v3929_v22, 0.0  ;;  %v4412_v5 = vmul.f32 %v9402_v46, %v8657_v16 }
 0x354   : > { %v4540_v12 = vrot.slane %v4539_v15, 4  ;;  %v4433_v40 = vadd.f32 %v4432_v21, %v4431_v18  ;;  %v4537_v39 = vrot.slane %v4536_v53, 1  ;;  %v4591_v29 = vrot.slane %v4590_v3, 2 }
 0x355   : > { %v4125_v56 = vrot.slane %v4124_v61, 4  ;;  %v4487_v45 = vadd.f32 %v4486_v32, %v4485_v13  ;;  %v4595_v1 = vsel %vm4419_vm10, %v4412_v5, 0.0  ;;  %v4397_v20 = vmul.f32 %v7795_v55, %v8666_v50  ;;  %v3887_v44 = vpop.permute.xlu1 %3886 }
 0x356   : > { %v4541_v57 = vadd.f32 %v4540_v12, %v4539_v15  ;;  %v8722_v6 = vsel %vm4676_vm1, %v4433_v40, %v4426_v41  ;;  %v4538_v42 = vadd.f32 %v4537_v39, %v4536_v53  ;;  %v4592_v46 = vadd.f32 %v4591_v29, %v4590_v3  ;;  %v8731_v12 = vpop.permute.xlu0 %4357 }
 0x357   : > { %v4126_v16 = vadd.f32 %v4125_v56, %v4124_v61  ;;  %v4488_v17 = vrot.slane %v4487_v45, 1  ;;  %v4596_v54 = vrot.slane %v4595_v1, 4  ;;  %v4490_v51 = vsel %vm4419_vm10, %v4397_v20, 0.0 }
 0x358   : > { %v4542_v47 = vrot.slane %v4541_v57, 2  ;;  %v4593_v33 = vrot.slane %v4592_v46, 1  ;;  %v4491_v8 = vrot.slane %v4490_v51, 4  ;;  %v4389_v18 = vmul.f32 %v9366_v11, %v8672_v0 }
 0x359   : > { %v4127_v25 = vrot.slane %v4126_v16, 2  ;;  %v4489_v55 = vadd.f32 %v4488_v17, %v4487_v45  ;;  %v4597_v23 = vadd.f32 %v4596_v54, %v4595_v1  ;;  %v4413_v41 = vmul.f32 %v9352_v9, %v8681_v58 }
 0x35a   : > { %v4543_v50 = vadd.f32 %v4542_v47, %v4541_v57  ;;  %v4594_v52 = vadd.f32 %v4593_v33, %v4592_v46  ;;  %v4492_v22 = vadd.f32 %v4491_v8, %v4490_v51  ;;  %v4434_v21 = vsel %vm4419_vm10, %v4389_v18, 0.0  ;;  %v4197_v8 = vpop.permute.xlu0 %4196 }
 0x35b   : > { %v4128_v13 = vadd.f32 %v4127_v25, %v4126_v16  ;;  %v4882_v53 = vsel %vm4676_vm1, %v4489_v55, %v4482_v24  ;;  %v4598_v15 = vrot.slane %v4597_v23, 2  ;;  %v4435_v32 = vrot.slane %v4434_v21, 4  ;;  %v4253_v16 = vpop.permute.xlu1 %4252 }
 0x35c   : > { %v4544_v3 = vrot.slane %v4543_v50, 1  ;;  %v4493_v0 = vrot.slane %v4492_v22, 2  ;;  %v4602_v61 = vsel %vm4419_vm10, %v4413_v41, 0.0  ;;  %v4405_v9 = vmul.f32 %v7866_v2, %v8686_v63 }
 0x35d   : > { %v4129_v11 = vrot.slane %v4128_v13, 1  ;;  %v4599_v5 = vadd.f32 %v4598_v15, %v4597_v23  ;;  %v4436_v40 = vadd.f32 %v4435_v32, %v4434_v21  ;;  %v4603_v39 = vrot.slane %v4602_v61, 4 }
 0x35e   : > { %v4545_v58 = vadd.f32 %v4544_v3, %v4543_v50  ;;  %v4494_v56 = vadd.f32 %v4493_v0, %v4492_v22  ;;  %v4546_v24 = vsel %vm4419_vm10, %v4405_v9, 0.0  ;;  %v4390_v45 = vmul.f32 %v9416_v7, %v8697_v4 }
 0x35f   : > { %v4130_v29 = vadd.f32 %v4129_v11, %v4128_v13  ;;  %v4600_v1 = vrot.slane %v4599_v5, 1  ;;  %v4437_v20 = vrot.slane %v4436_v40, 2  ;;  %v4604_v46 = vadd.f32 %v4603_v39, %v4602_v61  ;;  %v4365_v11 = vpop.permute.xlu1 %4364 }
 0x360   : > { %v4889_v57 = vsel %vm4676_vm1, %v4545_v58, %v4538_v42  ;;  %v4495_v63 = vrot.slane %v4494_v56, 1  ;;  %v4547_v17 = vrot.slane %v4546_v24, 4  ;;  %v4441_v47 = vsel %vm4419_vm10, %v4390_v45, 0.0 }
 0x361   : > { %v8742_v2 = vsel %vm4680_vm3, %v4130_v29, %v8706_v34  ;;  %v4601_v54 = vadd.f32 %v4600_v1, %v4599_v5  ;;  %v4438_v51 = vadd.f32 %v4437_v20, %v4436_v40  ;;  %v4605_v33 = vrot.slane %v4604_v46, 2  ;;  %v4309_v5 = vpop.permute.xlu0 %4308 }
 0x362   : > { %v4442_v25 = vrot.slane %v4441_v47, 4  ;;  %v4496_v7 = vadd.f32 %v4495_v63, %v4494_v56  ;;  %v4548_v4 = vadd.f32 %v4547_v17, %v4546_v24  ;;  %v3930_v42 = vmul.f32 %v7899_v49, %v8701_v60 }
 0x363   : > { %v4406_v18 = vmul.f32 %v7861_v30, %v8714_v43  ;;  %v4896_v34 = vsel %vm4676_vm1, %v4601_v54, %v4594_v52  ;;  %v4439_v55 = vrot.slane %v4438_v51, 1  ;;  %v4606_v50 = vadd.f32 %v4605_v33, %v4604_v46  ;;  %v3894_v54 = vpop.permute.xlu1 %3893 }
 0x364   : > { %v4443_v23 = vadd.f32 %v4442_v25, %v4441_v47  ;;  %v8751_v41 = vsel %vm4678_vm2, %v4496_v7, %v4882_v53  ;;  %v4549_v13 = vrot.slane %v4548_v4, 2  ;;  %v4131_v22 = vsel %vm3934_vm9, %v3930_v42, 0.0 }
 0x365   : > { %v4553_v21 = vsel %vm4419_vm10, %v4406_v18, 0.0  ;;  %v4440_v3 = vadd.f32 %v4439_v55, %v4438_v51  ;;  %v4607_v15 = vrot.slane %v4606_v50, 1  ;;  %v4132_v60 = vrot.slane %v4131_v22, 4  ;;  %v3838_v55 = vpop.permute.xlu0 %3837 }
 0x366   : > { %v4444_v32 = vrot.slane %v4443_v23, 2  ;;  %v4550_v0 = vadd.f32 %v4549_v13, %v4548_v4  ;;  %v4554_v30 = vrot.slane %v4553_v21, 4  ;;  %v4398_v43 = vmul.f32 %v7790_v59, %v8719_v35 }
 0x367   : > { %v3931_v52 = vmul.f32 %v7897_v19, %v3887_v44  ;;  %v4876_v53 = vsel %vm4678_vm2, %v4440_v3, %v8722_v6  ;;  %v4608_v61 = vadd.f32 %v4607_v15, %v4606_v50  ;;  %v4133_v58 = vadd.f32 %v4132_v60, %v4131_v22 }
 0x368   : > { %v4445_v9 = vadd.f32 %v4444_v32, %v4443_v23  ;;  %v4551_v40 = vrot.slane %v4550_v0, 1  ;;  %v4555_v39 = vadd.f32 %v4554_v30, %v4553_v21  ;;  %v4497_v29 = vsel %vm4419_vm10, %v4398_v43, 0.0  ;;  %v4260_v43 = vpop.permute.xlu1 %4259 }
 0x369   : > { %v4138_v56 = vsel %vm3934_vm9, %v3931_v52, 0.0  ;;  %v8763_v24 = vsel %vm4678_vm2, %v4608_v61, %v4896_v34  ;;  %v4134_v59 = vrot.slane %v4133_v58, 2  ;;  %v4498_v35 = vrot.slane %v4497_v29, 4 }
 0x36a   : > { %v4446_v45 = vrot.slane %v4445_v9, 1  ;;  %v4552_v44 = vadd.f32 %v4551_v40, %v4550_v0  ;;  %v4556_v1 = vrot.slane %v4555_v39, 2  ;;  %v4139_v20 = vrot.slane %v4138_v56, 4 }
 0x36b   : > { %v4414_v6 = vmul.f32 %v9404_v14, %v8731_v12  ;;  %v4135_v63 = vadd.f32 %v4134_v59, %v4133_v58  ;;  %v4499_v17 = vadd.f32 %v4498_v35, %v4497_v29  ;;  %v4399_v47 = vmul.f32 %v7809_v26, %v4253_v16 }
 0x36c   : > { %v4447_v46 = vadd.f32 %v4446_v45, %v4445_v9  ;;  %v4890_v51 = vsel %vm4678_vm2, %v4552_v44, %v4889_v57  ;;  %v4557_v33 = vadd.f32 %v4556_v1, %v4555_v39  ;;  %v4140_v25 = vadd.f32 %v4139_v20, %v4138_v56  ;;  %v4204_v39 = vpop.permute.xlu0 %4203 }
 0x36d   : > { %v4609_v7 = vsel %vm4419_vm10, %v4414_v6, 0.0  ;;  %v4136_v42 = vrot.slane %v4135_v63, 1  ;;  %v4500_v18 = vrot.slane %v4499_v17, 2  ;;  %v4504_v50 = vsel %vm4419_vm10, %v4399_v47, 0.0 }
 0x36e   : > { %v8771_v4 = vsel %vm4680_vm3, %v4447_v46, %v4876_v53  ;;  %v4610_v34 = vrot.slane %v4609_v7, 4  ;;  %v4558_v14 = vrot.slane %v4557_v33, 1  ;;  %v4141_v12 = vrot.slane %v4140_v25, 2 }
 0x36f   : > { %v4391_v26 = vmul.f32 %v9417_v36, %v4197_v8  ;;  %v4137_v16 = vadd.f32 %v4136_v42, %v4135_v63  ;;  %v4501_v23 = vadd.f32 %v4500_v18, %v4499_v17  ;;  %v4505_v13 = vrot.slane %v4504_v50, 4 }
 0x370   : > { %v4611_v57 = vadd.f32 %v4610_v34, %v4609_v7  ;;  %v4559_v22 = vadd.f32 %v4558_v14, %v4557_v33  ;;  %v4142_v21 = vadd.f32 %v4141_v12, %v4140_v25  ;;  %v4415_v15 = vmul.f32 %v7899_v49, %v4365_v11  ;;  %v4316_v18 = vpop.permute.xlu0 %4315 }
 0x371   : > { %v4448_v3 = vsel %vm4419_vm10, %v4391_v26, 0.0  ;;  %v4835_v32 = vsel %vm4682_vm4, %v4137_v16, %v8742_v2  ;;  %v4502_v60 = vrot.slane %v4501_v23, 1  ;;  %v4506_v30 = vadd.f32 %v4505_v13, %v4504_v50 }
 0x372   : > { %v4612_v0 = vrot.slane %v4611_v57, 2  ;;  %v8780_v52 = vsel %vm4680_vm3, %v4559_v22, %v4890_v51  ;;  %v4143_v36 = vrot.slane %v4142_v21, 1  ;;  %v4449_v8 = vrot.slane %v4448_v3, 4 }
 0x373   : > { %v4616_v53 = vsel %vm4419_vm10, %v4415_v15, 0.0  ;;  %v4503_v61 = vadd.f32 %v4502_v60, %v4501_v23  ;;  %v4507_v58 = vrot.slane %v4506_v30, 2  ;;  %v4407_v2 = vmul.f32 %v7873_v37, %v4309_v5  ;;  %v4372_v37 = vpop.permute.xlu1 %4371 }
 0x374   : > { %v4613_v9 = vadd.f32 %v4612_v0, %v4611_v57  ;;  %v4617_v40 = vrot.slane %v4616_v53, 4  ;;  %v4144_v49 = vadd.f32 %v4143_v36, %v4142_v21  ;;  %v4450_v11 = vadd.f32 %v4449_v8, %v4448_v3 }
 0x375   : > { %v3932_v29 = vmul.f32 %v9413_v48, %v3894_v54  ;;  %v4884_v56 = vsel %vm4680_vm3, %v4503_v61, %v8751_v41  ;;  %v4508_v59 = vadd.f32 %v4507_v58, %v4506_v30  ;;  %v4560_v20 = vsel %vm4419_vm10, %v4407_v2, 0.0  ;;  %v9424_v58 = vld [vmem:[#allocation37_spill] sm:$0xff] }
 0x376   : > { %v4614_v45 = vrot.slane %v4613_v9, 1  ;;  %v4618_v35 = vadd.f32 %v4617_v40, %v4616_v53  ;;  %v4836_v44 = vsel %vm4684_vm5, %v4144_v49, %v4835_v32  ;;  %v4451_v1 = vrot.slane %v4450_v11, 2  ;;  %v3845_v53 = vpop.permute.xlu0 %3844 }
 0x377   : > { %v4145_v6 = vsel %vm3934_vm9, %v3932_v29, 0.0  ;;  %v4509_v63 = vrot.slane %v4508_v59, 1  ;;  %v4561_v47 = vrot.slane %v4560_v20, 4  ;;  %v8793_v41 = vsel %vm4684_vm5, %v8675_v62, %v8689_v27  ;;  %v3901_v15 = vpop.permute.xlu1 %3900 }
 0x378   : > { %v4615_v46 = vadd.f32 %v4614_v45, %v4613_v9  ;;  %v4619_v17 = vrot.slane %v4618_v35, 2  ;;  %v4452_v5 = vadd.f32 %v4451_v1, %v4450_v11  ;;  %v4146_v54 = vrot.slane %v4145_v6, 4 }
 0x379   : > { %v3924_v51 = vmul.f32 %v7879_v28, %v3838_v55  ;;  %v4510_v25 = vadd.f32 %v4509_v63, %v4508_v59  ;;  %v4562_v42 = vadd.f32 %v4561_v47, %v4560_v20  ;;  %v4400_v50 = vmul.f32 %v7807_v31, %v4260_v43  ;;  %v9425_v63 = vld [vmem:[#allocation48_spill] sm:$0xff] }
 0x37a   : > { %v4898_v33 = vsel %vm4680_vm3, %v4615_v46, %v8763_v24  ;;  %v4620_v7 = vadd.f32 %v4619_v17, %v4618_v35  ;;  %v4453_v34 = vrot.slane %v4452_v5, 1  ;;  %v4147_v14 = vadd.f32 %v4146_v54, %v4145_v6  ;;  %v9426_v54 = vld [vmem:[#allocation67_spill] sm:$0xff] }
 0x37b   : > { %v4089_v12 = vsel %vm3934_vm9, %v3924_v51, 0.0  ;;  %v4885_v26 = vsel %vm4682_vm4, %v4510_v25, %v4884_v56  ;;  %v4563_v62 = vrot.slane %v4562_v42, 2  ;;  %v4511_v57 = vsel %vm4419_vm10, %v4400_v50, 0.0  ;;  %v4267_v1 = vpop.permute.xlu1 %4266  ;;  %v9427_v51 = vld [vmem:[#allocation60_spill] sm:$0xff] }
 0x37c   : > { %v4621_v16 = vrot.slane %v4620_v7, 1  ;;  %v4090_v27 = vrot.slane %v4089_v12, 4  ;;  %v4454_v23 = vadd.f32 %v4453_v34, %v4452_v5  ;;  %v4148_v55 = vrot.slane %v4147_v14, 2 }
 0x37d   : > { %v4392_v24 = vmul.f32 %v9368_v10, %v4204_v39  ;;  %v4564_v22 = vadd.f32 %v4563_v62, %v4562_v42  ;;  %v4512_v3 = vrot.slane %v4511_v57, 4  ;;  %v4416_v0 = vmul.f32 %v7897_v19, %v4372_v37 }
 0x37e   : > { %v4622_v13 = vadd.f32 %v4621_v16, %v4620_v7  ;;  %v4091_v21 = vadd.f32 %v4090_v27, %v4089_v12  ;;  %v4878_v32 = vsel %vm4682_vm4, %v4454_v23, %v8771_v4  ;;  %v4149_v31 = vadd.f32 %v4148_v55, %v4147_v14  ;;  %v9430_v23 = vld [vmem:[#allocation38_spill] sm:$0xff] }
 0x37f   : > { %v4455_v60 = vsel %vm4419_vm10, %v4392_v24, 0.0  ;;  %v4565_v43 = vrot.slane %v4564_v22, 1  ;;  %v4513_v8 = vadd.f32 %v4512_v3, %v4511_v57  ;;  %v4623_v9 = vsel %vm4419_vm10, %v4416_v0, 0.0  ;;  %v9431_v57 = vld [vmem:[#allocation34_spill] sm:$0xff] }
 0x380   : > { %v4899_v30 = vsel %vm4682_vm4, %v4622_v13, %v4898_v33  ;;  %v4092_v36 = vrot.slane %v4091_v21, 2  ;;  %v4150_v10 = vrot.slane %v4149_v31, 1  ;;  %v4456_v61 = vrot.slane %v4455_v60, 4  ;;  %v9432_v3 = vld [vmem:[#allocation30_spill] sm:$0xff] }
 0x381   : > { %v4408_v40 = vmul.f32 %v9424_v58, %v4316_v18  ;;  %v4566_v39 = vadd.f32 %v4565_v43, %v4564_v22  ;;  %v4514_v4 = vrot.slane %v4513_v8, 2  ;;  %v4624_v11 = vrot.slane %v4623_v9, 4  ;;  %v9428_v18 = vld [vmem:[#allocation65_spill] sm:$0xff] }
 0x382   : > { %v4093_v49 = vadd.f32 %v4092_v36, %v4091_v21  ;;  %v4151_v2 = vadd.f32 %v4150_v10, %v4149_v31  ;;  %v4457_v29 = vadd.f32 %v4456_v61, %v4455_v60  ;;  %v3933_v17 = vmul.f32 %v9425_v63, %v3901_v15  ;;  %v4379_v31 = vpop.permute.xlu1 %4378 }
 0x383   : > { %v4567_v19 = vsel %vm4419_vm10, %v4408_v40, 0.0  ;;  %v4892_v56 = vsel %vm4682_vm4, %v4566_v39, %v8780_v52  ;;  %v4515_v59 = vadd.f32 %v4514_v4, %v4513_v8  ;;  %v4625_v35 = vadd.f32 %v4624_v11, %v4623_v9  ;;  %v4211_v52 = vpop.permute.xlu0 %4210 }
 0x384   : > { %v4094_v45 = vrot.slane %v4093_v49, 1  ;;  %v8814_v20 = vsel %vm4686_vm6, %v4151_v2, %v4836_v44  ;;  %v4458_v6 = vrot.slane %v4457_v29, 2  ;;  %v4568_v46 = vrot.slane %v4567_v19, 4  ;;  %v9429_v44 = vld [vmem:[#allocation56_spill] sm:$0xff] }
 0x385   : > { %v4516_v37 = vrot.slane %v4515_v59, 1  ;;  %v4626_v5 = vrot.slane %v4625_v35, 2  ;;  %v8820_v33 = vsel %vm2964_vm0, %v9427_v51, %v9426_v54  ;;  %v4152_v42 = vsel %vm3934_vm9, %v3933_v17, 0.0 }
 0x386   : > { %v4095_v47 = vadd.f32 %v4094_v45, %v4093_v49  ;;  %v4459_v25 = vadd.f32 %v4458_v6, %v4457_v29  ;;  %v4569_v7 = vadd.f32 %v4568_v46, %v4567_v19  ;;  %v8826_v34 = vsel %vm2964_vm0, %v9429_v44, %v9428_v18  ;;  %v4274_v6 = vpop.permute.xlu1 %4273 }
 0x387   : > { %v4517_v12 = vadd.f32 %v4516_v37, %v4515_v59  ;;  %v4627_v50 = vadd.f32 %v4626_v5, %v4625_v35  ;;  %v4153_v16 = vrot.slane %v4152_v42, 4  ;;  %v3925_v55 = vmul.f32 %v9430_v23, %v3845_v53  ;;  %v4323_v61 = vpop.permute.xlu0 %4322 }
 0x388   : > { %v8830_v14 = vsel %vm4686_vm6, %v4095_v47, %v8793_v41  ;;  %v4460_v62 = vrot.slane %v4459_v25, 1  ;;  %v4570_v27 = vrot.slane %v4569_v7, 2  ;;  %v4401_v24 = vmul.f32 %v9431_v57, %v4267_v1 }
 0x389   : > { %v8835_v13 = vsel %vm4684_vm5, %v4517_v12, %v4885_v26  ;;  %v4628_v22 = vrot.slane %v4627_v50, 1  ;;  %v4154_v21 = vadd.f32 %v4153_v16, %v4152_v42  ;;  %v4393_v15 = vmul.f32 %v9432_v3, %v4211_v52  ;;  %v9435_v3 = vld [vmem:[#allocation68_spill] sm:$0xff] }
 0x38a   : > { %v4461_v60 = vadd.f32 %v4460_v62, %v4459_v25  ;;  %v4571_v41 = vadd.f32 %v4570_v27, %v4569_v7  ;;  %v4096_v0 = vsel %vm3934_vm9, %v3925_v55, 0.0  ;;  %v4518_v43 = vsel %vm4419_vm10, %v4401_v24, 0.0  ;;  %v9433_v25 = vld [vmem:[#allocation33_spill] sm:$0xff]  ;;  %v9434_v7 = vld [vmem:[#allocation63_spill] sm:$0xff] }
 0x38b   : > { %v4629_v36 = vadd.f32 %v4628_v22, %v4627_v50  ;;  %v4155_v8 = vrot.slane %v4154_v21, 2  ;;  %v4097_v10 = vrot.slane %v4096_v0, 4  ;;  %v4519_v53 = vrot.slane %v4518_v43, 4  ;;  %v4218_v54 = vpop.permute.xlu0 %4217 }
 0x38c   : > { %v4879_v9 = vsel %vm4684_vm5, %v4461_v60, %v4878_v32  ;;  %v4572_v26 = vrot.slane %v4571_v41, 1  ;;  %v4462_v58 = vsel %vm4419_vm10, %v4393_v15, 0.0  ;;  %v4417_v40 = vmul.f32 %v9413_v48, %v4379_v31  ;;  %v9436_v15 = vld [vmem:[#allocation61_spill] sm:$0xff] }
 0x38d   : > { %v4900_v39 = vsel %vm4684_vm5, %v4629_v36, %v4899_v30  ;;  %v4156_v49 = vadd.f32 %v4155_v8, %v4154_v21  ;;  %v4098_v4 = vadd.f32 %v4097_v10, %v4096_v0  ;;  %v4520_v11 = vadd.f32 %v4519_v53, %v4518_v43  ;;  %v9437_v31 = vld [vmem:[#allocation13_spill] sm:$0xff] }
 0x38e   : > { %v4573_v2 = vadd.f32 %v4572_v26, %v4571_v41  ;;  %v4463_v29 = vrot.slane %v4462_v58, 4  ;;  %v4630_v19 = vsel %vm4419_vm10, %v4417_v40, 0.0  ;;  %v4409_v45 = vmul.f32 %v7879_v28, %v4323_v61  ;;  %v4386_v41 = vpop.permute.xlu1 %4385 }
 0x38f   : > { %v4157_v59 = vrot.slane %v4156_v49, 1  ;;  %v4099_v35 = vrot.slane %v4098_v4, 2  ;;  %v4521_v1 = vrot.slane %v4520_v11, 2  ;;  %v4631_v32 = vrot.slane %v4630_v19, 4  ;;  %v4330_v8 = vpop.permute.xlu0 %4329 }
 0x390   : > { %v4893_v46 = vsel %vm4684_vm5, %v4573_v2, %v4892_v56  ;;  %v4464_v48 = vadd.f32 %v4463_v29, %v4462_v58  ;;  %v4574_v30 = vsel %vm4419_vm10, %v4409_v45, 0.0  ;;  %v4402_v28 = vmul.f32 %v9433_v25, %v4274_v6 }
 0x391   : > { %v4158_v17 = vadd.f32 %v4157_v59, %v4156_v49  ;;  %v4100_v47 = vadd.f32 %v4099_v35, %v4098_v4  ;;  %v4522_v37 = vadd.f32 %v4521_v1, %v4520_v11  ;;  %v4632_v5 = vadd.f32 %v4631_v32, %v4630_v19 }
 0x392   : > { %v4465_v51 = vrot.slane %v4464_v48, 2  ;;  %v4575_v52 = vrot.slane %v4574_v30, 4  ;;  %v4913_v42 = vsel %vm4911_vm11, %v9434_v7, %v8648_v38  ;;  %v4525_v27 = vsel %vm4419_vm10, %v4402_v28, 0.0 }
 0x393   : > { %v4838_v56 = vsel %vm4688_vm7, %v4158_v17, %v8814_v20  ;;  %v4101_v18 = vrot.slane %v4100_v47, 1  ;;  %v4523_v44 = vrot.slane %v4522_v37, 1  ;;  %v4633_v12 = vrot.slane %v4632_v5, 2 }
 0x394   : > { %v8856_v50 = vsel %vm4911_vm11, %v8820_v33, %v4838_v56  ;;  %v4466_v16 = vadd.f32 %v4465_v51, %v4464_v48  ;;  %v4576_v62 = vadd.f32 %v4575_v52, %v4574_v30  ;;  %v4526_v22 = vrot.slane %v4525_v27, 4 }
 0x395   : > { %v4102_v55 = vadd.f32 %v4101_v18, %v4100_v47  ;;  %v4524_v57 = vadd.f32 %v4523_v44, %v4522_v37  ;;  %v4634_v24 = vadd.f32 %v4633_v12, %v4632_v5  ;;  %v4912_v20 = vsel %vm4911_vm11, %v9436_v15, %v9435_v3 }
 0x396   : > { %v4467_v21 = vrot.slane %v4466_v16, 1  ;;  %v4577_v38 = vrot.slane %v4576_v62, 2  ;;  %v4394_v60 = vmul.f32 %v9437_v31, %v4218_v54  ;;  %v4527_v36 = vadd.f32 %v4526_v22, %v4525_v27 }
 0x397   : > { %v4831_v33 = vsel %vm4688_vm7, %v4102_v55, %v8830_v14  ;;  %v4887_v0 = vsel %vm4686_vm6, %v4524_v57, %v8835_v13  ;;  %v4635_v43 = vrot.slane %v4634_v24, 1  ;;  %v4418_v4 = vmul.f32 %v9425_v63, %v4386_v41 }
 0x398   : > { %v4914_v10 = vsel %vm4911_vm11, %v8826_v34, %v4831_v33  ;;  %v4468_v53 = vadd.f32 %v4467_v21, %v4466_v16  ;;  %v4578_v61 = vadd.f32 %v4577_v38, %v4576_v62  ;;  %v4469_v26 = vsel %vm4419_vm10, %v4394_v60, 0.0 }
 0x399   : > { %v4636_v58 = vadd.f32 %v4635_v43, %v4634_v24  ;;  %v4528_v40 = vrot.slane %v4527_v36, 2  ;;  %v4470_v49 = vrot.slane %v4469_v26, 4  ;;  %v4410_v13 = vmul.f32 %v9430_v23, %v4330_v8 }
 0x39a   : > { %v4880_v14 = vsel %vm4686_vm6, %v4468_v53, %v4879_v9  ;;  %v4579_v11 = vrot.slane %v4578_v61, 1  ;;  %v4637_v34 = vsel %vm4419_vm10, %v4418_v4, 0.0 }
 0x39b   : > { %v4901_v2 = vsel %vm4686_vm6, %v4636_v58, %v4900_v39  ;;  %v4529_v29 = vadd.f32 %v4528_v40, %v4527_v36  ;;  %v4471_v19 = vadd.f32 %v4470_v49, %v4469_v26  ;;  %v4638_v59 = vrot.slane %v4637_v34, 4 }
 0x39c   : > { %v4580_v45 = vadd.f32 %v4579_v11, %v4578_v61  ;;  %v4581_v35 = vsel %vm4419_vm10, %v4410_v13, 0.0 }
 0x39d   : > { %v4530_v1 = vrot.slane %v4529_v29, 1  ;;  %v4472_v32 = vrot.slane %v4471_v19, 2  ;;  %v4582_v6 = vrot.slane %v4581_v35, 4  ;;  %v4639_v9 = vadd.f32 %v4638_v59, %v4637_v34 }
 0x39e   : > { %v4894_v63 = vsel %vm4686_vm6, %v4580_v45, %v4893_v46 }
 0x39f   : > { %v4531_v48 = vadd.f32 %v4530_v1, %v4529_v29  ;;  %v4473_v23 = vadd.f32 %v4472_v32, %v4471_v19  ;;  %v4583_v30 = vadd.f32 %v4582_v6, %v4581_v35  ;;  %v4640_v39 = vrot.slane %v4639_v9, 2 }
 0x3a1   : > { %v4888_v17 = vsel %vm4688_vm7, %v4531_v48, %v4887_v0  ;;  %v4474_v47 = vrot.slane %v4473_v23, 1  ;;  %v4584_v37 = vrot.slane %v4583_v30, 2  ;;  %v4641_v54 = vadd.f32 %v4640_v39, %v4639_v9 }
 0x3a2   : > { %v4918_v5 = vsel %vm4916_vm12, %v4913_v42, %v4888_v17 }
 0x3a3   : > { %v4922_v51 = vmax.f32 %v4918_v5, 0.0  ;;  %v4475_v52 = vadd.f32 %v4474_v47, %v4473_v23  ;;  %v4585_v25 = vadd.f32 %v4584_v37, %v4583_v30  ;;  %v4642_v28 = vrot.slane %v4641_v54, 1 }
 0x3a5   : > { %4926 = vst [vmem:[%s245_s10 + $0x8] sm:$0xff] %v4922_v51  ;;  %v4881_v46 = vsel %vm4688_vm7, %v4475_v52, %v4880_v14  ;;  %v4586_v7 = vrot.slane %v4585_v25, 1  ;;  %v4643_v18 = vadd.f32 %v4642_v28, %v4641_v54 }
 0x3a6   : > { %v4917_v56 = vsel %vm4916_vm12, %v4912_v20, %v4881_v46 }
 0x3a7   : > { %v4921_v44 = vmax.f32 %v4917_v56, 0.0  ;;  %v4587_v12 = vadd.f32 %v4586_v7, %v4585_v25  ;;  %v4902_v42 = vsel %vm4688_vm7, %v4643_v18, %v4901_v2 }
 0x3a8   : > { %v4920_v16 = vsel %vm4916_vm12, %v8856_v50, %v4902_v42 }
 0x3a9   : > { %4925 = vst [vmem:[%s245_s10] sm:$0xff] %v4921_v44  ;;  %v4895_v62 = vsel %vm4688_vm7, %v4587_v12, %v4894_v63  ;;  %v4924_v27 = vmax.f32 %v4920_v16, 0.0 }
 0x3aa   : > { %v4919_v55 = vsel %vm4916_vm12, %v4914_v10, %v4895_v62 }
 0x3ab   : > { %v4923_v57 = vmax.f32 %v4919_v55, 0.0  ;;  %4928 = vst [vmem:[%s245_s10 + $0x18] sm:$0xff] %v4924_v27 }
 0x3ad   : > { %4927 = vst [vmem:[%s245_s10 + $0x10] sm:$0xff] %v4923_v57 }
 0x3ae   : > { %6393 = shalt.err (!%p6390_p0)
}
 0x3af   : > { %s6394_s11 = scalar_lea.hbm %s8891_s30, 512  ;;  %s6398_s7 = scalar_lea.hbm %s8940_s4, 4096 }
 0x3b0   : > { %p6395_p2 = scmp.ne.s32.totalorder %s8891_s30, %s6394_s11  ;;  %p6399_p3 = scmp.lt.u32.totalorder %s8891_s30, %s8940_s4 }
 0x3b1   : > { %p6400_p13 = scmp.lt.u32.totalorder %s6398_s7, %s6394_s11  ;;  %p6402_p12 = scmp.lt.u32.totalorder %s6394_s11, %s8891_s30 }
 0x3b2   : > { %p6396_p7 = pnand %p6395_p2, %p9438_p8 }
 0x3b3   : > { %p6401_p5 = por %p6400_p13, %p6399_p3 }
 0x3b4   : > { %p6397_p6 = pneg %p6396_p7 }
 0x3b5   : > { %p6403_p9 = por %p6402_p12, %p6401_p5 }
 0x3b7   : > { %p6404_p10 = pnand %p6403_p9, %p6397_p6 }
 0x3b9   : > { %6407 = shalt.err (!%p6404_p10)
}
 0x3ba   : > { %s6460_s10 = smov 128   ;;  %s6461_s29 = smov 8  }
 0x3bb   : > { %6201 = dma.vmem_to_hbm [thread:$0]  (%p9438_p8), %s8893_s9, 512, %s8891_s30, %s4930_s19, %s6460_s10, %s6460_s10, %s6461_s29  }
 0x3bc PF: > { %p6218_p1 = scmp.ge.s32.totalorder %s6450_s18, 2  ;;  %s4958_s20 = sand.u32 1, %s6438_s15  }
 0x3bd   : > { %p9439_p4 = scmp.ne.s32.totalorder %s9098_s28, 0  ;;  %s4959_s25 = scalar_lea.sflag [#allocation4], %s4958_s20 }
 0x3bf   : > { %p6212_p11 = pnand %p6218_p1, %p9439_p4 }
 0x3c1   : > { %6433 = dma.done.wait (!%p6212_p11), %s4959_s25, 512  }
 0x3c2   : > { %6435 = vsyncadd (!%p6212_p11), %s4959_s25, 4294966784  ;;  %p18_p0 = scmp.ge.s32.totalorder %s6512_s21, 10   ;;  %s9440_s15 = smov %s6442_s16 }
 0x3c3   : > { %s9441_s16 = smov %s6446_s17  ;;  %s9442_s17 = smov %s6524_s24 }
 0x3c4   : > { %s9443_s18 = smov %s6512_s21  ;;  %20 = sbr.rel (!%p18_p0) target bundleno = 6 (0x6), region = 89 }
 0x3cb   :  { %4964 = vsyncpa [#allocation3], 1 }
 0x3cc   :  { %4966 = vsyncpa [#allocation3 + $0x1], 1 }
 0x3cd   :  { %4967 = vsyncpa [#allocation4], 1 }
 0x3ce   :  { %4969 = vsyncpa [#allocation4 + $0x1], 1 }
 0x3cf   :  { %4970 = vsyncpa [#allocation5], 1 }
 0x3d0   :  { %4972 = vsyncpa [#allocation5 + $0x1], 1 }

</bundles_post_ra>
